<compile_context>
chip_gen: v6e
topology: v6e:2x2x1
jax: 0.10.0
libtpu: 0.0.40
codegen_flags: <defaults>
</compile_context>

<pallas_src>
import functools

import jax
import jax.numpy as jnp
from jax import lax
from jax.experimental import pallas as pl
from jax.experimental.pallas import tpu as pltpu

EPS = 1e-5


def _se_block_kernel(H, x_ref, w1_ref, b1_ref, w2_ref, b2_ref,
                     fc1w_ref, fc1b_ref, fc2w_ref, fc2b_ref,
                     pool_ref, expand_ref, seg_ref, segT_ref,
                     out_ref, patch_ref):
    # x_ref/out_ref: (IMGS*H, L) f32, L = W*C  (IMGS images per grid step, lane-dense)
    # w{1,2}_ref:    (9*L, L) bf16 block-diagonal conv weights (BN folded, dw edge
    #                masks folded in as zeroed block rows)
    # b{1,2}_ref:    (1, L)  f32 folded bias tiled across W
    # pool_ref:      (L, C)  one-hot lane->channel pooling matrix   (hoisted const)
    # expand_ref:    (C, L)  one-hot channel->lane broadcast matrix (hoisted const)
    # seg_ref:       (IMGS, IMGS*H) one-hot row->image segment matrix
    # segT_ref:      (IMGS*H, IMGS) its transpose
    # patch_ref:     (IMGS*H, 9*L) bf16 VMEM im2col scratch (shared by both convs)
    rows, L = x_ref.shape
    C = pool_ref.shape[1]
    W = L // C
    inv_hw = 1.0 / float(H * W)

    x = x_ref[...]                                              # f32 residual

    # dh row-validity masks (per image inside the packed block), built once and
    # reused by both convs.  dw validity is folded into the weights host-side.
    row_mod = lax.broadcasted_iota(jnp.int32, (rows, L), 0) % H
    mask_up = row_mod > 0                                       # dh = -1 valid
    mask_dn = row_mod < (H - 1)                                 # dh = +1 valid

    def build_patches(inp):
        # Three dw lane-rolled copies computed once and shared across dh taps
        # (2 lane rolls + 6 sublane rolls per conv).  Rolls/masks stay f32;
        # bf16 cast happens only at the patch store (MXU input dtype).
        copies = (pltpu.roll(inp, shift=C, axis=1),             # dw = -1
                  inp,                                          # dw =  0
                  pltpu.roll(inp, shift=L - C, axis=1))         # dw = +1
        t = 0
        for dh in (-1, 0, 1):
            for dw in (-1, 0, 1):
                v = copies[dw + 1]
                if dh == -1:
                    v = jnp.where(mask_up, pltpu.roll(v, shift=1, axis=0), 0.0)
                elif dh == 1:
                    v = jnp.where(mask_dn, pltpu.roll(v, shift=rows - 1, axis=0), 0.0)
                patch_ref[:, t * L:(t + 1) * L] = v.astype(jnp.bfloat16)
                t += 1

    # conv1 (BN folded) + ReLU: one (rows, 9L) @ (9L, L) bf16 MXU matmul, f32 acc
    build_patches(x)
    h1 = jnp.maximum(
        jnp.dot(patch_ref[...], w1_ref[...], preferred_element_type=jnp.float32)
        + b1_ref[...], 0.0)

    # conv2 (BN folded)
    build_patches(h1)
    h2 = (jnp.dot(patch_ref[...], w2_ref[...], preferred_element_type=jnp.float32)
          + b2_ref[...])

    # --- SE: per-image global average pool -> fc1 -> ReLU -> fc2 -> sigmoid ---
    row_sum = jnp.dot(seg_ref[...], h2,
                      preferred_element_type=jnp.float32)                     # (IMGS, L)
    y = jnp.dot(row_sum, pool_ref[...],
                preferred_element_type=jnp.float32) * inv_hw                  # (IMGS, C)
    y1 = jnp.maximum(
        jnp.dot(y, fc1w_ref[...], preferred_element_type=jnp.float32)
        + fc1b_ref[...], 0.0)                                                 # (IMGS, C//r)
    s = jax.nn.sigmoid(
        jnp.dot(y1, fc2w_ref[...], preferred_element_type=jnp.float32)
        + fc2b_ref[...])                                                      # (IMGS, C)

    # broadcast s back to (rows, L) via the host-built one-hot matrices
    s_lane = jnp.dot(s, expand_ref[...], preferred_element_type=jnp.float32)  # (IMGS, L)
    s_full = jnp.dot(segT_ref[...], s_lane,
                     preferred_element_type=jnp.float32)                      # (rows, L)

    # SE scale + residual add + final ReLU, lane-dense unmasked store
    out_ref[...] = jnp.maximum(h2 * s_full + x, 0.0).astype(out_ref.dtype)


def _fold_bn(w_hwio, g, b, m, v):
    # Eval-mode BN folded into the conv.  Done entirely in f32; the bf16 cast
    # happens later in _conv_weight_mat (precision of the folded scale is kept).
    scale = g * lax.rsqrt(v + EPS)                              # (C,)
    return w_hwio * scale[None, None, None, :], b - m * scale


def _conv_weight_mat(w_hwio, W, dtype=jnp.bfloat16):
    # (3,3,Cin,Cout) -> (9*W*C, W*C): per-tap block-diagonal kron(I_W, K[kh,kw]).
    # The lane-wrap rows of the dw=+-1 tap blocks are zeroed so the kernel's
    # lane roll wraparound contributes nothing (no in-kernel dw masks needed).
    C = w_hwio.shape[2]
    eye_w = jnp.eye(W, dtype=jnp.float32)
    blocks = []
    for kh in range(3):
        for kw in range(3):
            blk = jnp.kron(eye_w, w_hwio[kh, kw].astype(jnp.float32))  # (WC, WC)
            dw = kw - 1
            if dw == -1:
                blk = blk.at[:C, :].set(0.0)                # w=0 has no left nbr
            elif dw == 1:
                blk = blk.at[(W - 1) * C:, :].set(0.0)      # w=W-1 has no right nbr
            blocks.append(blk)
    return jnp.concatenate(blocks, axis=0).astype(dtype)


def _pick_imgs_per_step(B, H):
    # Target ~256 rows per MXU matmul (fills the v6e/v7x M dimension), but keep
    # the grid length >= 2 so dimension_semantics=("parallel",) still shards
    # across v7x's two TensorCores, and require IMGS to divide B.
    imgs = min(B, max(1, 256 // H))
    while imgs > 1 and (B % imgs != 0 or (B // imgs) < 2):
        imgs -= 1
    return imgs


def se_basic_block(x_nchw, params, imgs_per_step=None):
    """x_nchw: (B, C, H, W) float32 (PyTorch layout). Returns (B, C, H, W)."""
    B, C, H, W = x_nchw.shape
    L = W * C
    # Lane-dense layout assumptions (explicit per review correctness note).
    assert L % 128 == 0 and H % 8 == 0, "need W*C % 128 == 0 and H % 8 == 0"
    # TODO(synk): non-lane-aligned shapes (e.g. W=7, C=512), stride!=1/downsample
    #             variants and training-mode BN are not handled.
    # TODO(synk): at realistic channel counts the (9L, L) kron weights exceed
    #             VMEM (esp. v7x 64 MiB); switch to a split-K grid axis with an
    #             f32 accumulator, or C-lane im2col once C >= 128.

    imgs = imgs_per_step if imgs_per_step is not None else _pick_imgs_per_step(B, H)
    assert B % imgs == 0
    rows = imgs * H

    # TODO(synk): in a full network, keep activations in this (B*H, W*C) layout
    #             between blocks instead of paying NCHW<->NHWC transposes here.
    x_flat = jnp.transpose(x_nchw, (0, 2, 3, 1)).reshape(B * H, L)

    w1f, b1f = _fold_bn(params["w1"], params["g1"], params["b1"],
                        params["m1"], params["v1"])
    w2f, b2f = _fold_bn(params["w2"], params["g2"], params["b2"],
                        params["m2"], params["v2"])
    w1m = _conv_weight_mat(w1f, W)                              # (9L, L) bf16
    w2m = _conv_weight_mat(w2f, W)
    b1l = jnp.tile(b1f, W)[None, :].astype(jnp.float32)         # (1, L)
    b2l = jnp.tile(b2f, W)[None, :].astype(jnp.float32)

    Ch = params["fc1w"].shape[1]

    # Hoisted SE constants (no per-step iota/compare/one-hot rebuild in-kernel).
    lane = jnp.arange(L)
    pool_w = (lane[:, None] % C == jnp.arange(C)[None, :]).astype(jnp.float32)    # (L, C)
    expand_w = pool_w.T                                                            # (C, L)
    r_idx = jnp.arange(rows)
    seg = (r_idx[None, :] // H == jnp.arange(imgs)[:, None]).astype(jnp.float32)   # (IMGS, rows)
    segT = seg.T                                                                   # (rows, IMGS)

    cost = pl.CostEstimate(
        flops=int(2 * 2 * (B * H) * (9 * L) * L),               # two im2col matmuls
        transcendentals=int(B * C),                             # SE sigmoid
        bytes_accessed=int(2 * x_flat.size * 4                  # x in + out
                           + 2 * 9 * L * L * 2                  # bf16 conv weights
                           + 4 * L * 4),
    )

    # NOTE: the constant-index operands (weights/biases/fc/one-hots) are fetched
    # once since their index_map never changes; at realistic sizes they should
    # additionally be single-buffered to halve their VMEM footprint.
    const = lambda b: (0, 0)

    out_flat = pl.pallas_call(
        functools.partial(_se_block_kernel, H),
        out_shape=jax.ShapeDtypeStruct((B * H, L), jnp.float32),
        grid_spec=pltpu.PrefetchScalarGridSpec(
            num_scalar_prefetch=0,
            grid=(B // imgs,),
            in_specs=[
                pl.BlockSpec((rows, L), lambda b: (b, 0)),      # x  (IMGS images/step)
                pl.BlockSpec((9 * L, L), const),                # w1 (resident, bf16)
                pl.BlockSpec((1, L), const),                    # b1
                pl.BlockSpec((9 * L, L), const),                # w2 (resident, bf16)
                pl.BlockSpec((1, L), const),                    # b2
                pl.BlockSpec((C, Ch), const),                   # fc1w
                pl.BlockSpec((1, Ch), const),                   # fc1b
                pl.BlockSpec((Ch, C), const),                   # fc2w
                pl.BlockSpec((1, C), const),                    # fc2b
                pl.BlockSpec((L, C), const),                    # pool one-hot
                pl.BlockSpec((C, L), const),                    # expand one-hot
                pl.BlockSpec((imgs, rows), const),              # seg
                pl.BlockSpec((rows, imgs), const),              # segT
            ],
            out_specs=pl.BlockSpec((rows, L), lambda b: (b, 0)),
            scratch_shapes=[pltpu.VMEM((rows, 9 * L), jnp.bfloat16)],
        ),
        compiler_params=pltpu.CompilerParams(
            dimension_semantics=("parallel",)),
        cost_estimate=cost,
    )(x_flat, w1m, b1l, w2m, b2l,
      params["fc1w"].astype(jnp.float32), params["fc1b"].astype(jnp.float32),
      params["fc2w"].astype(jnp.float32), params["fc2b"].astype(jnp.float32),
      pool_w, expand_w, seg, segT)

    return jnp.transpose(out_flat.reshape(B, H, W, C), (0, 3, 1, 2))


# ---------------- pure-JAX reference (unfolded BN, f32, for correctness) ----------------
def reference_forward(x_nchw, p):
    x = jnp.transpose(x_nchw, (0, 2, 3, 1))                     # NHWC

    def conv(h, w_hwio):
        return lax.conv_general_dilated(
            h, w_hwio, window_strides=(1, 1), padding="SAME",
            dimension_numbers=("NHWC", "HWIO", "NHWC"))

    def bn(h, g, b, m, v):
        return (h - m) * (g / jnp.sqrt(v + EPS)) + b

    residual = x
    h = jnp.maximum(bn(conv(x, p["w1"]), p["g1"], p["b1"], p["m1"], p["v1"]), 0.0)
    h = bn(conv(h, p["w2"]), p["g2"], p["b2"], p["m2"], p["v2"])
    y = jnp.mean(h, axis=(1, 2))                                # (B, C)
    y1 = jnp.maximum(y @ p["fc1w"] + p["fc1b"], 0.0)
    s = jax.nn.sigmoid(y1 @ p["fc2w"] + p["fc2b"])              # (B, C)
    h = h * s[:, None, None, :]
    out = jnp.maximum(h + residual, 0.0)
    return jnp.transpose(out, (0, 3, 1, 2))


if __name__ == "__main__":
    B, H, W = 8, 16, 16                 # B=8 so images are packed 4/step, grid=2
    C = 8                               # inplanes == planes, stride=1, no downsample
    reduction = 4
    Ch = C // reduction

    key = jax.random.PRNGKey(0)
    ks = jax.random.split(key, 16)

    params = {
        # conv weights in HWIO (3,3,Cin,Cout) == torch (Cout,Cin,3,3).transpose(2,3,1,0)
        "w1": jax.random.normal(ks[0], (3, 3, C, C), jnp.float32) * 0.1,
        "w2": jax.random.normal(ks[1], (3, 3, C, C), jnp.float32) * 0.1,
        # bn1 / bn2 parameters + running stats (eval mode)
        "g1": 1.0 + 0.1 * jax.random.normal(ks[2], (C,), jnp.float32),
        "b1": 0.1 * jax.random.normal(ks[3], (C,), jnp.float32),
        "m1": 0.1 * jax.random.normal(ks[4], (C,), jnp.float32),
        "v1": jax.random.uniform(ks[5], (C,), jnp.float32, 0.5, 1.5),
        "g2": 1.0 + 0.1 * jax.random.normal(ks[6], (C,), jnp.float32),
        "b2": 0.1 * jax.random.normal(ks[7], (C,), jnp.float32),
        "m2": 0.1 * jax.random.normal(ks[8], (C,), jnp.float32),
        "v2": jax.random.uniform(ks[9], (C,), jnp.float32, 0.5, 1.5),
        # SE fc weights pre-transposed so forward is y @ W + b
        "fc1w": jax.random.normal(ks[10], (C, Ch), jnp.float32) * 0.2,
        "fc1b": 0.1 * jax.random.normal(ks[11], (1, Ch), jnp.float32),
        "fc2w": jax.random.normal(ks[12], (Ch, C), jnp.float32) * 0.2,
        "fc2b": 0.1 * jax.random.normal(ks[13], (1, C), jnp.float32),
    }

    # PyTorch-style NCHW input
    x = jax.random.normal(ks[14], (B, C, H, W), jnp.float32)

    out = jax.block_until_ready(se_basic_block(x, params))
    ref = reference_forward(x, params)

    assert out.shape == (B, C, H, W)
    max_err = float(jnp.max(jnp.abs(out - ref)))
    # bf16 MXU path vs f32 reference -> relaxed (but still bug-catching) tolerance
    assert jnp.allclose(out, ref, atol=5e-2, rtol=5e-2), max_err

    print("KERNEL_OK")
</pallas_src>

<mosaic_0001>
module attributes {stable_mosaic.version = 11 : i64} {
  func.func @_se_block_kernel(%arg0: i32, %arg1: memref<64x128xf32, #tpu.memory_space<vmem>>, %arg2: memref<1152x128xbf16, #tpu.memory_space<vmem>>, %arg3: memref<1x128xf32, #tpu.memory_space<vmem>>, %arg4: memref<1152x128xbf16, #tpu.memory_space<vmem>>, %arg5: memref<1x128xf32, #tpu.memory_space<vmem>>, %arg6: memref<8x2xf32, #tpu.memory_space<vmem>>, %arg7: memref<1x2xf32, #tpu.memory_space<vmem>>, %arg8: memref<2x8xf32, #tpu.memory_space<vmem>>, %arg9: memref<1x8xf32, #tpu.memory_space<vmem>>, %arg10: memref<128x8xf32, #tpu.memory_space<vmem>>, %arg11: memref<8x128xf32, #tpu.memory_space<vmem>>, %arg12: memref<4x64xf32, #tpu.memory_space<vmem>>, %arg13: memref<64x4xf32, #tpu.memory_space<vmem>>, %arg14: memref<64x128xf32, #tpu.memory_space<vmem>>, %arg15: memref<64x1152xbf16, #tpu.memory_space<vmem>>) attributes {dimension_semantics = [#tpu.dimension_semantics<parallel>], iteration_bounds = array<i64: 2>, scalar_prefetch = 0 : i64, scratch_operands = 1 : i64, tpu.core_type = #tpu.core_type<tc>, window_params = [{transform_indices = @transform_0, window_bounds = array<i64: 64, 128>}, {pipeline_mode = #tpu.pipeline_mode<synchronous>, transform_indices = @transform_1, window_bounds = array<i64: 1152, 128>}, {pipeline_mode = #tpu.pipeline_mode<synchronous>, transform_indices = @transform_2, window_bounds = array<i64: 1, 128>}, {pipeline_mode = #tpu.pipeline_mode<synchronous>, transform_indices = @transform_3, window_bounds = array<i64: 1152, 128>}, {pipeline_mode = #tpu.pipeline_mode<synchronous>, transform_indices = @transform_4, window_bounds = array<i64: 1, 128>}, {pipeline_mode = #tpu.pipeline_mode<synchronous>, transform_indices = @transform_5, window_bounds = array<i64: 8, 2>}, {pipeline_mode = #tpu.pipeline_mode<synchronous>, transform_indices = @transform_6, window_bounds = array<i64: 1, 2>}, {pipeline_mode = #tpu.pipeline_mode<synchronous>, transform_indices = @transform_7, window_bounds = array<i64: 2, 8>}, {pipeline_mode = #tpu.pipeline_mode<synchronous>, transform_indices = @transform_8, window_bounds = array<i64: 1, 8>}, {pipeline_mode = #tpu.pipeline_mode<synchronous>, transform_indices = @transform_9, window_bounds = array<i64: 128, 8>}, {pipeline_mode = #tpu.pipeline_mode<synchronous>, transform_indices = @transform_10, window_bounds = array<i64: 8, 128>}, {pipeline_mode = #tpu.pipeline_mode<synchronous>, transform_indices = @transform_11, window_bounds = array<i64: 4, 64>}, {pipeline_mode = #tpu.pipeline_mode<synchronous>, transform_indices = @transform_12, window_bounds = array<i64: 64, 4>}, {transform_indices = @transform_13, window_bounds = array<i64: 64, 128>}]} {
    %c0 = arith.constant 0 : index
    %c0_0 = arith.constant 0 : index
    %0 = vector.load %arg1[%c0, %c0_0] : memref<64x128xf32, #tpu.memory_space<vmem>>, vector<64x128xf32>
    %1 = tpu.iota {dimensions = array<i32: 0>} : vector<64x128xi32>
    %c16_i32 = arith.constant 16 : i32
    %c0_i32 = arith.constant 0 : i32
    %2 = arith.cmpi eq, %c16_i32, %c0_i32 : i32
    %c1_i32 = arith.constant 1 : i32
    %3 = arith.select %2, %c1_i32, %c16_i32 : i32
    %4 = vector.broadcast %3 : i32 to vector<64x128xi32>
    %5 = arith.remsi %1, %4 : vector<64x128xi32>
    %c0_i32_1 = arith.constant 0 : i32
    %6 = vector.broadcast %c0_i32_1 : i32 to vector<64x128xi32>
    %7 = arith.cmpi ne, %5, %6 : vector<64x128xi32>
    %c0_i32_2 = arith.constant 0 : i32
    %8 = vector.broadcast %c0_i32_2 : i32 to vector<64x128xi32>
    %9 = arith.cmpi slt, %5, %8 : vector<64x128xi32>
    %c0_i32_3 = arith.constant 0 : i32
    %10 = arith.cmpi slt, %3, %c0_i32_3 : i32
    %11 = vector.broadcast %10 : i1 to vector<64x128xi1>
    %12 = vector.broadcast %11 : vector<64x128xi1> to vector<64x128xi1>
    %13 = arith.xori %9, %12 : vector<64x128xi1>
    %14 = arith.andi %13, %7 : vector<64x128xi1>
    %15 = vector.broadcast %3 : i32 to vector<64x128xi32>
    %16 = arith.addi %5, %15 : vector<64x128xi32>
    %17 = arith.select %14, %16, %5 : vector<64x128xi1>, vector<64x128xi32>
    %c0_i32_4 = arith.constant 0 : i32
    %18 = vector.broadcast %c0_i32_4 : i32 to vector<64x128xi32>
    %19 = arith.cmpi sgt, %17, %18 : vector<64x128xi32>
    %c15_i32 = arith.constant 15 : i32
    %20 = vector.broadcast %c15_i32 : i32 to vector<64x128xi32>
    %21 = arith.cmpi slt, %17, %20 : vector<64x128xi32>
    %c8_i32 = arith.constant 8 : i32
    %22 = tpu.dynamic_rotate %0 by %c8_i32 dim 1 : vector<64x128xf32>, i32 -> vector<64x128xf32>
    %c120_i32 = arith.constant 120 : i32
    %23 = tpu.dynamic_rotate %0 by %c120_i32 dim 1 : vector<64x128xf32>, i32 -> vector<64x128xf32>
    %c1_i32_5 = arith.constant 1 : i32
    %24 = tpu.dynamic_rotate %22 by %c1_i32_5 dim 0 : vector<64x128xf32>, i32 -> vector<64x128xf32>
    %cst = arith.constant 0.000000e+00 : f32
    %25 = vector.broadcast %cst : f32 to vector<64x128xf32>
    %26 = arith.select %19, %24, %25 : vector<64x128xi1>, vector<64x128xf32>
    %27 = arith.truncf %26 : vector<64x128xf32> to vector<64x128xbf16>
    %c0_6 = arith.constant 0 : index
    %c0_7 = arith.constant 0 : index
    %28 = vector.load %arg15[%c0_6, %c0_7] : memref<64x1152xbf16, #tpu.memory_space<vmem>>, vector<64x128xbf16>
    tpu.vector_store %arg15[%c0_6, %c0_7], %27 {strides = array<i32>} : memref<64x1152xbf16, #tpu.memory_space<vmem>>, vector<64x128xbf16>,
    %c1_i32_8 = arith.constant 1 : i32
    %29 = tpu.dynamic_rotate %0 by %c1_i32_8 dim 0 : vector<64x128xf32>, i32 -> vector<64x128xf32>
    %cst_9 = arith.constant 0.000000e+00 : f32
    %30 = vector.broadcast %cst_9 : f32 to vector<64x128xf32>
    %31 = arith.select %19, %29, %30 : vector<64x128xi1>, vector<64x128xf32>
    %32 = arith.truncf %31 : vector<64x128xf32> to vector<64x128xbf16>
    %c0_10 = arith.constant 0 : index
    %c128 = arith.constant 128 : index
    %33 = vector.load %arg15[%c0_10, %c128] : memref<64x1152xbf16, #tpu.memory_space<vmem>>, vector<64x128xbf16>
    tpu.vector_store %arg15[%c0_10, %c128], %32 {strides = array<i32>} : memref<64x1152xbf16, #tpu.memory_space<vmem>>, vector<64x128xbf16>,
    %c1_i32_11 = arith.constant 1 : i32
    %34 = tpu.dynamic_rotate %23 by %c1_i32_11 dim 0 : vector<64x128xf32>, i32 -> vector<64x128xf32>
    %cst_12 = arith.constant 0.000000e+00 : f32
    %35 = vector.broadcast %cst_12 : f32 to vector<64x128xf32>
    %36 = arith.select %19, %34, %35 : vector<64x128xi1>, vector<64x128xf32>
    %37 = arith.truncf %36 : vector<64x128xf32> to vector<64x128xbf16>
    %c0_13 = arith.constant 0 : index
    %c256 = arith.constant 256 : index
    %38 = vector.load %arg15[%c0_13, %c256] : memref<64x1152xbf16, #tpu.memory_space<vmem>>, vector<64x128xbf16>
    tpu.vector_store %arg15[%c0_13, %c256], %37 {strides = array<i32>} : memref<64x1152xbf16, #tpu.memory_space<vmem>>, vector<64x128xbf16>,
    %39 = arith.truncf %22 : vector<64x128xf32> to vector<64x128xbf16>
    %c0_14 = arith.constant 0 : index
    %c384 = arith.constant 384 : index
    %40 = vector.load %arg15[%c0_14, %c384] : memref<64x1152xbf16, #tpu.memory_space<vmem>>, vector<64x128xbf16>
    tpu.vector_store %arg15[%c0_14, %c384], %39 {strides = array<i32>} : memref<64x1152xbf16, #tpu.memory_space<vmem>>, vector<64x128xbf16>,
    %41 = arith.truncf %0 : vector<64x128xf32> to vector<64x128xbf16>
    %c0_15 = arith.constant 0 : index
    %c512 = arith.constant 512 : index
    %42 = vector.load %arg15[%c0_15, %c512] : memref<64x1152xbf16, #tpu.memory_space<vmem>>, vector<64x128xbf16>
    tpu.vector_store %arg15[%c0_15, %c512], %41 {strides = array<i32>} : memref<64x1152xbf16, #tpu.memory_space<vmem>>, vector<64x128xbf16>,
    %43 = arith.truncf %23 : vector<64x128xf32> to vector<64x128xbf16>
    %c0_16 = arith.constant 0 : index
    %c640 = arith.constant 640 : index
    %44 = vector.load %arg15[%c0_16, %c640] : memref<64x1152xbf16, #tpu.memory_space<vmem>>, vector<64x128xbf16>
    tpu.vector_store %arg15[%c0_16, %c640], %43 {strides = array<i32>} : memref<64x1152xbf16, #tpu.memory_space<vmem>>, vector<64x128xbf16>,
    %c63_i32 = arith.constant 63 : i32
    %45 = tpu.dynamic_rotate %22 by %c63_i32 dim 0 : vector<64x128xf32>, i32 -> vector<64x128xf32>
    %cst_17 = arith.constant 0.000000e+00 : f32
    %46 = vector.broadcast %cst_17 : f32 to vector<64x128xf32>
    %47 = arith.select %21, %45, %46 : vector<64x128xi1>, vector<64x128xf32>
    %48 = arith.truncf %47 : vector<64x128xf32> to vector<64x128xbf16>
    %c0_18 = arith.constant 0 : index
    %c768 = arith.constant 768 : index
    %49 = vector.load %arg15[%c0_18, %c768] : memref<64x1152xbf16, #tpu.memory_space<vmem>>, vector<64x128xbf16>
    tpu.vector_store %arg15[%c0_18, %c768], %48 {strides = array<i32>} : memref<64x1152xbf16, #tpu.memory_space<vmem>>, vector<64x128xbf16>,
    %c63_i32_19 = arith.constant 63 : i32
    %50 = tpu.dynamic_rotate %0 by %c63_i32_19 dim 0 : vector<64x128xf32>, i32 -> vector<64x128xf32>
    %cst_20 = arith.constant 0.000000e+00 : f32
    %51 = vector.broadcast %cst_20 : f32 to vector<64x128xf32>
    %52 = arith.select %21, %50, %51 : vector<64x128xi1>, vector<64x128xf32>
    %53 = arith.truncf %52 : vector<64x128xf32> to vector<64x128xbf16>
    %c0_21 = arith.constant 0 : index
    %c896 = arith.constant 896 : index
    %54 = vector.load %arg15[%c0_21, %c896] : memref<64x1152xbf16, #tpu.memory_space<vmem>>, vector<64x128xbf16>
    tpu.vector_store %arg15[%c0_21, %c896], %53 {strides = array<i32>} : memref<64x1152xbf16, #tpu.memory_space<vmem>>, vector<64x128xbf16>,
    %c63_i32_22 = arith.constant 63 : i32
    %55 = tpu.dynamic_rotate %23 by %c63_i32_22 dim 0 : vector<64x128xf32>, i32 -> vector<64x128xf32>
    %cst_23 = arith.constant 0.000000e+00 : f32
    %56 = vector.broadcast %cst_23 : f32 to vector<64x128xf32>
    %57 = arith.select %21, %55, %56 : vector<64x128xi1>, vector<64x128xf32>
    %58 = arith.truncf %57 : vector<64x128xf32> to vector<64x128xbf16>
    %c0_24 = arith.constant 0 : index
    %c1024 = arith.constant 1024 : index
    %59 = vector.load %arg15[%c0_24, %c1024] : memref<64x1152xbf16, #tpu.memory_space<vmem>>, vector<64x128xbf16>
    tpu.vector_store %arg15[%c0_24, %c1024], %58 {strides = array<i32>} : memref<64x1152xbf16, #tpu.memory_space<vmem>>, vector<64x128xbf16>,
    %c0_25 = arith.constant 0 : index
    %c0_26 = arith.constant 0 : index
    %60 = vector.load %arg15[%c0_25, %c0_26] : memref<64x1152xbf16, #tpu.memory_space<vmem>>, vector<64x1152xbf16>
    %c0_27 = arith.constant 0 : index
    %c0_28 = arith.constant 0 : index
    %61 = vector.load %arg2[%c0_27, %c0_28] : memref<1152x128xbf16, #tpu.memory_space<vmem>>, vector<1152x128xbf16>
    %cst_29 = arith.constant dense<0.000000e+00> : vector<64x128xf32>
    %62 = tpu.matmul %60, %61, %cst_29 {dimension_numbers = #tpu.dot_dimension_numbers<[1], [0], [0], [1], [0, 0, 1, 1], [], []>} : vector<64x1152xbf16>, vector<1152x128xbf16>, vector<64x128xf32> -> vector<64x128xf32>
    %c0_30 = arith.constant 0 : index
    %c0_31 = arith.constant 0 : index
    %63 = vector.load %arg3[%c0_30, %c0_31] : memref<1x128xf32, #tpu.memory_space<vmem>>, vector<1x128xf32>
    %64 = vector.broadcast %63 : vector<1x128xf32> to vector<64x128xf32>
    %65 = arith.addf %62, %64 : vector<64x128xf32>
    %cst_32 = arith.constant 0.000000e+00 : f32
    %66 = vector.broadcast %cst_32 : f32 to vector<64x128xf32>
    %67 = arith.maximumf %65, %66 : vector<64x128xf32>
    %c8_i32_33 = arith.constant 8 : i32
    %68 = tpu.dynamic_rotate %67 by %c8_i32_33 dim 1 : vector<64x128xf32>, i32 -> vector<64x128xf32>
    %c120_i32_34 = arith.constant 120 : i32
    %69 = tpu.dynamic_rotate %67 by %c120_i32_34 dim 1 : vector<64x128xf32>, i32 -> vector<64x128xf32>
    %c1_i32_35 = arith.constant 1 : i32
    %70 = tpu.dynamic_rotate %68 by %c1_i32_35 dim 0 : vector<64x128xf32>, i32 -> vector<64x128xf32>
    %cst_36 = arith.constant 0.000000e+00 : f32
    %71 = vector.broadcast %cst_36 : f32 to vector<64x128xf32>
    %72 = arith.select %19, %70, %71 : vector<64x128xi1>, vector<64x128xf32>
    %73 = arith.truncf %72 : vector<64x128xf32> to vector<64x128xbf16>
    %c0_37 = arith.constant 0 : index
    %c0_38 = arith.constant 0 : index
    %74 = vector.load %arg15[%c0_37, %c0_38] : memref<64x1152xbf16, #tpu.memory_space<vmem>>, vector<64x128xbf16>
    tpu.vector_store %arg15[%c0_37, %c0_38], %73 {strides = array<i32>} : memref<64x1152xbf16, #tpu.memory_space<vmem>>, vector<64x128xbf16>,
    %c1_i32_39 = arith.constant 1 : i32
    %75 = tpu.dynamic_rotate %67 by %c1_i32_39 dim 0 : vector<64x128xf32>, i32 -> vector<64x128xf32>
    %cst_40 = arith.constant 0.000000e+00 : f32
    %76 = vector.broadcast %cst_40 : f32 to vector<64x128xf32>
    %77 = arith.select %19, %75, %76 : vector<64x128xi1>, vector<64x128xf32>
    %78 = arith.truncf %77 : vector<64x128xf32> to vector<64x128xbf16>
    %c0_41 = arith.constant 0 : index
    %c128_42 = arith.constant 128 : index
    %79 = vector.load %arg15[%c0_41, %c128_42] : memref<64x1152xbf16, #tpu.memory_space<vmem>>, vector<64x128xbf16>
    tpu.vector_store %arg15[%c0_41, %c128_42], %78 {strides = array<i32>} : memref<64x1152xbf16, #tpu.memory_space<vmem>>, vector<64x128xbf16>,
    %c1_i32_43 = arith.constant 1 : i32
    %80 = tpu.dynamic_rotate %69 by %c1_i32_43 dim 0 : vector<64x128xf32>, i32 -> vector<64x128xf32>
    %cst_44 = arith.constant 0.000000e+00 : f32
    %81 = vector.broadcast %cst_44 : f32 to vector<64x128xf32>
    %82 = arith.select %19, %80, %81 : vector<64x128xi1>, vector<64x128xf32>
    %83 = arith.truncf %82 : vector<64x128xf32> to vector<64x128xbf16>
    %c0_45 = arith.constant 0 : index
    %c256_46 = arith.constant 256 : index
    %84 = vector.load %arg15[%c0_45, %c256_46] : memref<64x1152xbf16, #tpu.memory_space<vmem>>, vector<64x128xbf16>
    tpu.vector_store %arg15[%c0_45, %c256_46], %83 {strides = array<i32>} : memref<64x1152xbf16, #tpu.memory_space<vmem>>, vector<64x128xbf16>,
    %85 = arith.truncf %68 : vector<64x128xf32> to vector<64x128xbf16>
    %c0_47 = arith.constant 0 : index
    %c384_48 = arith.constant 384 : index
    %86 = vector.load %arg15[%c0_47, %c384_48] : memref<64x1152xbf16, #tpu.memory_space<vmem>>, vector<64x128xbf16>
    tpu.vector_store %arg15[%c0_47, %c384_48], %85 {strides = array<i32>} : memref<64x1152xbf16, #tpu.memory_space<vmem>>, vector<64x128xbf16>,
    %87 = arith.truncf %67 : vector<64x128xf32> to vector<64x128xbf16>
    %c0_49 = arith.constant 0 : index
    %c512_50 = arith.constant 512 : index
    %88 = vector.load %arg15[%c0_49, %c512_50] : memref<64x1152xbf16, #tpu.memory_space<vmem>>, vector<64x128xbf16>
    tpu.vector_store %arg15[%c0_49, %c512_50], %87 {strides = array<i32>} : memref<64x1152xbf16, #tpu.memory_space<vmem>>, vector<64x128xbf16>,
    %89 = arith.truncf %69 : vector<64x128xf32> to vector<64x128xbf16>
    %c0_51 = arith.constant 0 : index
    %c640_52 = arith.constant 640 : index
    %90 = vector.load %arg15[%c0_51, %c640_52] : memref<64x1152xbf16, #tpu.memory_space<vmem>>, vector<64x128xbf16>
    tpu.vector_store %arg15[%c0_51, %c640_52], %89 {strides = array<i32>} : memref<64x1152xbf16, #tpu.memory_space<vmem>>, vector<64x128xbf16>,
    %c63_i32_53 = arith.constant 63 : i32
    %91 = tpu.dynamic_rotate %68 by %c63_i32_53 dim 0 : vector<64x128xf32>, i32 -> vector<64x128xf32>
    %cst_54 = arith.constant 0.000000e+00 : f32
    %92 = vector.broadcast %cst_54 : f32 to vector<64x128xf32>
    %93 = arith.select %21, %91, %92 : vector<64x128xi1>, vector<64x128xf32>
    %94 = arith.truncf %93 : vector<64x128xf32> to vector<64x128xbf16>
    %c0_55 = arith.constant 0 : index
    %c768_56 = arith.constant 768 : index
    %95 = vector.load %arg15[%c0_55, %c768_56] : memref<64x1152xbf16, #tpu.memory_space<vmem>>, vector<64x128xbf16>
    tpu.vector_store %arg15[%c0_55, %c768_56], %94 {strides = array<i32>} : memref<64x1152xbf16, #tpu.memory_space<vmem>>, vector<64x128xbf16>,
    %c63_i32_57 = arith.constant 63 : i32
    %96 = tpu.dynamic_rotate %67 by %c63_i32_57 dim 0 : vector<64x128xf32>, i32 -> vector<64x128xf32>
    %cst_58 = arith.constant 0.000000e+00 : f32
    %97 = vector.broadcast %cst_58 : f32 to vector<64x128xf32>
    %98 = arith.select %21, %96, %97 : vector<64x128xi1>, vector<64x128xf32>
    %99 = arith.truncf %98 : vector<64x128xf32> to vector<64x128xbf16>
    %c0_59 = arith.constant 0 : index
    %c896_60 = arith.constant 896 : index
    %100 = vector.load %arg15[%c0_59, %c896_60] : memref<64x1152xbf16, #tpu.memory_space<vmem>>, vector<64x128xbf16>
    tpu.vector_store %arg15[%c0_59, %c896_60], %99 {strides = array<i32>} : memref<64x1152xbf16, #tpu.memory_space<vmem>>, vector<64x128xbf16>,
    %c63_i32_61 = arith.constant 63 : i32
    %101 = tpu.dynamic_rotate %69 by %c63_i32_61 dim 0 : vector<64x128xf32>, i32 -> vector<64x128xf32>
    %cst_62 = arith.constant 0.000000e+00 : f32
    %102 = vector.broadcast %cst_62 : f32 to vector<64x128xf32>
    %103 = arith.select %21, %101, %102 : vector<64x128xi1>, vector<64x128xf32>
    %104 = arith.truncf %103 : vector<64x128xf32> to vector<64x128xbf16>
    %c0_63 = arith.constant 0 : index
    %c1024_64 = arith.constant 1024 : index
    %105 = vector.load %arg15[%c0_63, %c1024_64] : memref<64x1152xbf16, #tpu.memory_space<vmem>>, vector<64x128xbf16>
    tpu.vector_store %arg15[%c0_63, %c1024_64], %104 {strides = array<i32>} : memref<64x1152xbf16, #tpu.memory_space<vmem>>, vector<64x128xbf16>,
    %c0_65 = arith.constant 0 : index
    %c0_66 = arith.constant 0 : index
    %106 = vector.load %arg15[%c0_65, %c0_66] : memref<64x1152xbf16, #tpu.memory_space<vmem>>, vector<64x1152xbf16>
    %c0_67 = arith.constant 0 : index
    %c0_68 = arith.constant 0 : index
    %107 = vector.load %arg4[%c0_67, %c0_68] : memref<1152x128xbf16, #tpu.memory_space<vmem>>, vector<1152x128xbf16>
    %cst_69 = arith.constant dense<0.000000e+00> : vector<64x128xf32>
    %108 = tpu.matmul %106, %107, %cst_69 {dimension_numbers = #tpu.dot_dimension_numbers<[1], [0], [0], [1], [0, 0, 1, 1], [], []>} : vector<64x1152xbf16>, vector<1152x128xbf16>, vector<64x128xf32> -> vector<64x128xf32>
    %c0_70 = arith.constant 0 : index
    %c0_71 = arith.constant 0 : index
    %109 = vector.load %arg5[%c0_70, %c0_71] : memref<1x128xf32, #tpu.memory_space<vmem>>, vector<1x128xf32>
    %110 = vector.broadcast %109 : vector<1x128xf32> to vector<64x128xf32>
    %111 = arith.addf %108, %110 : vector<64x128xf32>
    %c0_72 = arith.constant 0 : index
    %c0_73 = arith.constant 0 : index
    %112 = vector.load %arg12[%c0_72, %c0_73] : memref<4x64xf32, #tpu.memory_space<vmem>>, vector<4x64xf32>
    %cst_74 = arith.constant dense<0.000000e+00> : vector<4x128xf32>
    %113 = tpu.matmul %112, %111, %cst_74 {dimension_numbers = #tpu.dot_dimension_numbers<[1], [0], [0], [1], [0, 0, 1, 1], [], []>} : vector<4x64xf32>, vector<64x128xf32>, vector<4x128xf32> -> vector<4x128xf32>
    %c0_75 = arith.constant 0 : index
    %c0_76 = arith.constant 0 : index
    %114 = vector.load %arg10[%c0_75, %c0_76] : memref<128x8xf32, #tpu.memory_space<vmem>>, vector<128x8xf32>
    %cst_77 = arith.constant dense<0.000000e+00> : vector<4x8xf32>
    %115 = tpu.matmul %113, %114, %cst_77 {dimension_numbers = #tpu.dot_dimension_numbers<[1], [0], [0], [1], [0, 0, 1, 1], [], []>} : vector<4x128xf32>, vector<128x8xf32>, vector<4x8xf32> -> vector<4x8xf32>
    %cst_78 = arith.constant 3.906250e-03 : f32
    %116 = vector.broadcast %cst_78 : f32 to vector<4x8xf32>
    %117 = arith.mulf %115, %116 : vector<4x8xf32>
    %c0_79 = arith.constant 0 : index
    %c0_80 = arith.constant 0 : index
    %118 = vector.load %arg6[%c0_79, %c0_80] : memref<8x2xf32, #tpu.memory_space<vmem>>, vector<8x2xf32>
    %cst_81 = arith.constant dense<0.000000e+00> : vector<4x2xf32>
    %119 = tpu.matmul %117, %118, %cst_81 {dimension_numbers = #tpu.dot_dimension_numbers<[1], [0], [0], [1], [0, 0, 1, 1], [], []>} : vector<4x8xf32>, vector<8x2xf32>, vector<4x2xf32> -> vector<4x2xf32>
    %c0_82 = arith.constant 0 : index
    %c0_83 = arith.constant 0 : index
    %120 = vector.load %arg7[%c0_82, %c0_83] : memref<1x2xf32, #tpu.memory_space<vmem>>, vector<1x2xf32>
    %121 = vector.broadcast %120 : vector<1x2xf32> to vector<4x2xf32>
    %122 = arith.addf %119, %121 : vector<4x2xf32>
    %cst_84 = arith.constant 0.000000e+00 : f32
    %123 = vector.broadcast %cst_84 : f32 to vector<4x2xf32>
    %124 = arith.maximumf %122, %123 : vector<4x2xf32>
    %c0_85 = arith.constant 0 : index
    %c0_86 = arith.constant 0 : index
    %125 = vector.load %arg8[%c0_85, %c0_86] : memref<2x8xf32, #tpu.memory_space<vmem>>, vector<2x8xf32>
    %cst_87 = arith.constant dense<0.000000e+00> : vector<4x8xf32>
    %126 = tpu.matmul %124, %125, %cst_87 {dimension_numbers = #tpu.dot_dimension_numbers<[1], [0], [0], [1], [0, 0, 1, 1], [], []>} : vector<4x2xf32>, vector<2x8xf32>, vector<4x8xf32> -> vector<4x8xf32>
    %c0_88 = arith.constant 0 : index
    %c0_89 = arith.constant 0 : index
    %127 = vector.load %arg9[%c0_88, %c0_89] : memref<1x8xf32, #tpu.memory_space<vmem>>, vector<1x8xf32>
    %128 = vector.broadcast %127 : vector<1x8xf32> to vector<4x8xf32>
    %129 = arith.addf %126, %128 : vector<4x8xf32>
    %130 = arith.negf %129 : vector<4x8xf32>
    %131 = math.exp %130 : vector<4x8xf32>
    %cst_90 = arith.constant 1.000000e+00 : f32
    %132 = vector.broadcast %cst_90 : f32 to vector<4x8xf32>
    %133 = arith.addf %132, %131 : vector<4x8xf32>
    %134 = arith.divf %132, %133 : vector<4x8xf32>
    %c0_91 = arith.constant 0 : index
    %c0_92 = arith.constant 0 : index
    %135 = vector.load %arg11[%c0_91, %c0_92] : memref<8x128xf32, #tpu.memory_space<vmem>>, vector<8x128xf32>
    %cst_93 = arith.constant dense<0.000000e+00> : vector<4x128xf32>
    %136 = tpu.matmul %134, %135, %cst_93 {dimension_numbers = #tpu.dot_dimension_numbers<[1], [0], [0], [1], [0, 0, 1, 1], [], []>} : vector<4x8xf32>, vector<8x128xf32>, vector<4x128xf32> -> vector<4x128xf32>
    %c0_94 = arith.constant 0 : index
    %c0_95 = arith.constant 0 : index
    %137 = vector.load %arg13[%c0_94, %c0_95] : memref<64x4xf32, #tpu.memory_space<vmem>>, vector<64x4xf32>
    %cst_96 = arith.constant dense<0.000000e+00> : vector<64x128xf32>
    %138 = tpu.matmul %137, %136, %cst_96 {dimension_numbers = #tpu.dot_dimension_numbers<[1], [0], [0], [1], [0, 0, 1, 1], [], []>} : vector<64x4xf32>, vector<4x128xf32>, vector<64x128xf32> -> vector<64x128xf32>
    %139 = arith.mulf %111, %138 : vector<64x128xf32>
    %140 = arith.addf %139, %0 : vector<64x128xf32>
    %cst_97 = arith.constant 0.000000e+00 : f32
    %141 = vector.broadcast %cst_97 : f32 to vector<64x128xf32>
    %142 = arith.maximumf %140, %141 : vector<64x128xf32>
    %c0_98 = arith.constant 0 : index
    %c0_99 = arith.constant 0 : index
    %143 = vector.load %arg14[%c0_98, %c0_99] : memref<64x128xf32, #tpu.memory_space<vmem>>, vector<64x128xf32>
    tpu.vector_store %arg14[%c0_98, %c0_99], %142 {strides = array<i32>} : memref<64x128xf32, #tpu.memory_space<vmem>>, vector<64x128xf32>,
    return
  }
  func.func @transform_0(%arg0: i32) -> (i32, i32) {
    %c0_i32 = arith.constant 0 : i32
    %c0_i32_0 = arith.constant 0 : i32
    return %arg0, %c0_i32 : i32, i32
  }
  func.func @transform_1(%arg0: i32) -> (i32, i32) {
    %c0_i32 = arith.constant 0 : i32
    %c0_i32_0 = arith.constant 0 : i32
    %c0_i32_1 = arith.constant 0 : i32
    return %c0_i32, %c0_i32_0 : i32, i32
  }
  func.func @transform_2(%arg0: i32) -> (i32, i32) {
    %c0_i32 = arith.constant 0 : i32
    %c0_i32_0 = arith.constant 0 : i32
    %c0_i32_1 = arith.constant 0 : i32
    return %c0_i32, %c0_i32_0 : i32, i32
  }
  func.func @transform_3(%arg0: i32) -> (i32, i32) {
    %c0_i32 = arith.constant 0 : i32
    %c0_i32_0 = arith.constant 0 : i32
    %c0_i32_1 = arith.constant 0 : i32
    return %c0_i32, %c0_i32_0 : i32, i32
  }
  func.func @transform_4(%arg0: i32) -> (i32, i32) {
    %c0_i32 = arith.constant 0 : i32
    %c0_i32_0 = arith.constant 0 : i32
    %c0_i32_1 = arith.constant 0 : i32
    return %c0_i32, %c0_i32_0 : i32, i32
  }
  func.func @transform_5(%arg0: i32) -> (i32, i32) {
    %c0_i32 = arith.constant 0 : i32
    %c0_i32_0 = arith.constant 0 : i32
    %c0_i32_1 = arith.constant 0 : i32
    return %c0_i32, %c0_i32_0 : i32, i32
  }
  func.func @transform_6(%arg0: i32) -> (i32, i32) {
    %c0_i32 = arith.constant 0 : i32
    %c0_i32_0 = arith.constant 0 : i32
    %c0_i32_1 = arith.constant 0 : i32
    return %c0_i32, %c0_i32_0 : i32, i32
  }
  func.func @transform_7(%arg0: i32) -> (i32, i32) {
    %c0_i32 = arith.constant 0 : i32
    %c0_i32_0 = arith.constant 0 : i32
    %c0_i32_1 = arith.constant 0 : i32
    return %c0_i32, %c0_i32_0 : i32, i32
  }
  func.func @transform_8(%arg0: i32) -> (i32, i32) {
    %c0_i32 = arith.constant 0 : i32
    %c0_i32_0 = arith.constant 0 : i32
    %c0_i32_1 = arith.constant 0 : i32
    return %c0_i32, %c0_i32_0 : i32, i32
  }
  func.func @transform_9(%arg0: i32) -> (i32, i32) {
    %c0_i32 = arith.constant 0 : i32
    %c0_i32_0 = arith.constant 0 : i32
    %c0_i32_1 = arith.constant 0 : i32
    return %c0_i32, %c0_i32_0 : i32, i32
  }
  func.func @transform_10(%arg0: i32) -> (i32, i32) {
    %c0_i32 = arith.constant 0 : i32
    %c0_i32_0 = arith.constant 0 : i32
    %c0_i32_1 = arith.constant 0 : i32
    return %c0_i32, %c0_i32_0 : i32, i32
  }
  func.func @transform_11(%arg0: i32) -> (i32, i32) {
    %c0_i32 = arith.constant 0 : i32
    %c0_i32_0 = arith.constant 0 : i32
    %c0_i32_1 = arith.constant 0 : i32
    return %c0_i32, %c0_i32_0 : i32, i32
  }
  func.func @transform_12(%arg0: i32) -> (i32, i32) {
    %c0_i32 = arith.constant 0 : i32
    %c0_i32_0 = arith.constant 0 : i32
    %c0_i32_1 = arith.constant 0 : i32
    return %c0_i32, %c0_i32_0 : i32, i32
  }
  func.func @transform_13(%arg0: i32) -> (i32, i32) {
    %c0_i32 = arith.constant 0 : i32
    %c0_i32_0 = arith.constant 0 : i32
    return %arg0, %c0_i32 : i32, i32
  }
}

</mosaic_0001>

<bundles_post_ra>
// kernel: tpu_custom_call.1
= control target key start
LH: loop header
LB: loop body
LE: loop exit
PB: predicated region body
PF: predicated region fallthrough
CT: control target
= control target key end

     0   :  { %18 = vsyncpa [#allocation4], 0  ;;  %s7517_s0 = inlined_call_operand.vmem [shape: f32[128,128], index: 0, kind: input, shape index: {}]   ;;  %s7518_s1 = inlined_call_operand.hbm [shape: bf16[1152,128], index: 1, kind: input, shape index: {}]   ;;  %s7519_s2 = inlined_call_operand.vmem [shape: f32[1,128], index: 2, kind: input, shape index: {}]   ;;  %s7520_s3 = inlined_call_operand.hbm [shape: bf16[1152,128], index: 3, kind: input, shape index: {}]   ;;  %s7521_s4 = inlined_call_operand.vmem [shape: f32[1,128], index: 4, kind: input, shape index: {}]   ;;  %s7522_s5 = inlined_call_operand.vmem [shape: f32[8,2], index: 5, kind: input, shape index: {}]   ;;  %s7523_s6 = inlined_call_operand.vmem [shape: f32[1,2], index: 6, kind: input, shape index: {}]   ;;  %s7524_s7 = inlined_call_operand.vmem [shape: f32[2,8], index: 7, kind: input, shape index: {}]   ;;  %s7525_s8 = inlined_call_operand.vmem [shape: f32[1,8], index: 8, kind: input, shape index: {}]   ;;  %s7526_s9 = inlined_call_operand.vmem [shape: f32[128,8], index: 9, kind: input, shape index: {}]   ;;  %s7527_s10 = inlined_call_operand.vmem [shape: f32[8,128], index: 10, kind: input, shape index: {}]   ;;  %s7528_s11 = inlined_call_operand.vmem [shape: f32[4,64], index: 11, kind: input, shape index: {}]   ;;  %s7529_s12 = inlined_call_operand.vmem [shape: f32[64,4], index: 12, kind: input, shape index: {}]   ;;  %s7530_s13 = inlined_call_operand.hbm [shape: f32[128,128], index: 13, kind: output, shape index: {}]  }
   0x1   :  { %19 = vsyncpa [#allocation7], 0 }
   0x2   :  { %20 = vsyncpa [#allocation5], 0 }
   0x3   :  { %22 = vsyncpa [#allocation5 + $0x1], 0  ;;  %s6276_s25 = smov 0   ;;  %s6278_s26 = smov 0  }
   0x4   :  { %s6280_s27 = smov 0   ;;  %s6282_s28 = smov 0  }
   0x5 LB: > { %7556 = sst [smem:[#allocation12_spill]] %s6190_s27  ;;  %s6297_s29 = sadd.s32 4294967295, %s6194_s28   ;;  %s6194_s28 = sphi %s6282_s28, %s7630_s28   ;;  %s6190_s27 = sphi %s6280_s27, %s7632_s27   ;;  %s6186_s26 = sphi %s6278_s26, %s7634_s26   ;;  %s6182_s25 = sphi %s6276_s25, %s7633_s25  }
   0x6   : > { %s4631_s30 = sadd.s32 4294967294, %s6194_s28   ;;  %s6301_s14 = sadd.s32 1, %s6194_s28  }
   0x7   : > { %7557 = sst [smem:[#allocation13_spill]] %s6301_s14  ;;  %s313_s15 = sadd.s32 1, %s6190_s27 }
   0x8   : > { %s310_s16 = ssub.s32 %s6194_s28, %s6301_s14  ;;  %p323_p0 = scmp.ne.s32.totalorder %s6190_s27, %s6186_s26 }
   0x9   : > { %p311_p1 = scmp.eq.s32.totalorder %s310_s16, 0  ;;  %p324_p2 = scmp.eq.s32.totalorder %s6297_s29, 1 }
   0xa   : > { %p329_p3 = scmp.ne.s32.totalorder %s6186_s26, %s6182_s25  ;;  %p330_p4 = scmp.eq.s32.totalorder %s4631_s30, 1 }
   0xb   : > { %s6312_s17 = scalar_select %p311_p1, %s6190_s27, %s313_s15  }
   0xc   : > { %p6314_p5 = por %p324_p2, %p323_p0  ;;  %p6318_p6 = por %p330_p4, %p329_p3 }
   0xd   : > { %7558 = sst [smem:[#allocation14_spill]] %s6312_s17  ;;  %p4632_p7 = scmp.ge.s32.totalorder %s6194_s28, 1 }
   0xe   : > { %s7560_s19 = scalar_select %p6318_p6, 1, 0 }
   0xf   : > { %p337_p8 = scmp.lt.s32.totalorder %s6194_s28, 3  ;;  %p7532_p9 = scmp.eq.s32.totalorder %s6297_s29, 0 }
  0x10   : > { %s6196_s21 = smov [#allocation3]   ;;  %s6197_s24 = smov [#allocation6]  }
  0x11   : > { %p6325_p10 = pnand %p4632_p7, %p337_p8  ;;  %s349_s22 = sshll.u32 %s6196_s21, 4  ;;  %s350_s22 = int_to_ptr.vmem [resolvable:$true] %s349_s22 }
  0x12   : > { %s365_s30 = sshll.u32 %s6197_s24, 4  ;;  %s6085_s15 = scalar_lea.vmem %s350_s22, 9216  ;;  %s366_s30 = int_to_ptr.vmem [resolvable:$true] %s365_s30 }
  0x13   : > { %p5697_p11 = pneg %p6325_p10  ;;  %p6086_p0 = scmp.ne.s32.totalorder %s350_s22, %s6085_s15 }
  0x14   : > { %p6093_p3 = scmp.lt.s32.totalorder %s350_s22, %s350_s22  ;;  %p6094_p4 = scmp.lt.s32.totalorder %s6085_s15, %s6085_s15 }
  0x15   : > { %p6333_p12 = pnand %p7532_p9, %p5697_p11 }
  0x16   : > { %p6095_p7 = por %p6094_p4, %p6093_p3 }
  0x17   : > { %p6076_p13 = pneg %p6333_p12 }
  0x19   : > { %p6088_p1 = pnand %p6086_p0, %p6076_p13 }
  0x1b   : > { %p6089_p2 = pneg %p6088_p1 }
  0x1d   : > { %p6096_p8 = pnand %p6095_p7, %p6089_p2 }
  0x1f   : > { %6099 = shalt.err (!%p6096_p8)
}
  0x20   : > { %s6198_s16 = smov 64   ;;  %s6199_s21 = smov 4  }
  0x21   : > { %5700 = dma.hbm_to_vmem [thread:$0]  (!%p6333_p12), %s7518_s1, 9216, %s350_s22, [#allocation4], %s6198_s16, %s6198_s16, %s6199_s21  }
  0x22   : > { %s6111_s27 = scalar_lea.vmem %s366_s30, 9216  ;;  %p6119_p9 = scmp.lt.s32.totalorder %s366_s30, %s366_s30 }
  0x23   : > { %p6112_p11 = scmp.ne.s32.totalorder %s366_s30, %s6111_s27  ;;  %p6120_p6 = scmp.lt.s32.totalorder %s6111_s27, %s6111_s27 }
  0x25   : > { %p6114_p0 = pnand %p6112_p11, %p6076_p13  ;;  %p6121_p3 = por %p6120_p6, %p6119_p9 }
  0x27   : > { %p6115_p1 = pneg %p6114_p0 }
  0x29   : > { %p6122_p2 = pnand %p6121_p3, %p6115_p1 }
  0x2b   : > { %6125 = shalt.err (!%p6122_p2)
}
  0x2c   : > { %5703 = dma.hbm_to_vmem [thread:$0]  (!%p6333_p12), %s7520_s3, 9216, %s366_s30, [#allocation7], %s6198_s16, %s6198_s16, %s6199_s21  }
  0x2d   : > { %417 = sbr.rel (%p6325_p10) target bundleno = 2151 (0x867), region = 72 }
  0x32   : > { %p7563_p4 = scmp.eq.s32.totalorder %s6297_s29, 0 }
  0x34   : > { %6169 = dma.done.wait (%p7563_p4), [#allocation4], 9216   ;;  %p7564_p13 = pmov %p7563_p4 }
  0x35   : > { %p7565_p7 = pmov %p7563_p4 }
  0x36   : > { %6171 = vsyncadd (%p7564_p13), [#allocation4], 4294958080 }
  0x37   : > { %6173 = dma.done.wait (%p7565_p7), [#allocation7], 9216   ;;  %p7566_p6 = pmov %p7563_p4 }
  0x38   : > { %s4640_s27 = sshll.u32 %s6297_s29, 3  ;;  %v481_v0 = vlaneseq  ;;  %v5814_v21 = vld [vmem:[#allocation3 + $0x78] sm:$0xff]   ;;  %s7555_s23 = smov 8   ;;  %v7568_v27 = vmov 0  ;;  %v5816_v36 = vld [vmem:[#allocation3 + $0x70] sm:$0xff]   ;;  %v5820_v58 = vld [vmem:[#allocation3 + $0x68] sm:$0xff]  }
  0x39   : > { %6175 = vsyncadd (%p7566_p6), [#allocation7], 4294958080  ;;  %p466_p9 = scmp.lt.s32.totalorder %s4640_s27, 15  ;;  %5171 = vmatprep.subr.bf16.mxu0 %v5814_v21  ;;  %v5815_v32 = vld [vmem:[#allocation3 + $0x38] sm:$0xff]   ;;  %s6201_s30 = smov 120   ;;  %v5818_v46 = vld [vmem:[#allocation3 + $0x30] sm:$0xff]  }
  0x3a   : > { %v6366_v1 = vshrl.u32 %v481_v0, 7  ;;  %5172 = vmatpush3.bf16.msra.mxu0 %v5815_v32  ;;  %v5817_v45 = vld [vmem:[#allocation3 + $0xf8] sm:$0xff]   ;;  %v5821_v61 = vld [vmem:[#allocation3 + $0xf0] sm:$0xff]   ;;  %vm6203_vm10 = vmmov 0   ;;  %vm3949_vm11 = vcmask 523264   ;;  %vm4118_vm12 = vcmask 64512  }
  0x3b   : > { %s7636_s27 = smov (!%p466_p9, %s4640_s27), 15  ;;  %5173 = vmatprep.subr.bf16.mxu0 %v5816_v36  ;;  %5211 = vmatprep.subr.bf16.mxu1 %v5817_v45  ;;  %v5819_v53 = vld [vmem:[#allocation3 + $0xb8] sm:$0xff]   ;;  %v5829_v36 = vld [vmem:[#allocation3 + $0xe0] sm:$0xff]   ;;  %vm4205_vm13 = vcmask 1041408   ;;  %vm4201_vm14 = vcmask 15360   ;;  %vm4367_vm15 = vcmask 31744  }
  0x3c   : > { %7567 = vst [vmem:[#allocation15_spill] sm:$0xff] %v6366_v1  ;;  %v6369_v2 = vadd.s32 56, %v6366_v1  ;;  %s4641_s14 = sshll.u32 %s7636_s27, 3  ;;  %v6372_v3 = vadd.s32 8, %v6366_v1  ;;  %vm642_vm0 = vcmp.lt.s32.totalorder %v6366_v1, 1  ;;  %vm955_vm1 = vcmp.lt.s32.totalorder %v6366_v1, 7  ;;  %5212 = vmatpush3.bf16.msra.mxu1 %v5819_v53 }
  0x3d   : > { %s6377_s22 = scalar_lea.vmem %s7517_s0, %s4641_s14  ;;  %v494_v4 = vand.u32 15, %v6366_v1  ;;  %v6393_v9 = vadd.s32 16, %v6366_v1  ;;  %5213 = vmatprep.subr.bf16.mxu1 %v5821_v61  ;;  %v5828_v32 = vld [vmem:[#allocation3 + $0x58] sm:$0xff]   ;;  %v488_v53 = vadd.s32 48, %v6366_v1  ;;  %v5837_v61 = vld [vmem:[#allocation3 + $0xd0] sm:$0xff]   ;;  %s462_s21 = sand.u32 1, %s6186_s26  }
  0x3e   : > { %v6383_v5 = vld [vmem:[%s6377_s22 + $0x10] sm:$0xff]  ;;  %v6386_v6 = vld [vmem:[%s6377_s22 + $0x18] sm:$0xff]  ;;  %v6389_v7 = vld [vmem:[%s6377_s22] sm:$0xff]  ;;  %v543_v8 = vand.u32 15, %v6369_v2  ;;  %v501_v10 = vand.u32 15, %v6372_v3  ;;  %5174 = vmatpush3.bf16.msra.mxu0 %v5818_v46  ;;  %v485_v3 = vadd.s32 24, %v6366_v1 }
  0x3f   : > { %v702_v11 = vrot.slane %v6386_v6, 7  ;;  %v5061_v12 = vpack.c.bf16 %v6386_v6, %v6386_v6  ;;  %v1015_v13 = vrot.slane %v6386_v6, 1  ;;  %v6402_v14 = vpack.i.bf16 %v6386_v6, %v6383_v5  ;;  %v6405_v15 = vld [vmem:[%s6377_s22 + $0x38] sm:$0xff]  ;;  %v6413_v20 = vld [vmem:[%s6377_s22 + $0x20] sm:$0xff]  ;;  %v6423_v25 = vld [vmem:[%s6377_s22 + $0x8] sm:$0xff]  ;;  %5175 = vmatprep.subr.bf16.mxu0 %v5820_v58  ;;  %s4639_s24 = sshll.u32 %s462_s21, 6 }
  0x40   : > { %v701_v16 = vrot.slane %v6383_v5, 7  ;;  %v5060_v17 = vpack.c.bf16 %v6383_v5, %v6383_v5  ;;  %v1014_v18 = vrot.slane %v6383_v5, 1  ;;  %v706_v19 = vrot.slane %v6405_v15, 7  ;;  %v6426_v26 = vld [vmem:[%s6377_s22 + $0x28] sm:$0xff]  ;;  %v6463_v44 = vld [vmem:[%s6377_s22 + $0x30] sm:$0xff]  ;;  %s7444_s15 = scalar_lea.vmem [#allocation8], %s4639_s24 }
  0x41   : > { %902 = vst [vmem:[#allocation2 + $0x7c] sm:$0xf] %v5061_v12  ;;  %5760 = vrot.lane.b32.xlu1 %v6402_v14, %s7555_s23  ;;  %v5065_v22 = vpack.c.bf16 %v6405_v15, %v6405_v15  ;;  %v1019_v23 = vrot.slane %v6405_v15, 1  ;;  %v5754_v24 = vpack.i.bf16 %v6405_v15, %v6389_v7  ;;  %vm6428_vm2 = vcmp.gt.s32.totalorder %v494_v4, 0  ;;  %v5824_v15 = vld [vmem:[#allocation3 + $0x60] sm:$0xff]   ;;  %v5827_v5 = vld [vmem:[#allocation3 + $0xa8] sm:$0xff]  }
  0x42   : > { %v7569_v27 = vsel %vm6428_vm2, 4294967295, %v7568_v27  ;;  %v711_v28 = vsel %vm642_vm0, %v701_v16, %v702_v11  ;;  %901 = vst [vmem:[#allocation2 + $0x58] sm:$0xf] %v5060_v17  ;;  %v1024_v29 = vsel %vm955_vm1, %v1014_v18, %v1015_v13  ;;  %v699_v30 = vrot.slane %v6389_v7, 7  ;;  %s4547_s27 = sshll.u32 %s7444_s15, 4  ;;  %s5170_s14 = sshll.u32 %s6297_s29, 10  ;;  %s7465_s27 = int_to_ptr.vmem [resolvable:$true] %s4547_s27 }
  0x43   : > { %7570 = vst [vmem:[#allocation16_spill] sm:$0xff] %v7569_v27  ;;  %v5058_v31 = vpack.c.bf16 %v6389_v7, %v6389_v7  ;;  %v5037_v33 = vpack.c.bf16 %v711_v28, %v711_v28  ;;  %v5084_v34 = vpack.c.bf16 %v1024_v29, %v1024_v29  ;;  %906 = vst [vmem:[#allocation2 + $0x10c] sm:$0xf] %v5065_v22  ;;  %5755 = vrot.lane.b32.xlu0 %v5754_v24, %s7555_s23  ;;  %v5823_v22 = vld [vmem:[#allocation3 + $0xb0] sm:$0xff]   ;;  %v5825_v28 = vld [vmem:[#allocation3 + $0xe8] sm:$0xff]   ;;  %s7476_s16 = scalar_lea.sflag [#allocation5], %s462_s21 }
  0x44   : > { %v1012_v35 = vrot.slane %v6389_v7, 1  ;;  %v700_v37 = vrot.slane %v6423_v25, 7  ;;  %v5059_v38 = vpack.c.bf16 %v6423_v25, %v6423_v25  ;;  %v1013_v39 = vrot.slane %v6423_v25, 1  ;;  %5214 = vmatpush3.bf16.msra.mxu1 %v5823_v22  ;;  %v5857_v22 = vld [vmem:[#allocation3 + $0x1f8] sm:$0xff]   ;;  %s6126_s29 = scalar_lea.vmem %s7465_s27, 1024 }
  0x45   : > { %899 = vst [vmem:[#allocation2 + $0x10] sm:$0xf] %v5058_v31  ;;  %758 = vst [vmem:[#allocation2 + $0x70] sm:$0xf] %v5037_v33  ;;  %5765 = vrot.lane.b32.xlu1 %v5754_v24, %s6201_s30  ;;  %v704_v40 = vrot.slane %v6426_v26, 7  ;;  %v5063_v41 = vpack.c.bf16 %v6426_v26, %v6426_v26  ;;  %v1017_v42 = vrot.slane %v6426_v26, 1  ;;  %v6460_v43 = vpack.i.bf16 %v6426_v26, %v6413_v20  ;;  %p6127_p10 = scmp.ne.s32.totalorder %s7465_s27, %s6126_s29 }
  0x46   : > { %1070 = vst [vmem:[#allocation2 + $0x64] sm:$0xf] %v5084_v34  ;;  %900 = vst [vmem:[#allocation2 + $0x34] sm:$0xf] %v5059_v38  ;;  %v713_v47 = vsel %vm642_vm0, %v699_v30, %v700_v37  ;;  %v1026_v48 = vsel %vm955_vm1, %v1012_v35, %v1013_v39  ;;  %v703_v51 = vrot.slane %v6413_v20, 7  ;;  %v5062_v52 = vpack.c.bf16 %v6413_v20, %v6413_v20  ;;  %v5839_v26 = vld [vmem:[#allocation3 + $0x90] sm:$0xff]  }
  0x47   : > { %604 = vrot.lane.b32.xlu0 %v6423_v25, %s7555_s23  ;;  %v5035_v49 = vpack.c.bf16 %v713_v47, %v713_v47  ;;  %v5082_v50 = vpack.c.bf16 %v1026_v48, %v1026_v48  ;;  %904 = vst [vmem:[#allocation2 + $0xc4] sm:$0xf] %v5063_v41  ;;  %v1016_v54 = vrot.slane %v6413_v20, 1  ;;  %v705_v55 = vrot.slane %v6463_v44, 7  ;;  %5215 = vmatprep.subr.bf16.mxu1 %v5825_v28  ;;  %v5832_v47 = vld [vmem:[#allocation3 + $0x50] sm:$0xff]   ;;  %p6128_p12 = pnand %p6127_p10, %p6314_p5 }
  0x48   : > { %v5064_v56 = vpack.c.bf16 %v6463_v44, %v6463_v44  ;;  %v1018_v57 = vrot.slane %v6463_v44, 1  ;;  %v714_v59 = vsel %vm642_vm0, %v706_v19, %v699_v30  ;;  %v709_v60 = vsel %vm642_vm0, %v703_v51, %v704_v40  ;;  %903 = vst [vmem:[#allocation2 + $0xa0] sm:$0xf] %v5062_v52  ;;  %v5826_v30 = vld [vmem:[#allocation3 + $0x20] sm:$0xff]   ;;  %5216 = vmatpush3.bf16.msra.mxu1 %v5827_v5 }
  0x49   : > { %756 = vst [vmem:[#allocation2 + $0x28] sm:$0xf] %v5035_v49  ;;  %1068 = vst [vmem:[#allocation2 + $0x1c] sm:$0xf] %v5082_v50  ;;  %5770 = vrot.lane.b32.xlu1 %v6460_v43, %s7555_s23  ;;  %v508_v62 = vand.u32 15, %v6393_v9  ;;  %v1027_v63 = vsel %vm955_vm1, %v1019_v23, %v1012_v35  ;;  %v5039_v0 = vpack.c.bf16 %v709_v60, %v709_v60  ;;  %v5822_v9 = vld [vmem:[#allocation3 + $0x28] sm:$0xff]   ;;  %5217 = vmatprep.subr.bf16.mxu1 %v5829_v36  ;;  %p6129_p8 = pneg %p6128_p12 }
  0x4a   : > { %v1022_v4 = vsel %vm955_vm1, %v1016_v54, %v1017_v42  ;;  %v707_v7 = vsel %vm642_vm0, %v705_v55, %v706_v19  ;;  %905 = vst [vmem:[#allocation2 + $0xe8] sm:$0xf] %v5064_v56  ;;  %v1020_v21 = vsel %vm955_vm1, %v1018_v57, %v1019_v23  ;;  %vm6518_vm3 = vcmp.lt.s32.totalorder %v543_v8, 15  ;;  %5176 = vmatpush3.bf16.msra.mxu0 %v5822_v9  ;;  %v5834_v49 = vld [vmem:[#allocation3 + $0x10] sm:$0xff]   ;;  %v5843_v9 = vld [vmem:[#allocation3 + $0x88] sm:$0xff]  }
  0x4b   : > { %v5086_v12 = vpack.c.bf16 %v1022_v4, %v1022_v4  ;;  %620 = vrot.lane.b32.xlu0 %v6423_v25, %s6201_s30  ;;  %v5041_v17 = vpack.c.bf16 %v707_v7, %v707_v7  ;;  %760 = vst [vmem:[#allocation2 + $0xb8] sm:$0xf] %v5039_v0  ;;  %v5088_v24 = vpack.c.bf16 %v1020_v21, %v1020_v21  ;;  %v7571_v19 = vmov 0  ;;  %v5841_v4 = vld [vmem:[#allocation3 + $0xc8] sm:$0xff]   ;;  %v5842_v7 = vld [vmem:[#allocation3] sm:$0xff]  }
  0x4c   : > { %v7572_v19 = vsel %vm6518_vm3, 4294967295, %v7571_v19  ;;  %v715_v25 = vsel %vm6428_vm2, %v714_v59, 0.0  ;;  %v712_v23 = vsel %vm642_vm0, %v700_v37, %v701_v16  ;;  %v1025_v29 = vsel %vm955_vm1, %v1013_v39, %v1014_v18  ;;  %5177 = vmatprep.subr.bf16.mxu0 %v5824_v15  ;;  %v5831_v39 = vld [vmem:[#allocation3 + $0xa0] sm:$0xff]  }
  0x4d   : > { %7573 = vst [vmem:[#allocation17_spill] sm:$0xff] %v7572_v19  ;;  %1072 = vst [vmem:[#allocation2 + $0xac] sm:$0xf] %v5086_v12  ;;  %614 = vrot.lane.b32.xlu1 %v6463_v44, %s7555_s23  ;;  %v5034_v2 = vpack.c.bf16 %v715_v25, %v715_v25  ;;  %v1035_v8 = vsel %vm6518_vm3, %v1027_v63, 0.0  ;;  %vm6538_vm4 = vcmp.gt.s32.totalorder %v508_v62, 0  ;;  %v7574_v16 = vmov 0  ;;  %5218 = vmatpush3.bf16.msra.mxu1 %v5831_v39 }
  0x4e   : > { %762 = vst [vmem:[#allocation2 + $0x100] sm:$0xf] %v5041_v17  ;;  %1074 = vst [vmem:[#allocation2 + $0xf4] sm:$0xf] %v5088_v24  ;;  %v5089_v31 = vpack.c.bf16 %v1035_v8, %v1035_v8  ;;  %v7575_v16 = vsel %vm6538_vm4, 4294967295, %v7574_v16  ;;  %vm6544_vm5 = vcmp.lt.s32.totalorder %v501_v10, 15  ;;  %5178 = vmatpush3.bf16.msra.mxu0 %v5826_v30  ;;  %v1023_v38 = vsel %vm955_vm1, %v1015_v13, %v1016_v54 }
  0x4f   : > { %5775 = vrot.lane.b32.xlu0 %v6402_v14, %s6201_s30  ;;  %755 = vst [vmem:[#allocation2 + $0x4] sm:$0xf] %v5034_v2  ;;  %7576 = vst [vmem:[#allocation18_spill] sm:$0xff] %v7575_v16  ;;  %v7577_v18 = vmov 0  ;;  %v717_v33 = vsel %vm6538_vm4, %v712_v23, 0.0  ;;  %v1029_v14 = vsel %vm6544_vm5, %v1025_v29, 0.0  ;;  %5179 = vmatprep.subr.bf16.mxu0 %v5828_v32  ;;  %v710_v45 = vsel %vm642_vm0, %v702_v11, %v703_v51 }
  0x50   : > { %v7578_v18 = vsel %vm6544_vm5, 4294967295, %v7577_v18  ;;  %1075 = vst [vmem:[#allocation2 + $0x118] sm:$0xf] %v5089_v31  ;;  %v5036_v34 = vpack.c.bf16 %v717_v33, %v717_v33  ;;  %v5083_v35 = vpack.c.bf16 %v1029_v14, %v1029_v14  ;;  %v5830_v10 = vld [vmem:[#allocation3 + $0x18] sm:$0xff]   ;;  %v486_v37 = vadd.s32 32, %v6366_v1  ;;  %v5836_v54 = vld [vmem:[#allocation3 + $0x48] sm:$0xff]  }
  0x51   : > { %7579 = vst [vmem:[#allocation19_spill] sm:$0xff] %v7578_v18  ;;  %630 = vrot.lane.b32.xlu1 %v6463_v44, %s6201_s30  ;;  %v515_v41 = vand.u32 15, %v485_v3  ;;  %v7580_v13 = vmov 0  ;;  %v7583_v48 = vmov 0  ;;  %v5835_v51 = vld [vmem:[#allocation3 + $0x98] sm:$0xff]   ;;  %v487_v52 = vadd.s32 40, %v6366_v1 }
  0x52   : > { %757 = vst [vmem:[#allocation2 + $0x4c] sm:$0xf] %v5036_v34  ;;  %1069 = vst [vmem:[#allocation2 + $0x40] sm:$0xf] %v5083_v35  ;;  %v522_v46 = vand.u32 15, %v486_v37  ;;  %5180 = vmatpush3.bf16.msra.mxu0 %v5830_v10  ;;  %v708_v56 = vsel %vm642_vm0, %v704_v40, %v705_v55  ;;  %v1021_v58 = vsel %vm955_vm1, %v1017_v42, %v1018_v57  ;;  %v536_v60 = vand.u32 15, %v488_v53 }
  0x53   : > { %5780 = vrot.lane.b32.xlu0 %v6460_v43, %s6201_s30  ;;  %vm6570_vm6 = vcmp.lt.s32.totalorder %v515_v41, 15  ;;  %v5833_v43 = vld [vmem:[#allocation3 + $0xd8] sm:$0xff]   ;;  %5181 = vmatprep.subr.bf16.mxu0 %v5832_v47  ;;  %v529_v59 = vand.u32 15, %v487_v52  ;;  %v5838_v62 = vld [vmem:[#allocation3 + $0x8] sm:$0xff]   ;;  %v7586_v63 = vmov 0  ;;  %v7589_v40 = vmov 0 }
  0x54   : > { %v7581_v13 = vsel %vm6570_vm6, 4294967295, %v7580_v13  ;;  %vm6574_vm7 = vcmp.gt.s32.totalorder %v522_v46, 0  ;;  %v1031_v20 = vsel %vm6570_vm6, %v1023_v38, 0.0  ;;  %5219 = vmatprep.subr.bf16.mxu1 %v5833_v43  ;;  %vm6596_vm8 = vcmp.gt.s32.totalorder %v536_v60, 0  ;;  %v5840_v44 = vld [vmem:[#allocation3 + $0x40] sm:$0xff]   ;;  %v5848_v17 = vld [vmem:[#allocation3 + $0x178] sm:$0xff]  }
  0x55   : > { %7582 = vst [vmem:[#allocation20_spill] sm:$0xff] %v7581_v13  ;;  %v7584_v48 = vsel %vm6574_vm7, 4294967295, %v7583_v48  ;;  %v719_v6 = vsel %vm6574_vm7, %v710_v45, 0.0  ;;  %v5085_v11 = vpack.c.bf16 %v1031_v20, %v1031_v20  ;;  %5220 = vmatpush3.bf16.msra.mxu1 %v5835_v51  ;;  %v7587_v63 = vsel %vm6596_vm8, 4294967295, %v7586_v63  ;;  %v5847_v12 = vld [vmem:[#allocation3 + $0xc0] sm:$0xff]  }
  0x56   : > { %7585 = vst [vmem:[#allocation21_spill] sm:$0xff] %v7584_v48  ;;  %v5038_v50 = vpack.c.bf16 %v719_v6, %v719_v6  ;;  %5182 = vmatpush3.bf16.msra.mxu0 %v5834_v49  ;;  %7588 = vst [vmem:[#allocation22_spill] sm:$0xff] %v7587_v63  ;;  %vm6600_vm9 = vcmp.lt.s32.totalorder %v529_v59, 15  ;;  %5221 = vmatprep.subr.bf16.mxu1 %v5837_v61  ;;  %v721_v42 = vsel %vm6596_vm8, %v708_v56, 0.0  ;;  %v5851_v21 = vld [vmem:[#allocation3 + $0x80] sm:$0xff]  }
  0x57   : > { %1071 = vst [vmem:[#allocation2 + $0x88] sm:$0xf] %v5085_v11  ;;  %5183 = vmatprep.subr.bf16.mxu0 %v5836_v54  ;;  %v7590_v40 = vsel %vm6600_vm9, 4294967295, %v7589_v40  ;;  %v1033_v55 = vsel %vm6600_vm9, %v1021_v58, 0.0  ;;  %v5040_v57 = vpack.c.bf16 %v721_v42, %v721_v42 }
  0x58   : > { %759 = vst [vmem:[#allocation2 + $0x94] sm:$0xf] %v5038_v50  ;;  %7591 = vst [vmem:[#allocation23_spill] sm:$0xff] %v7590_v40  ;;  %v5087_v0 = vpack.c.bf16 %v1033_v55, %v1033_v55 }
  0x59   : > { %5222 = vmatpush3.bf16.msra.mxu1 %v5839_v26  ;;  %761 = vst [vmem:[#allocation2 + $0xdc] sm:$0xf] %v5040_v57 }
  0x5a   : > { %5184 = vmatpush3.bf16.msra.mxu0 %v5838_v62  ;;  %1073 = vst [vmem:[#allocation2 + $0xd0] sm:$0xf] %v5087_v0  ;;  %5223 = vmatprep.subr.bf16.mxu1 %v5841_v4 }
  0x5b   : > { %5185 = vmatprep.subr.bf16.mxu0 %v5840_v44 }
  0x5d   : > { %5224 = vmatpush3.bf16.msra.mxu1 %v5843_v9 }
  0x5e   : > { %5186 = vmatpush3.bf16.msra.mxu0 %v5842_v7  ;;  %5225 = vmatprep.subr.bf16.mxu1 %v5847_v12 }
  0x5f   : > { %5251 = vmatprep.subr.bf16.mxu0 %v5848_v17 }
  0x61   : > { %5226 = vmatpush3.bf16.msra.mxu1 %v5851_v21 }
  0x62   : > { %5291 = vmatprep.subr.bf16.mxu1 %v5857_v22 }
  0xb3   : > { %v5761_v24 = vpop.permute.xlu1 %5760 }
  0xb4   : > { %v6608_v25 = vunpack.i.h.bf16 %v5761_v24  ;;  %v6610_v15 = vunpack.i.l.bf16 %v5761_v24 }
  0xb5   : > { %v5756_v28 = vpop.permute.xlu0 %5755 }
  0xb6   : > { %v637_v23 = vrot.slane %v6608_v25, 7  ;;  %v5053_v29 = vpack.c.bf16 %v6608_v25, %v6608_v25  ;;  %v950_v2 = vrot.slane %v6608_v25, 1  ;;  %v636_v8 = vrot.slane %v6610_v15, 7 }
  0xb7   : > { %v5052_v30 = vpack.c.bf16 %v6610_v15, %v6610_v15  ;;  %v949_v31 = vrot.slane %v6610_v15, 1  ;;  %v6620_v5 = vunpack.i.h.bf16 %v5756_v28  ;;  %v6622_v32 = vunpack.i.l.bf16 %v5756_v28  ;;  %v5766_v33 = vpop.permute.xlu1 %5765 }
  0xb8   : > { %862 = vst [vmem:[#allocation2 + $0x78] sm:$0xf] %v5053_v29  ;;  %v647_v14 = vsel %vm642_vm0, %v636_v8, %v637_v23  ;;  %v6628_v34 = vunpack.i.h.bf16 %v5766_v33  ;;  %v6630_v35 = vunpack.i.l.bf16 %v5766_v33 }
  0xb9   : > { %v5029_v36 = vpack.c.bf16 %v647_v14, %v647_v14  ;;  %861 = vst [vmem:[#allocation2 + $0x54] sm:$0xf] %v5052_v30  ;;  %v960_v3 = vsel %vm955_vm1, %v949_v31, %v950_v2  ;;  %v641_v10 = vrot.slane %v6620_v5, 7  ;;  %v5057_v37 = vpack.c.bf16 %v6620_v5, %v6620_v5  ;;  %v605_v38 = vpop.permute.xlu0 %604 }
  0xba   : > { %v5076_v39 = vpack.c.bf16 %v960_v3, %v960_v3  ;;  %v954_v41 = vrot.slane %v6620_v5, 1  ;;  %v634_v45 = vrot.slane %v6622_v32, 7  ;;  %v5050_v46 = vpack.c.bf16 %v6622_v32, %v6622_v32 }
  0xbb   : > { %694 = vst [vmem:[#allocation2 + $0x6c] sm:$0xf] %v5029_v36  ;;  %866 = vst [vmem:[#allocation2 + $0x108] sm:$0xf] %v5057_v37  ;;  %v947_v47 = vrot.slane %v6622_v32, 1  ;;  %v770_v43 = vrot.slane %v6628_v34, 7  ;;  %v5073_v20 = vpack.c.bf16 %v6628_v34, %v6628_v34  ;;  %v5771_v11 = vpop.permute.xlu1 %5770  ;;  %v5066_v51 = vpack.c.bf16 %v6630_v35, %v6630_v35 }
  0xbc   : > { %v1083_v6 = vrot.slane %v6628_v34, 1  ;;  %1006 = vst [vmem:[#allocation2 + $0x60] sm:$0xf] %v5076_v39  ;;  %v650_v49 = vsel %vm642_vm0, %v641_v10, %v634_v45  ;;  %859 = vst [vmem:[#allocation2 + $0xc] sm:$0xf] %v5050_v46  ;;  %v763_v50 = vrot.slane %v6630_v35, 7  ;;  %v5051_v58 = vpack.c.bf16 %v605_v38, %v605_v38 }
  0xbd   : > { %v1076_v52 = vrot.slane %v6630_v35, 1  ;;  %v651_v53 = vsel %vm6428_vm2, %v650_v49, 0.0  ;;  %v963_v54 = vsel %vm955_vm1, %v954_v41, %v947_v47  ;;  %946 = vst [vmem:[#allocation2 + $0x110] sm:$0xf] %v5073_v20  ;;  %v635_v56 = vrot.slane %v605_v38, 7  ;;  %v6680_v57 = vpop.permute.xlu0 %620 }
  0xbe   : > { %v5026_v59 = vpack.c.bf16 %v651_v53, %v651_v53  ;;  %v971_v60 = vsel %vm6518_vm3, %v963_v54, 0.0  ;;  %v778_v61 = vsel %vm642_vm0, %v770_v43, %v763_v50  ;;  %939 = vst [vmem:[#allocation2 + $0x14] sm:$0xf] %v5066_v51  ;;  %860 = vst [vmem:[#allocation2 + $0x30] sm:$0xf] %v5051_v58  ;;  %v948_v21 = vrot.slane %v605_v38, 1 }
  0xbf   : > { %v1091_v62 = vsel %vm955_vm1, %v1083_v6, %v1076_v52  ;;  %v5081_v26 = vpack.c.bf16 %v971_v60, %v971_v60  ;;  %v779_v44 = vsel %vm6428_vm2, %v778_v61, 0.0  ;;  %v648_v55 = vsel %vm642_vm0, %v635_v56, %v636_v8  ;;  %v6688_v24 = vpop.permute.xlu1 %614 }
  0xc0   : > { %v1099_v42 = vsel %vm6518_vm3, %v1091_v62, 0.0  ;;  %691 = vst [vmem:[#allocation2] sm:$0xf] %v5026_v59  ;;  %v5042_v0 = vpack.c.bf16 %v779_v44, %v779_v44  ;;  %v649_v7 = vsel %vm642_vm0, %v634_v45, %v635_v56  ;;  %v653_v9 = vsel %vm6538_vm4, %v648_v55, 0.0 }
  0xc1   : > { %v5097_v4 = vpack.c.bf16 %v1099_v42, %v1099_v42  ;;  %1011 = vst [vmem:[#allocation2 + $0x114] sm:$0xf] %v5081_v26  ;;  %v5027_v12 = vpack.c.bf16 %v649_v7, %v649_v7  ;;  %v5028_v17 = vpack.c.bf16 %v653_v9, %v653_v9  ;;  %v6686_v22 = vunpack.i.h.bf16 %v5771_v11  ;;  %v5776_v49 = vpop.permute.xlu0 %5775  ;;  %v5852_v26 = vld [vmem:[#allocation3 + $0x138] sm:$0xff]  }
  0xc2   : > { %819 = vst [vmem:[#allocation2 + $0x8] sm:$0xf] %v5042_v0  ;;  %v5772_v28 = vunpack.i.l.bf16 %v5771_v11  ;;  %v764_v29 = vrot.slane %v6680_v57, 7  ;;  %v5067_v8 = vpack.c.bf16 %v6680_v57, %v6680_v57  ;;  %v1077_v30 = vrot.slane %v6680_v57, 1  ;;  %v5844_v0 = vld [vmem:[#allocation2 + $0x4] ss:$36 sps:$4 sm:$0xff]  }
  0xc3   : > { %1139 = vst [vmem:[#allocation2 + $0x11c] sm:$0xf] %v5097_v4  ;;  %692 = vst [vmem:[#allocation2 + $0x24] sm:$0xf] %v5027_v12  ;;  %v961_v32 = vsel %vm955_vm1, %v948_v21, %v949_v31  ;;  %v962_v33 = vsel %vm955_vm1, %v947_v47, %v948_v21  ;;  %v639_v14 = vrot.slane %v6686_v22, 7  ;;  %v5055_v35 = vpack.c.bf16 %v6686_v22, %v6686_v22  ;;  %v6728_v54 = vpop.permute.xlu1 %630 }
  0xc4   : > { %693 = vst [vmem:[#allocation2 + $0x48] sm:$0xf] %v5028_v17  ;;  %v965_v36 = vsel %vm6544_vm5, %v961_v32, 0.0  ;;  %v5074_v3 = vpack.c.bf16 %v962_v33, %v962_v33  ;;  %v952_v37 = vrot.slane %v6686_v22, 1  ;;  %v638_v38 = vrot.slane %v5772_v28, 7  ;;  %v5856_v22 = vld [vmem:[#allocation3 + $0x170] sm:$0xff]   ;;  %1979 = vmatprep.mubr.bf16.mxu0 %v5844_v0 }
  0xc5   : > { %940 = vst [vmem:[#allocation2 + $0x38] sm:$0xf] %v5067_v8  ;;  %v5075_v15 = vpack.c.bf16 %v965_v36, %v965_v36  ;;  %864 = vst [vmem:[#allocation2 + $0xc0] sm:$0xf] %v5055_v35  ;;  %v5054_v39 = vpack.c.bf16 %v5772_v28, %v5772_v28  ;;  %v951_v31 = vrot.slane %v5772_v28, 1  ;;  %v777_v45 = vsel %vm642_vm0, %v763_v50, %v764_v29  ;;  %v5781_v32 = vpop.permute.xlu0 %5780 }
  0xc6   : > { %1004 = vst [vmem:[#allocation2 + $0x18] sm:$0xf] %v5074_v3  ;;  %v645_v46 = vsel %vm642_vm0, %v638_v38, %v639_v14  ;;  %v646_v47 = vsel %vm642_vm0, %v637_v23, %v638_v38  ;;  %v5043_v20 = vpack.c.bf16 %v777_v45, %v777_v45  ;;  %v1090_v11 = vsel %vm955_vm1, %v1076_v52, %v1077_v30  ;;  %v5849_v21 = vld [vmem:[#allocation2 + $0x4c] ss:$36 sps:$4 sm:$0xff]  }
  0xc7   : > { %1005 = vst [vmem:[#allocation2 + $0x3c] sm:$0xf] %v5075_v15  ;;  %v655_v50 = vsel %vm6574_vm7, %v646_v47, 0.0  ;;  %v5031_v51 = vpack.c.bf16 %v645_v46, %v645_v46  ;;  %863 = vst [vmem:[#allocation2 + $0x9c] sm:$0xf] %v5054_v39  ;;  %v958_v53 = vsel %vm955_vm1, %v951_v31, %v952_v37  ;;  %v959_v23 = vsel %vm955_vm1, %v950_v2, %v951_v31  ;;  %v5858_v38 = vld [vmem:[#allocation3 + $0x130] sm:$0xff]  }
  0xc8   : > { %v5030_v56 = vpack.c.bf16 %v655_v50, %v655_v50  ;;  %v967_v52 = vsel %vm6570_vm6, %v959_v23, 0.0  ;;  %v5078_v58 = vpack.c.bf16 %v958_v53, %v958_v53  ;;  %820 = vst [vmem:[#allocation2 + $0x2c] sm:$0xf] %v5043_v20  ;;  %v5090_v59 = vpack.c.bf16 %v1090_v11, %v1090_v11  ;;  %v5859_v15 = vld [vmem:[#allocation3 + $0x1b8] sm:$0xff]   ;;  %v5853_v47 = vld [vmem:[#allocation2 + $0xc] ss:$36 sps:$4 sm:$0xff]  }
  0xc9   : > { %696 = vst [vmem:[#allocation2 + $0xb4] sm:$0xf] %v5031_v51  ;;  %v5077_v60 = vpack.c.bf16 %v967_v52, %v967_v52  ;;  %v640_v61 = vrot.slane %v6688_v24, 7  ;;  %v5056_v62 = vpack.c.bf16 %v6688_v24, %v6688_v24  ;;  %v953_v25 = vrot.slane %v6688_v24, 1  ;;  %v5861_v51 = vld [vmem:[#allocation3 + $0x168] sm:$0xff]   ;;  %v5862_v53 = vld [vmem:[#allocation3 + $0x1f0] sm:$0xff]   ;;  %2044 = vmatprep.mubr.bf16.mxu1 %v5853_v47 }
  0xca   : > { %695 = vst [vmem:[#allocation2 + $0x90] sm:$0xf] %v5030_v56  ;;  %1008 = vst [vmem:[#allocation2 + $0xa8] sm:$0xf] %v5078_v58  ;;  %v6736_v2 = vunpack.i.h.bf16 %v5776_v49  ;;  %v5777_v44 = vunpack.i.l.bf16 %v5776_v49  ;;  %v769_v42 = vrot.slane %v6728_v54, 7  ;;  %v5072_v55 = vpack.c.bf16 %v6728_v54, %v6728_v54  ;;  %v5885_v47 = vld [vmem:[#allocation3 + $0x1d8] sm:$0xff]  }
  0xcb   : > { %1132 = vst [vmem:[#allocation2 + $0x20] sm:$0xf] %v5090_v59  ;;  %v5846_v4 = vld [vmem:[#allocation2] ss:$36 sps:$4 sm:$0xff]   ;;  %1007 = vst [vmem:[#allocation2 + $0x84] sm:$0xf] %v5077_v60  ;;  %v643_v7 = vsel %vm642_vm0, %v640_v61, %v641_v10  ;;  %v644_v9 = vsel %vm642_vm0, %v639_v14, %v640_v61  ;;  %v956_v12 = vsel %vm955_vm1, %v953_v25, %v954_v41  ;;  %v6768_v45 = vunpack.i.h.bf16 %v5781_v32 }
  0xcc   : > { %865 = vst [vmem:[#allocation2 + $0xe4] sm:$0xf] %v5056_v62  ;;  %v957_v17 = vsel %vm955_vm1, %v952_v37, %v953_v25  ;;  %v657_v24 = vsel %vm6596_vm8, %v644_v9, 0.0  ;;  %v5033_v28 = vpack.c.bf16 %v643_v7, %v643_v7  ;;  %v5080_v8 = vpack.c.bf16 %v956_v12, %v956_v12  ;;  %945 = vst [vmem:[#allocation2 + $0xec] sm:$0xf] %v5072_v55  ;;  %v5866_v55 = vld [vmem:[#allocation3 + $0x1b0] sm:$0xff]  }
  0xcd   : > { %v969_v10 = vsel %vm6600_vm9, %v957_v17, 0.0  ;;  %v5032_v5 = vpack.c.bf16 %v657_v24, %v657_v24  ;;  %v766_v41 = vrot.slane %v6736_v2, 7  ;;  %v5069_v14 = vpack.c.bf16 %v6736_v2, %v6736_v2  ;;  %1980 = vmatmul.mubr.bf16.vlgmr.msra.gmra.mxu0 %v5846_v4  ;;  %v5863_v4 = vld [vmem:[#allocation2 + $0x94] ss:$36 sps:$4 sm:$0xff]   ;;  %v5870_v7 = vld [vmem:[#allocation3 + $0x160] sm:$0xff]   ;;  %v5871_v9 = vld [vmem:[#allocation3 + $0x1e8] sm:$0xff]  }
  0xce   : > { %v5079_v33 = vpack.c.bf16 %v969_v10, %v969_v10  ;;  %698 = vst [vmem:[#allocation2 + $0xfc] sm:$0xf] %v5033_v28  ;;  %1010 = vst [vmem:[#allocation2 + $0xf0] sm:$0xf] %v5080_v8  ;;  %v1079_v35 = vrot.slane %v6736_v2, 1  ;;  %v765_v36 = vrot.slane %v5777_v44, 7  ;;  %v5068_v3 = vpack.c.bf16 %v5777_v44, %v5777_v44  ;;  %1987 = vmatprep.mubr.bf16.mxu0 %v5849_v21 }
  0xcf   : > { %v1078_v37 = vrot.slane %v5777_v44, 1  ;;  %5252 = vmatpush3.bf16.msra.mxu0 %v5852_v26  ;;  %697 = vst [vmem:[#allocation2 + $0xd8] sm:$0xf] %v5032_v5  ;;  %942 = vst [vmem:[#allocation2 + $0x80] sm:$0xf] %v5069_v14  ;;  %v771_v39 = vsel %vm642_vm0, %v769_v42, %v770_v43  ;;  %v1082_v31 = vrot.slane %v6728_v54, 1  ;;  %v6770_v46 = vunpack.i.l.bf16 %v5781_v32 }
  0xd0   : > { %1009 = vst [vmem:[#allocation2 + $0xcc] sm:$0xf] %v5079_v33  ;;  %v5855_v20 = vld [vmem:[#allocation2 + $0x8] ss:$36 sps:$4 sm:$0xff]   ;;  %5253 = vmatprep.subr.bf16.mxu0 %v5856_v22  ;;  %v775_v11 = vsel %vm642_vm0, %v765_v36, %v766_v41  ;;  %v776_v49 = vsel %vm642_vm0, %v764_v29, %v765_v36  ;;  %941 = vst [vmem:[#allocation2 + $0x5c] sm:$0xf] %v5068_v3  ;;  %v5049_v60 = vpack.c.bf16 %v771_v39, %v771_v39 }
  0xd1   : > { %v1088_v43 = vsel %vm955_vm1, %v1078_v37, %v1079_v35  ;;  %v1089_v50 = vsel %vm955_vm1, %v1077_v30, %v1078_v37  ;;  %v781_v23 = vsel %vm6538_vm4, %v776_v49, 0.0  ;;  %v5045_v56 = vpack.c.bf16 %v775_v11, %v775_v11  ;;  %2045 = vmatmul.mubr.bf16.vlgmr.msra.gmra.mxu1 %v5855_v20  ;;  %v5865_v30 = vld [vmem:[#allocation3 + $0x128] sm:$0xff]   ;;  %v5872_v32 = vld [vmem:[#allocation3 + $0x120] sm:$0xff]   ;;  %v5877_v36 = vld [vmem:[#allocation3 + $0x158] sm:$0xff]  }
  0xd2   : > { %v1093_v29 = vsel %vm6544_vm5, %v1089_v50, 0.0  ;;  %v5092_v52 = vpack.c.bf16 %v1088_v43, %v1088_v43  ;;  %v5044_v58 = vpack.c.bf16 %v781_v23, %v781_v23  ;;  %v1084_v57 = vsel %vm955_vm1, %v1082_v31, %v1083_v6  ;;  %5292 = vmatpush3.bf16.msra.mxu1 %v5859_v15  ;;  %v5860_v44 = vld [vmem:[#allocation2 + $0x48] ss:$36 sps:$4 sm:$0xff]   ;;  %826 = vst [vmem:[#allocation2 + $0x104] sm:$0xf] %v5049_v60  ;;  %v5878_v3 = vld [vmem:[#allocation3 + $0x1e0] sm:$0xff]  }
  0xd3   : > { %v5091_v59 = vpack.c.bf16 %v1093_v29, %v1093_v29  ;;  %822 = vst [vmem:[#allocation2 + $0x74] sm:$0xf] %v5045_v56  ;;  %v5096_v61 = vpack.c.bf16 %v1084_v57, %v1084_v57  ;;  %v768_v62 = vrot.slane %v6768_v45, 7  ;;  %v5071_v25 = vpack.c.bf16 %v6768_v45, %v6768_v45  ;;  %5254 = vmatpush3.bf16.msra.mxu0 %v5858_v38  ;;  %v5873_v5 = vld [vmem:[#allocation3 + $0x1a8] sm:$0xff]   ;;  %v5876_v15 = vld [vmem:[#allocation2 + $0x90] ss:$36 sps:$4 sm:$0xff]  }
  0xd4   : > { %1134 = vst [vmem:[#allocation2 + $0x68] sm:$0xf] %v5092_v52  ;;  %v1081_v26 = vrot.slane %v6768_v45, 1  ;;  %821 = vst [vmem:[#allocation2 + $0x50] sm:$0xf] %v5044_v58  ;;  %v767_v34 = vrot.slane %v6770_v46, 7  ;;  %v5070_v6 = vpack.c.bf16 %v6770_v46, %v6770_v46  ;;  %5255 = vmatprep.subr.bf16.mxu0 %v5861_v51  ;;  %5293 = vmatprep.subr.bf16.mxu1 %v5862_v53 }
  0xd5   : > { %1133 = vst [vmem:[#allocation2 + $0x44] sm:$0xf] %v5091_v59  ;;  %v1080_v0 = vrot.slane %v6770_v46, 1  ;;  %1138 = vst [vmem:[#allocation2 + $0xf8] sm:$0xf] %v5096_v61  ;;  %v772_v12 = vsel %vm642_vm0, %v768_v62, %v769_v42  ;;  %1988 = vmatmul.mubr.bf16.gmra.mxu0 %v5860_v44  ;;  %v5881_v39 = vld [vmem:[#allocation3 + $0x118] sm:$0xff]  }
  0xd6   : > { %944 = vst [vmem:[#allocation2 + $0xc8] sm:$0xf] %v5071_v25  ;;  %v1085_v17 = vsel %vm955_vm1, %v1081_v26, %v1082_v31  ;;  %v785_v21 = vsel %vm6596_vm8, %v772_v12, 0.0  ;;  %v773_v24 = vsel %vm642_vm0, %v767_v34, %v768_v62  ;;  %v774_v54 = vsel %vm642_vm0, %v766_v41, %v767_v34  ;;  %943 = vst [vmem:[#allocation2 + $0xa4] sm:$0xf] %v5070_v6  ;;  %v5882_v31 = vld [vmem:[#allocation3 + $0x1a0] sm:$0xff]  }
  0xd7   : > { %v1097_v22 = vsel %vm6600_vm9, %v1085_v17, 0.0  ;;  %1995 = vmatprep.mubr.bf16.mxu0 %v5863_v4  ;;  %v5048_v42 = vpack.c.bf16 %v785_v21, %v785_v21  ;;  %v783_v10 = vsel %vm6574_vm7, %v774_v54, 0.0  ;;  %v5047_v8 = vpack.c.bf16 %v773_v24, %v773_v24  ;;  %5256 = vmatpush3.bf16.msra.mxu0 %v5865_v30  ;;  %v5879_v2 = vld [vmem:[#allocation2 + $0xdc] ss:$36 sps:$4 sm:$0xff]   ;;  %v5884_v46 = vld [vmem:[#allocation3 + $0x150] sm:$0xff]   ;;  %v5891_v43 = vld [vmem:[#allocation3 + $0x148] sm:$0xff]  }
  0xd8   : > { %v5095_v28 = vpack.c.bf16 %v1097_v22, %v1097_v22  ;;  %5294 = vmatpush3.bf16.msra.mxu1 %v5866_v55  ;;  %v5046_v33 = vpack.c.bf16 %v783_v10, %v783_v10  ;;  %v1086_v14 = vsel %vm955_vm1, %v1080_v0, %v1081_v26  ;;  %v1087_v41 = vsel %vm955_vm1, %v1079_v35, %v1080_v0  ;;  %v5867_v35 = vld [vmem:[#allocation2 + $0x54] ss:$36 sps:$4 sm:$0xff]   ;;  %v5874_v50 = vld [vmem:[#allocation2 + $0x9c] ss:$36 sps:$4 sm:$0xff]   ;;  %v5893_v53 = vld [vmem:[#allocation3 + $0x108] sm:$0xff]  }
  0xd9   : > { %5257 = vmatprep.subr.bf16.mxu0 %v5870_v7  ;;  %5295 = vmatprep.subr.bf16.mxu1 %v5871_v9  ;;  %825 = vst [vmem:[#allocation2 + $0xe0] sm:$0xf] %v5048_v42  ;;  %824 = vst [vmem:[#allocation2 + $0xbc] sm:$0xf] %v5047_v8  ;;  %v1095_v37 = vsel %vm6570_vm6, %v1087_v41, 0.0  ;;  %v5094_v38 = vpack.c.bf16 %v1086_v14, %v1086_v14  ;;  %v5888_v11 = vld [vmem:[#allocation3 + $0x110] sm:$0xff]  }
  0xda   : > { %1137 = vst [vmem:[#allocation2 + $0xd4] sm:$0xf] %v5095_v28  ;;  %823 = vst [vmem:[#allocation2 + $0x98] sm:$0xf] %v5046_v33  ;;  %v5093_v45 = vpack.c.bf16 %v1095_v37, %v1095_v37  ;;  %2052 = vmatprep.mubr.bf16.mxu1 %v5867_v35  ;;  %v5889_v49 = vld [vmem:[#allocation3 + $0x198] sm:$0xff]   ;;  %v5892_v51 = vld [vmem:[#allocation3 + $0x1d0] sm:$0xff]  }
  0xdb   : > { %1136 = vst [vmem:[#allocation2 + $0xb0] sm:$0xf] %v5094_v38  ;;  %v5869_v20 = vld [vmem:[#allocation2 + $0x50] ss:$36 sps:$4 sm:$0xff]   ;;  %5258 = vmatpush3.bf16.msra.mxu0 %v5872_v32  ;;  %v5890_v23 = vld [vmem:[#allocation2 + $0xd8] ss:$36 sps:$4 sm:$0xff]  }
  0xdc   : > { %5296 = vmatpush3.bf16.msra.mxu1 %v5873_v5  ;;  %1135 = vst [vmem:[#allocation2 + $0x8c] sm:$0xf] %v5093_v45  ;;  %5259 = vmatprep.subr.bf16.mxu0 %v5877_v36  ;;  %v5896_v56 = vld [vmem:[#allocation3 + $0x190] sm:$0xff]   ;;  %v5898_v58 = vld [vmem:[#allocation3 + $0x140] sm:$0xff]   ;;  %v5899_v60 = vld [vmem:[#allocation3 + $0x1c8] sm:$0xff]  }
  0xdd   : > { %5297 = vmatprep.subr.bf16.mxu1 %v5878_v3  ;;  %1996 = vmatmul.mubr.bf16.gmra.mxu0 %v5876_v15  ;;  %v5894_v52 = vld [vmem:[#allocation2 + $0x14] ss:$36 sps:$4 sm:$0xff]   ;;  %v5886_v59 = vld [vmem:[#allocation2 + $0xe4] ss:$36 sps:$4 sm:$0xff]   ;;  %v5902_v55 = vld [vmem:[#allocation2 + $0x1c] ss:$36 sps:$4 sm:$0xff]  }
  0xde   : > { %2053 = vmatmul.mubr.bf16.gmra.mxu1 %v5869_v20  ;;  %2003 = vmatprep.mubr.bf16.mxu0 %v5879_v2  ;;  %v5900_v57 = vld [vmem:[#allocation3 + $0x100] sm:$0xff]   ;;  %v5901_v30 = vld [vmem:[#allocation3 + $0x188] sm:$0xff]   ;;  %v5906_v61 = vld [vmem:[#allocation3 + $0x238] sm:$0xff]  }
  0xdf   : > { %5260 = vmatpush3.bf16.msra.mxu0 %v5881_v39  ;;  %2060 = vmatprep.mubr.bf16.mxu1 %v5874_v50  ;;  %v5905_v62 = vld [vmem:[#allocation3 + $0x1c0] sm:$0xff]   ;;  %v5904_v26 = vld [vmem:[#allocation2 + $0x10] ss:$36 sps:$4 sm:$0xff]   ;;  %v5915_v0 = vld [vmem:[#allocation3 + $0x228] sm:$0xff]  }
  0xe0   : > { %5298 = vmatpush3.bf16.msra.mxu1 %v5882_v31  ;;  %5261 = vmatprep.subr.bf16.mxu0 %v5884_v46  ;;  %v5897_v25 = vld [vmem:[#allocation2 + $0xe0] ss:$36 sps:$4 sm:$0xff]   ;;  %v5911_v6 = vld [vmem:[#allocation3 + $0x230] sm:$0xff]   ;;  %v5910_v4 = vld [vmem:[#allocation2 + $0x18] ss:$36 sps:$4 sm:$0xff]  }
  0xe1   : > { %5299 = vmatprep.subr.bf16.mxu1 %v5885_v47  ;;  %v5883_v29 = vld [vmem:[#allocation2 + $0x98] ss:$36 sps:$4 sm:$0xff]   ;;  %v5909_v44 = vld [vmem:[#allocation3 + $0x180] sm:$0xff]   ;;  %v5920_v54 = vld [vmem:[#allocation2 + $0xac] ss:$36 sps:$4 sm:$0xff]  }
  0xe2   : > { %v5907_v34 = vld [vmem:[#allocation2 + $0x5c] ss:$36 sps:$4 sm:$0xff]   ;;  %v5912_v9 = vld [vmem:[#allocation2 + $0x64] ss:$36 sps:$4 sm:$0xff]   ;;  %v5924_v42 = vld [vmem:[#allocation2 + $0xec] ss:$36 sps:$4 sm:$0xff]  }
  0xe3   : > { %5262 = vmatpush3.bf16.msra.mxu0 %v5888_v11  ;;  %v5914_v7 = vld [vmem:[#allocation2 + $0x58] ss:$36 sps:$4 sm:$0xff]   ;;  %v5916_v12 = vld [vmem:[#allocation2 + $0xa4] ss:$36 sps:$4 sm:$0xff]   ;;  %v5927_v28 = vld [vmem:[#allocation3 + $0x210] sm:$0xff]  }
  0xe4   : > { %5300 = vmatpush3.bf16.msra.mxu1 %v5889_v49  ;;  %5263 = vmatprep.subr.bf16.mxu0 %v5891_v43  ;;  %v5919_v17 = vld [vmem:[#allocation3 + $0x220] sm:$0xff]   ;;  %v5923_v21 = vld [vmem:[#allocation3 + $0x218] sm:$0xff]   ;;  %v5931_v10 = vld [vmem:[#allocation3 + $0x208] sm:$0xff]  }
  0xe5   : > { %2004 = vmatmul.mubr.bf16.gmra.mxu0 %v5890_v23  ;;  %5301 = vmatprep.subr.bf16.mxu1 %v5892_v51  ;;  %v5918_v22 = vld [vmem:[#allocation2 + $0x60] ss:$36 sps:$4 sm:$0xff]   ;;  %v5926_v8 = vld [vmem:[#allocation2 + $0xa8] ss:$36 sps:$4 sm:$0xff]   ;;  %v5928_v5 = vld [vmem:[#allocation2 + $0xf4] ss:$36 sps:$4 sm:$0xff]  }
  0xe6   : > { %2061 = vmatmul.mubr.bf16.gmra.mxu1 %v5883_v29  ;;  %2109 = vmatprep.mubr.bf16.mxu0 %v5894_v52  ;;  %v5922_v24 = vld [vmem:[#allocation2 + $0xa0] ss:$36 sps:$4 sm:$0xff]   ;;  %v5930_v32 = vld [vmem:[#allocation2 + $0xe8] ss:$36 sps:$4 sm:$0xff]   ;;  %v5933_v41 = vld [vmem:[#allocation2 + $0xf0] ss:$36 sps:$4 sm:$0xff]  }
  0xe7   : > { %2068 = vmatprep.mubr.bf16.mxu1 %v5886_v59  ;;  %5264 = vmatpush3.bf16.msra.mxu0 %v5893_v53  ;;  %v5932_v33 = vld [vmem:[#allocation2 + $0x20] ss:$36 sps:$4 sm:$0xff]   ;;  %v5935_v36 = vld [vmem:[#allocation2 + $0x68] ss:$36 sps:$4 sm:$0xff]   ;;  %v5936_v3 = vld [vmem:[#allocation2 + $0xb0] ss:$36 sps:$4 sm:$0xff]  }
  0xe8   : > { %5302 = vmatpush3.bf16.msra.mxu1 %v5896_v56  ;;  %5265 = vmatprep.subr.bf16.mxu0 %v5898_v58  ;;  %v5934_v14 = vld [vmem:[#allocation3 + $0x200] sm:$0xff]   ;;  %v5937_v37 = vld [vmem:[#allocation2 + $0xf8] ss:$36 sps:$4 sm:$0xff]   ;;  %v5940_v39 = vld [vmem:[#allocation6 + $0x70] sm:$0xff]  }
  0xe9   : > { %5303 = vmatprep.subr.bf16.mxu1 %v5899_v60  ;;  %v5938_v38 = vld [vmem:[#allocation6 + $0x78] sm:$0xff]  }
  0xea   : > { %v5939_v15 = vld [vmem:[#allocation6 + $0x38] sm:$0xff]  }
  0xeb   : > { %5266 = vmatpush3.bf16.msra.mxu0 %v5900_v57 }
  0xec   : > { %5304 = vmatpush3.bf16.msra.mxu1 %v5901_v30  ;;  %5556 = vmatprep.subr.bf16.mxu0 %v5906_v61 }
  0xed   : > { %5305 = vmatprep.subr.bf16.mxu1 %v5905_v62 }
  0xee   : > { %2069 = vmatmul.mubr.bf16.gmra.mxu1 %v5897_v25  ;;  %2110 = vmatmul.mubr.bf16.vlgmr.msra.gmra.mxu0 %v5904_v26 }
  0xef   : > { %2174 = vmatprep.mubr.bf16.mxu1 %v5902_v55  ;;  %2117 = vmatprep.mubr.bf16.mxu0 %v5907_v34 }
  0xf0   : > { %5306 = vmatpush3.bf16.msra.mxu1 %v5909_v44  ;;  %5557 = vmatpush3.bf16.msra.mxu0 %v5906_v61 }
  0xf1   : > { %5558 = vmatprep.subr.bf16.mxu0 %v5911_v6  ;;  %5343 = vmatprep.subr.bf16.mxu1 %v5938_v38 }
  0xf4   : > { %5559 = vmatpush3.bf16.msra.mxu0 %v5911_v6 }
  0xf5   : > { %5560 = vmatprep.subr.bf16.mxu0 %v5915_v0 }
  0xf6   : > { %2175 = vmatmul.mubr.bf16.vlgmr.msra.gmra.mxu1 %v5910_v4  ;;  %2118 = vmatmul.mubr.bf16.gmra.mxu0 %v5914_v7 }
  0xf7   : > { %2182 = vmatprep.mubr.bf16.mxu1 %v5912_v9  ;;  %2125 = vmatprep.mubr.bf16.mxu0 %v5916_v12 }
  0xf8   : > { %5561 = vmatpush3.bf16.msra.mxu0 %v5915_v0  ;;  %5344 = vmatpush3.bf16.msra.mxu1 %v5939_v15 }
  0xf9   : > { %5562 = vmatprep.subr.bf16.mxu0 %v5919_v17  ;;  %5345 = vmatprep.subr.bf16.mxu1 %v5940_v39 }
  0xfc   : > { %5563 = vmatpush3.bf16.msra.mxu0 %v5919_v17 }
  0xfd   : > { %5564 = vmatprep.subr.bf16.mxu0 %v5923_v21 }
  0xfe   : > { %2183 = vmatmul.mubr.bf16.gmra.mxu1 %v5918_v22  ;;  %2126 = vmatmul.mubr.bf16.gmra.mxu0 %v5922_v24 }
  0xff   : > { %2190 = vmatprep.mubr.bf16.mxu1 %v5920_v54  ;;  %2133 = vmatprep.mubr.bf16.mxu0 %v5924_v42 }
 0x100   : > { %5565 = vmatpush3.bf16.msra.mxu0 %v5923_v21 }
 0x101   : > { %5566 = vmatprep.subr.bf16.mxu0 %v5927_v28 }
 0x104   : > { %5567 = vmatpush3.bf16.msra.mxu0 %v5927_v28 }
 0x105   : > { %5568 = vmatprep.subr.bf16.mxu0 %v5931_v10 }
 0x106   : > { %2191 = vmatmul.mubr.bf16.gmra.mxu1 %v5926_v8  ;;  %2134 = vmatmul.mubr.bf16.gmra.mxu0 %v5930_v32 }
 0x107   : > { %2198 = vmatprep.mubr.bf16.mxu1 %v5928_v5  ;;  %5572 = vmatprep.mubr.bf16.mxu0 %v5932_v33 }
 0x108   : > { %5569 = vmatpush3.bf16.msra.mxu0 %v5931_v10 }
 0x109   : > { %5570 = vmatprep.subr.bf16.mxu0 %v5934_v14 }
 0x10c   : > { %5571 = vmatpush3.bf16.msra.mxu0 %v5934_v14 }
 0x10e   : > { %2199 = vmatmul.mubr.bf16.gmra.mxu1 %v5933_v41 }
 0x10f   : > { %5573 = vmatmul.mubr.bf16.vlgmr.msra.gmra.mxu0 %v5935_v36 }
 0x110   : > { %5576 = vmatprep.mubr.bf16.mxu0 %v5936_v3 }
 0x117   : > { %5577 = vmatmul.mubr.bf16.gmra.mxu0 %v5937_v37  ;;  %v4714_v37 = vld [vmem:[%s7519_s2] ss:$0 sm:$0xff] }
 0x18d   : > { %v5187_v31 = vpop.f32.mrf.mxu0 }
 0x18f   : > { %v5188_v45 = vpop.f32.mrf.mxu0 }
 0x190   : > { %v5189_v41 = vadd.f32 %v5188_v45, %v5187_v31 }
 0x191   : > { %v5190_v2 = vpop.f32.mrf.mxu0  ;;  %v5227_v46 = vpop.f32.mrf.mxu1 }
 0x192   : > { %v1982_v19 = vadd.f32 %v5189_v41, %v4714_v37 }
 0x193   : > { %v5191_v47 = vpop.f32.mrf.mxu0  ;;  %v5228_v35 = vpop.f32.mrf.mxu1 }
 0x194   : > { %v5192_v38 = vadd.f32 %v5191_v47, %v5190_v2  ;;  %v5229_v16 = vadd.f32 %v5228_v35, %v5227_v46 }
 0x195   : > { %v5193_v20 = vpop.f32.mrf.mxu0  ;;  %v5230_v11 = vpop.f32.mrf.mxu1 }
 0x196   : > { %v1985_v18 = vadd.f32 %v5192_v38, %v4714_v37  ;;  %v2047_v38 = vadd.f32 %v5229_v16, %v1982_v19 }
 0x197   : > { %v5194_v49 = vpop.f32.mrf.mxu0  ;;  %v5231_v50 = vpop.f32.mrf.mxu1 }
 0x198   : > { %v5195_v15 = vadd.f32 %v5194_v49, %v5193_v20  ;;  %v5232_v1 = vadd.f32 %v5231_v50, %v5230_v11 }
 0x199   : > { %v5196_v43 = vpop.f32.mrf.mxu0 }
 0x19a   : > { %v1990_v45 = vadd.f32 %v5195_v15, %v4714_v37  ;;  %v2050_v46 = vadd.f32 %v5232_v1, %v1985_v18 }
 0x19b   : > { %v5197_v51 = vpop.f32.mrf.mxu0 }
 0x19c   : > { %v5198_v63 = vadd.f32 %v5197_v51, %v5196_v43 }
 0x19d   : > { %v5199_v53 = vpop.f32.mrf.mxu0 }
 0x19e   : > { %v5233_v23 = vpop.f32.mrf.mxu1 }
 0x19f   : > { %v5200_v56 = vpop.f32.mrf.mxu0 }
 0x1a0   : > { %v5234_v29 = vpop.f32.mrf.mxu1  ;;  %v5201_v31 = vadd.f32 %v5200_v56, %v5199_v53 }
 0x1a1   : > { %v5202_v52 = vpop.f32.mrf.mxu0  ;;  %v5235_v27 = vadd.f32 %v5234_v29, %v5233_v23 }
 0x1a2   : > { %v5236_v58 = vpop.f32.mrf.mxu1  ;;  %v1998_v35 = vadd.f32 %v5201_v31, %v4714_v37 }
 0x1a3   : > { %v5203_v59 = vpop.f32.mrf.mxu0  ;;  %v2055_v49 = vadd.f32 %v5235_v27, %v1990_v45 }
 0x1a4   : > { %v5237_v60 = vpop.f32.mrf.mxu1 }
 0x1a5   : > { %v5205_v57 = vpop.f32.mrf.mxu0 }
 0x1a6   : > { %v5239_v30 = vpop.f32.mrf.mxu1 }
 0x1a7   : > { %v5206_v61 = vpop.f32.mrf.mxu0 }
 0x1a8   : > { %v5240_v62 = vpop.f32.mrf.mxu1  ;;  %v5207_v47 = vadd.f32 %v5206_v61, %v5205_v57 }
 0x1a9   : > { %v5208_v25 = vpop.f32.mrf.mxu0  ;;  %v5241_v2 = vadd.f32 %v5240_v62, %v5239_v30 }
 0x1aa   : > { %v5242_v26 = vpop.f32.mrf.mxu1 }
 0x1ab   : > { %v5209_v44 = vpop.f32.mrf.mxu0 }
 0x1ac   : > { %v5243_v55 = vpop.f32.mrf.mxu1  ;;  %v5210_v20 = vadd.f32 %v5209_v44, %v5208_v25 }
 0x1ad   : > { %v5244_v43 = vadd.f32 %v5243_v55, %v5242_v26 }
 0x1ae   : > { %v5245_v34 = vpop.f32.mrf.mxu1  ;;  %v5267_v6 = vpop.f32.mrf.mxu0  ;;  %v2009_v57 = vadd.f32 %v5210_v20, %v4714_v37 }
 0x1b0   : > { %v5246_v0 = vpop.f32.mrf.mxu1  ;;  %v5268_v4 = vpop.f32.mrf.mxu0 }
 0x1b1   : > { %v5269_v51 = vadd.f32 %v5268_v4, %v5267_v6  ;;  %v5247_v11 = vadd.f32 %v5246_v0, %v5245_v34  ;;  %v5941_v0 = vld [vmem:[#allocation6 + $0x30] sm:$0xff]   ;;  %v5942_v4 = vld [vmem:[#allocation6 + $0xf8] sm:$0xff]  }
 0x1b2   : > { %v6830_v7 = vpop.f32.mrf.mxu1  ;;  %v6832_v9 = vpop.f32.mrf.mxu0  ;;  %5346 = vmatpush3.bf16.msra.mxu1 %v5941_v0  ;;  %5383 = vmatprep.subr.bf16.mxu0 %v5942_v4 }
 0x1b3   : > { %7592 = vst [vmem:[#allocation24_spill] sm:$0xff] %v6830_v7  ;;  %7593 = vst [vmem:[#allocation25_spill] sm:$0xff] %v6832_v9  ;;  %v1993_v9 = vadd.f32 %v5198_v63, %v4714_v37  ;;  %v2063_v63 = vadd.f32 %v5241_v2, %v1998_v35  ;;  %v2112_v61 = vadd.f32 %v5269_v51, %v2047_v38 }
 0x1b4   : > { %v6834_v12 = vpop.f32.mrf.mxu1  ;;  %v5271_v17 = vpop.f32.mrf.mxu0 }
 0x1b5   : > { %7594 = vst [vmem:[#allocation26_spill] sm:$0xff] %v6834_v12 }
 0x1b6   : > { %v5307_v21 = vpop.f32.mrf.mxu1  ;;  %v5273_v22 = vpop.f32.mrf.mxu0 }
 0x1b8   : > { %v5308_v24 = vpop.f32.mrf.mxu1  ;;  %v5274_v54 = vpop.f32.mrf.mxu0 }
 0x1b9   : > { %v5309_v56 = vadd.f32 %v5308_v24, %v5307_v21 }
 0x1ba   : > { %v6836_v42 = vpop.f32.mrf.mxu1  ;;  %v5276_v28 = vpop.f32.mrf.mxu0  ;;  %v7598_v62 = vld [vmem:[#allocation25_spill] sm:$0xff]  ;;  %v7599_v1 = vld [vmem:[#allocation24_spill] sm:$0xff] }
 0x1bb   : > { %7595 = vst [vmem:[#allocation27_spill] sm:$0xff] %v6836_v42  ;;  %v5275_v42 = vadd.f32 %v5274_v54, %v5273_v22  ;;  %v5272_v25 = vadd.f32 %v5271_v17, %v7598_v62  ;;  %v5944_v17 = vld [vmem:[#allocation6 + $0x68] sm:$0xff]  }
 0x1bc   : > { %v6838_v10 = vpop.f32.mrf.mxu1  ;;  %v5277_v8 = vpop.f32.mrf.mxu0  ;;  %v7600_v16 = vld [vmem:[#allocation26_spill] sm:$0xff]  ;;  %5347 = vmatprep.subr.bf16.mxu1 %v5944_v17 }
 0x1bd   : > { %7596 = vst [vmem:[#allocation28_spill] sm:$0xff] %v6838_v10  ;;  %v5238_v10 = vadd.f32 %v5237_v60, %v5236_v58  ;;  %v2006_v60 = vadd.f32 %v5207_v47, %v4714_v37  ;;  %v5278_v30 = vadd.f32 %v5277_v8, %v5276_v28  ;;  %v5250_v18 = vadd.f32 %v7600_v16, %v7599_v1  ;;  %v5946_v8 = vld [vmem:[#allocation6 + $0xf0] sm:$0xff]  }
 0x1be   : > { %v5313_v32 = vpop.f32.mrf.mxu1  ;;  %v5279_v5 = vpop.f32.mrf.mxu0 }
 0x1bf   : > { %v2058_v50 = vadd.f32 %v5238_v10, %v1993_v9  ;;  %v2071_v19 = vadd.f32 %v5247_v11, %v2006_v60  ;;  %v5943_v9 = vld [vmem:[#allocation6 + $0xb8] sm:$0xff]   ;;  %v2177_v10 = vadd.f32 %v5309_v56, %v2112_v61 }
 0x1c0   : > { %v5314_v33 = vpop.f32.mrf.mxu1  ;;  %v5280_v14 = vpop.f32.mrf.mxu0  ;;  %5384 = vmatpush3.bf16.msra.mxu0 %v5943_v9 }
 0x1c1   : > { %v5315_v23 = vadd.f32 %v5314_v33, %v5313_v32  ;;  %v5281_v55 = vadd.f32 %v5280_v14, %v5279_v5  ;;  %v2123_v32 = vadd.f32 %v5278_v30, %v2058_v50  ;;  %v5945_v5 = vld [vmem:[#allocation6 + $0x28] sm:$0xff]   ;;  %v2115_v14 = vadd.f32 %v5272_v25, %v2050_v46  ;;  %5385 = vmatprep.subr.bf16.mxu0 %v5946_v8 }
 0x1c2   : > { %v5316_v36 = vpop.f32.mrf.mxu1  ;;  %v6840_v3 = vpop.f32.mrf.mxu0  ;;  %v7601_v21 = vld [vmem:[#allocation27_spill] sm:$0xff]  ;;  %5348 = vmatpush3.bf16.msra.mxu1 %v5945_v5 }
 0x1c3   : > { %7597 = vst [vmem:[#allocation29_spill] sm:$0xff] %v6840_v3  ;;  %v5204_v3 = vadd.f32 %v5203_v59, %v5202_v52  ;;  %v2120_v52 = vadd.f32 %v5275_v42, %v2055_v49  ;;  %v2128_v2 = vadd.f32 %v5281_v55, %v2063_v63  ;;  %v5997_v55 = vld [vmem:[#allocation6 + $0x1a8] sm:$0xff]  }
 0x1c4   : > { %v5317_v39 = vpop.f32.mrf.mxu1  ;;  %v5283_v40 = vpop.f32.mrf.mxu0  ;;  %v7602_v22 = vld [vmem:[#allocation28_spill] sm:$0xff] }
 0x1c5   : > { %v2001_v53 = vadd.f32 %v5204_v3, %v4714_v37  ;;  %v2185_v44 = vadd.f32 %v5315_v23, %v2120_v52  ;;  %v5318_v34 = vadd.f32 %v5317_v39, %v5316_v36  ;;  %v5312_v24 = vadd.f32 %v7602_v22, %v7601_v21 }
 0x1c6   : > { %v5319_v13 = vpop.f32.mrf.mxu1  ;;  %v5285_v48 = vpop.f32.mrf.mxu0  ;;  %v2074_v23 = vadd.f32 %v5250_v18, %v2009_v57 }
 0x1c7   : > { %v2066_v27 = vadd.f32 %v5244_v43, %v2001_v53  ;;  %v2188_v49 = vadd.f32 %v5318_v34, %v2123_v32  ;;  %v2180_v51 = vadd.f32 %v5312_v24, %v2115_v14 }
 0x1c8   : > { %v5320_v12 = vpop.f32.mrf.mxu1  ;;  %v5286_v7 = vpop.f32.mrf.mxu0 }
 0x1c9   : > { %v5287_v54 = vadd.f32 %v5286_v7, %v5285_v48  ;;  %v5321_v37 = vadd.f32 %v5320_v12, %v5319_v13  ;;  %v5947_v48 = vld [vmem:[#allocation6 + $0xb0] sm:$0xff]   ;;  %v5948_v7 = vld [vmem:[#allocation6 + $0x60] sm:$0xff]  }
 0x1ca   : > { %v5322_v29 = vpop.f32.mrf.mxu1  ;;  %v5288_v41 = vpop.f32.mrf.mxu0  ;;  %v7603_v33 = vld [vmem:[#allocation29_spill] sm:$0xff]  ;;  %5386 = vmatpush3.bf16.msra.mxu0 %v5947_v48  ;;  %5349 = vmatprep.subr.bf16.mxu1 %v5948_v7 }
 0x1cb   : > { %v5284_v3 = vadd.f32 %v5283_v40, %v7603_v33  ;;  %v2136_v13 = vadd.f32 %v5287_v54, %v2071_v19  ;;  %v2193_v50 = vadd.f32 %v5321_v37, %v2128_v2 }
 0x1cc   : > { %v5323_v58 = vpop.f32.mrf.mxu1  ;;  %v5289_v59 = vpop.f32.mrf.mxu0 }
 0x1cd   : > { %v5324_v47 = vadd.f32 %v5323_v58, %v5322_v29  ;;  %v5290_v20 = vadd.f32 %v5289_v59, %v5288_v41  ;;  %v2131_v38 = vadd.f32 %v5284_v3, %v2066_v27 }
 0x1ce   : > { %v5325_v26 = vpop.f32.mrf.mxu1 }
 0x1cf   : > { %v5574_v6 = vpop.f32.mrf.mxu0  ;;  %v2139_v56 = vadd.f32 %v5290_v20, %v2074_v23  ;;  %v2196_v63 = vadd.f32 %v5324_v47, %v2131_v38  ;;  %v5949_v20 = vld [vmem:[#allocation6 + $0x20] sm:$0xff]  }
 0x1d0   : > { %v5326_v42 = vpop.f32.mrf.mxu1  ;;  %v2250_v28 = vadd.f32 %v5574_v6, %v2185_v44  ;;  %5350 = vmatpush3.bf16.msra.mxu1 %v5949_v20  ;;  %v5960_v20 = vld [vmem:[#allocation6 + $0x48] sm:$0xff]  }
 0x1d1   : > { %v2241_v15 = vpop.f32.mrf.mxu0  ;;  %v5327_v36 = vadd.f32 %v5326_v42, %v5325_v26 }
 0x1d2   : > { %v5328_v39 = vpop.f32.mrf.mxu1  ;;  %v6851_v31 = vmax.f32 %v2250_v28, 0.0  ;;  %v2242_v45 = vadd.f32 %v2241_v15, %v2177_v10 }
 0x1d3   : > { %v5575_v40 = vpop.f32.mrf.mxu0  ;;  %v2201_v53 = vadd.f32 %v5327_v36, %v2136_v13 }
 0x1d4   : > { %v5132_v12 = vpack.c.bf16 %v6851_v31, %v6851_v31  ;;  %v6855_v43 = vmax.f32 %v2242_v45, 0.0  ;;  %v5329_v46 = vpop.f32.mrf.mxu1  ;;  %v2253_v35 = vadd.f32 %v5575_v40, %v2188_v49  ;;  %v2378_v52 = vrot.slane %v6851_v31, 7  ;;  %v5950_v49 = vld [vmem:[#allocation6 + $0xe8] sm:$0xff]  }
 0x1d5   : > { %v2244_v11 = vpop.f32.mrf.mxu0  ;;  %v2690_v60 = vrot.slane %v6851_v31, 1  ;;  %v5330_v57 = vadd.f32 %v5329_v46, %v5328_v39  ;;  %5387 = vmatprep.subr.bf16.mxu0 %v5950_v49  ;;  %v5964_v49 = vld [vmem:[#allocation6 + $0x40] sm:$0xff]  }
 0x1d6   : > { %2578 = vst [vmem:[#allocation2 + $0x58] sm:$0xf] %v5132_v12  ;;  %v5130_v29 = vpack.c.bf16 %v6855_v43, %v6855_v43  ;;  %v2245_v41 = vadd.f32 %v2244_v11, %v2180_v51  ;;  %v6860_v58 = vmax.f32 %v2253_v35, 0.0  ;;  %v2376_v61 = vrot.slane %v6855_v43, 7  ;;  %v5951_v12 = vld [vmem:[#allocation6 + $0xa8] sm:$0xff]  }
 0x1d7   : > { %v5578_v59 = vpop.f32.mrf.mxu0  ;;  %v2688_v19 = vrot.slane %v6855_v43, 1  ;;  %v2204_v5 = vadd.f32 %v5330_v57, %v2139_v56  ;;  %5388 = vmatpush3.bf16.msra.mxu0 %v5951_v12  ;;  %v5952_v56 = vld [vmem:[#allocation6 + $0x58] sm:$0xff]   ;;  %v5967_v12 = vld [vmem:[#allocation6 + $0x88] sm:$0xff]  }
 0x1d8   : > { %2576 = vst [vmem:[#allocation2 + $0x10] sm:$0xf] %v5130_v29  ;;  %v6863_v30 = vmax.f32 %v2245_v41, 0.0  ;;  %v2266_v27 = vadd.f32 %v5578_v59, %v2201_v53  ;;  %v2379_v62 = vrot.slane %v6860_v58, 7  ;;  %v5133_v25 = vpack.c.bf16 %v6860_v58, %v6860_v58  ;;  %5351 = vmatprep.subr.bf16.mxu1 %v5952_v56 }
 0x1d9   : > { %v2691_v26 = vrot.slane %v6860_v58, 1  ;;  %v2257_v44 = vpop.f32.mrf.mxu0 }
 0x1da   : > { %v2377_v1 = vrot.slane %v6863_v30, 7  ;;  %v5131_v16 = vpack.c.bf16 %v6863_v30, %v6863_v30  ;;  %v2689_v18 = vrot.slane %v6863_v30, 1  ;;  %2282 = vrot.lane.b32.xlu1 %v6863_v30, %s7555_s23  ;;  %v2388_v34 = vsel %vm642_vm0, %v2378_v52, %v2379_v62  ;;  %2579 = vst [vmem:[#allocation2 + $0x7c] sm:$0xf] %v5133_v25 }
 0x1db   : > { %v2700_v6 = vsel %vm955_vm1, %v2690_v60, %v2691_v26  ;;  %v6881_v0 = vmax.f32 %v2266_v27, 0.0  ;;  %v2258_v4 = vadd.f32 %v2257_v44, %v2193_v50  ;;  %v5579_v9 = vpop.f32.mrf.mxu0  ;;  %v5109_v21 = vpack.c.bf16 %v2388_v34, %v2388_v34  ;;  %v6016_v50 = vld [vmem:[#allocation6 + $0x108] sm:$0xff]  }
 0x1dc   : > { %v5156_v22 = vpack.c.bf16 %v2700_v6, %v2700_v6  ;;  %v2389_v24 = vsel %vm642_vm0, %v2377_v1, %v2378_v52  ;;  %v2390_v54 = vsel %vm642_vm0, %v2376_v61, %v2377_v1  ;;  %2577 = vst [vmem:[#allocation2 + $0x34] sm:$0xf] %v5131_v16  ;;  %v2701_v17 = vsel %vm955_vm1, %v2689_v18, %v2690_v60 }
 0x1dd   : > { %v2394_v28 = vsel %vm6538_vm4, %v2389_v24, 0.0  ;;  %v5107_v10 = vpack.c.bf16 %v2390_v54, %v2390_v54  ;;  %v2702_v8 = vsel %vm955_vm1, %v2688_v19, %v2689_v18  ;;  %v2260_v32 = vpop.f32.mrf.mxu0  ;;  %2435 = vst [vmem:[#allocation2 + $0x70] sm:$0xf] %v5109_v21  ;;  %v2705_v37 = vsel %vm6544_vm5, %v2701_v17, 0.0 }
 0x1de   : > { %2746 = vst [vmem:[#allocation2 + $0x64] sm:$0xf] %v5156_v22  ;;  %v5108_v33 = vpack.c.bf16 %v2394_v28, %v2394_v28  ;;  %v5154_v15 = vpack.c.bf16 %v2702_v8, %v2702_v8  ;;  %v5155_v14 = vpack.c.bf16 %v2705_v37, %v2705_v37  ;;  %v5136_v36 = vpack.c.bf16 %v6881_v0, %v6881_v0  ;;  %v5954_v37 = vld [vmem:[#allocation6 + $0xe0] sm:$0xff]  }
 0x1df   : > { %2433 = vst [vmem:[#allocation2 + $0x28] sm:$0xf] %v5107_v10  ;;  %v6901_v39 = vmax.f32 %v2258_v4, 0.0  ;;  %v2269_v45 = vadd.f32 %v5579_v9, %v2204_v5  ;;  %v2261_v48 = vadd.f32 %v2260_v32, %v2196_v63  ;;  %v2382_v51 = vrot.slane %v6881_v0, 7  ;;  %5389 = vmatprep.subr.bf16.mxu0 %v5954_v37 }
 0x1e0   : > { %2434 = vst [vmem:[#allocation2 + $0x4c] sm:$0xf] %v5108_v33  ;;  %2744 = vst [vmem:[#allocation2 + $0x1c] sm:$0xf] %v5154_v15  ;;  %v2694_v23 = vrot.slane %v6881_v0, 1  ;;  %v5953_v33 = vld [vmem:[#allocation6 + $0x18] sm:$0xff]  }
 0x1e1   : > { %2745 = vst [vmem:[#allocation2 + $0x40] sm:$0xf] %v5155_v14  ;;  %2582 = vst [vmem:[#allocation2 + $0xe8] sm:$0xf] %v5136_v36  ;;  %v2380_v7 = vrot.slane %v6901_v39, 7  ;;  %v5134_v2 = vpack.c.bf16 %v6901_v39, %v6901_v39  ;;  %v2692_v47 = vrot.slane %v6901_v39, 1  ;;  %5352 = vmatpush3.bf16.msra.mxu1 %v5953_v33 }
 0x1e2   : > { %v2279_v40 = vmax.f32 %v2269_v45, 0.0  ;;  %v6907_v13 = vmax.f32 %v2261_v48, 0.0  ;;  %v5955_v36 = vld [vmem:[#allocation6 + $0xa0] sm:$0xff]   ;;  %v5956_v45 = vld [vmem:[#allocation6 + $0x50] sm:$0xff]  }
 0x1e3   : > { %v2387_v38 = vsel %vm642_vm0, %v2379_v62, %v2380_v7  ;;  %2580 = vst [vmem:[#allocation2 + $0xa0] sm:$0xf] %v5134_v2  ;;  %v2699_v46 = vsel %vm955_vm1, %v2691_v26, %v2692_v47  ;;  %5390 = vmatpush3.bf16.msra.mxu0 %v5955_v36  ;;  %5353 = vmatprep.subr.bf16.mxu1 %v5956_v45  ;;  %v5958_v2 = vld [vmem:[#allocation6 + $0xd8] sm:$0xff]  }
 0x1e4   : > { %v2396_v11 = vsel %vm6574_vm7, %v2387_v38, 0.0  ;;  %v2707_v29 = vsel %vm6570_vm6, %v2699_v46, 0.0  ;;  %v2383_v41 = vrot.slane %v2279_v40, 7  ;;  %v5137_v53 = vpack.c.bf16 %v2279_v40, %v2279_v40  ;;  %5391 = vmatprep.subr.bf16.mxu0 %v5958_v2 }
 0x1e5   : > { %v5110_v52 = vpack.c.bf16 %v2396_v11, %v2396_v11  ;;  %v5157_v59 = vpack.c.bf16 %v2707_v29, %v2707_v29  ;;  %v2695_v63 = vrot.slane %v2279_v40, 1  ;;  %v2381_v60 = vrot.slane %v6907_v13, 7 }
 0x1e6   : > { %v2384_v57 = vsel %vm642_vm0, %v2382_v51, %v2383_v41  ;;  %v2391_v27 = vsel %vm642_vm0, %v2383_v41, %v2376_v61  ;;  %2583 = vst [vmem:[#allocation2 + $0x10c] sm:$0xf] %v5137_v53  ;;  %v5135_v62 = vpack.c.bf16 %v6907_v13, %v6907_v13  ;;  %v2693_v25 = vrot.slane %v6907_v13, 1 }
 0x1e7   : > { %2436 = vst [vmem:[#allocation2 + $0x94] sm:$0xf] %v5110_v52  ;;  %2747 = vst [vmem:[#allocation2 + $0x88] sm:$0xf] %v5157_v59  ;;  %v2392_v44 = vsel %vm6428_vm2, %v2391_v27, 0.0  ;;  %v5113_v1 = vpack.c.bf16 %v2384_v57, %v2384_v57  ;;  %v2696_v16 = vsel %vm955_vm1, %v2694_v23, %v2695_v63  ;;  %v2703_v61 = vsel %vm955_vm1, %v2695_v63, %v2688_v19 }
 0x1e8   : > { %v5106_v18 = vpack.c.bf16 %v2392_v44, %v2392_v44  ;;  %v2711_v6 = vsel %vm6518_vm3, %v2703_v61, 0.0  ;;  %v5160_v4 = vpack.c.bf16 %v2696_v16, %v2696_v16  ;;  %v2385_v9 = vsel %vm642_vm0, %v2381_v60, %v2382_v51  ;;  %2581 = vst [vmem:[#allocation2 + $0xc4] sm:$0xf] %v5135_v62  ;;  %v5972_v51 = vld [vmem:[#allocation6 + $0xc0] sm:$0xff]  }
 0x1e9   : > { %2439 = vst [vmem:[#allocation2 + $0x100] sm:$0xf] %v5113_v1  ;;  %v5161_v21 = vpack.c.bf16 %v2711_v6, %v2711_v6  ;;  %v2386_v22 = vsel %vm642_vm0, %v2380_v7, %v2381_v60  ;;  %v2398_v54 = vsel %vm6596_vm8, %v2385_v9, 0.0  ;;  %v2697_v19 = vsel %vm955_vm1, %v2693_v25, %v2694_v23  ;;  %v5974_v23 = vld [vmem:[#allocation6 + $0x80] sm:$0xff]  }
 0x1ea   : > { %2432 = vst [vmem:[#allocation2 + $0x4] sm:$0xf] %v5106_v18  ;;  %2750 = vst [vmem:[#allocation2 + $0xf4] sm:$0xf] %v5160_v4  ;;  %v5111_v28 = vpack.c.bf16 %v2386_v22, %v2386_v22  ;;  %v5112_v10 = vpack.c.bf16 %v2398_v54, %v2398_v54  ;;  %v2698_v17 = vsel %vm955_vm1, %v2692_v47, %v2693_v25  ;;  %v2709_v32 = vsel %vm6600_vm9, %v2697_v19, 0.0  ;;  %v5959_v47 = vld [vmem:[#allocation6 + $0x98] sm:$0xff]  }
 0x1eb   : > { %2751 = vst [vmem:[#allocation2 + $0x118] sm:$0xf] %v5161_v21  ;;  %v5158_v15 = vpack.c.bf16 %v2698_v17, %v2698_v17  ;;  %v5159_v5 = vpack.c.bf16 %v2709_v32, %v2709_v32  ;;  %v5794_v14 = vpack.i.bf16 %v2279_v40, %v6855_v43  ;;  %v5799_v48 = vpack.i.bf16 %v6907_v13, %v6901_v39  ;;  %v5957_v43 = vld [vmem:[#allocation6 + $0x10] sm:$0xff]   ;;  %v5965_v40 = vld [vmem:[#allocation6] sm:$0xff]   ;;  %v5966_v13 = vld [vmem:[#allocation6 + $0xc8] sm:$0xff]  }
 0x1ec   : > { %2437 = vst [vmem:[#allocation2 + $0xb8] sm:$0xf] %v5111_v28  ;;  %2438 = vst [vmem:[#allocation2 + $0xdc] sm:$0xf] %v5112_v10  ;;  %v5789_v7 = vpack.i.bf16 %v6860_v58, %v6851_v31  ;;  %5354 = vmatpush3.bf16.msra.mxu1 %v5957_v43  ;;  %5392 = vmatpush3.bf16.msra.mxu0 %v5959_v47  ;;  %v5961_v31 = vld [vmem:[#allocation6 + $0x8] sm:$0xff]   ;;  %v5962_v58 = vld [vmem:[#allocation6 + $0xd0] sm:$0xff]  }
 0x1ed   : > { %2748 = vst [vmem:[#allocation2 + $0xac] sm:$0xf] %v5158_v15  ;;  %2749 = vst [vmem:[#allocation2 + $0xd0] sm:$0xf] %v5159_v5  ;;  %5795 = vrot.lane.b32.xlu1 %v5794_v14, %s6201_s30  ;;  %5785 = vrot.lane.b32.xlu0 %v5794_v14, %s7555_s23  ;;  %v5963_v39 = vld [vmem:[#allocation6 + $0x90] sm:$0xff]  }
 0x1ee   : > { %5355 = vmatprep.subr.bf16.mxu1 %v5960_v20  ;;  %5393 = vmatprep.subr.bf16.mxu0 %v5962_v58 }
 0x1f0   : > { %5356 = vmatpush3.bf16.msra.mxu1 %v5961_v31  ;;  %5394 = vmatpush3.bf16.msra.mxu0 %v5963_v39 }
 0x1f1   : > { %5800 = vrot.lane.b32.xlu1 %v5799_v48, %s7555_s23  ;;  %5790 = vrot.lane.b32.xlu0 %v5789_v7, %s7555_s23 }
 0x1f2   : > { %5357 = vmatprep.subr.bf16.mxu1 %v5964_v49  ;;  %5395 = vmatprep.subr.bf16.mxu0 %v5966_v13 }
 0x1f4   : > { %5358 = vmatpush3.bf16.msra.mxu1 %v5965_v40  ;;  %5396 = vmatpush3.bf16.msra.mxu0 %v5967_v12 }
 0x1f5   : > { %2292 = vrot.lane.b32.xlu1 %v6881_v0, %s7555_s23  ;;  %2298 = vrot.lane.b32.xlu0 %v6863_v30, %s6201_s30  ;;  %v5971_v30 = vld [vmem:[#allocation6 + $0x178] sm:$0xff]  }
 0x1f6   : > { %5423 = vmatprep.subr.bf16.mxu1 %v5971_v30  ;;  %5397 = vmatprep.subr.bf16.mxu0 %v5972_v51 }
 0x1f8   : > { %5398 = vmatpush3.bf16.msra.mxu0 %v5974_v23 }
 0x1f9   : > { %2308 = vrot.lane.b32.xlu1 %v6881_v0, %s6201_s30  ;;  %5805 = vrot.lane.b32.xlu0 %v5789_v7, %s6201_s30  ;;  %v5982_v0 = vld [vmem:[#allocation6 + $0x1f8] sm:$0xff]  }
 0x1fa   : > { %5463 = vmatprep.subr.bf16.mxu0 %v5982_v0 }
 0x1fd   : > { %5810 = vrot.lane.b32.xlu0 %v5799_v48, %s6201_s30  ;;  %s7471_s30 = scalar_lea.hbm %s7530_s13, %s5170_s14 }
 0x24c   : > { %v6968_v38 = vpop.permute.xlu1 %2282 }
 0x24d   : > { %v5123_v46 = vpack.c.bf16 %v6968_v38, %v6968_v38  ;;  %v2313_v59 = vrot.slane %v6968_v38, 7  ;;  %v2625_v63 = vrot.slane %v6968_v38, 1 }
 0x24f   : > { %2537 = vst [vmem:[#allocation2 + $0x30] sm:$0xf] %v5123_v46 }
 0x25f   : > { %v5796_v11 = vpop.permute.xlu1 %5795  ;;  %v5786_v29 = vpop.permute.xlu0 %5785 }
 0x260   : > { %v6972_v41 = vunpack.i.h.bf16 %v5796_v11  ;;  %v6974_v53 = vunpack.i.l.bf16 %v5796_v11  ;;  %v6976_v56 = vunpack.i.h.bf16 %v5786_v29  ;;  %v5787_v52 = vunpack.i.l.bf16 %v5786_v29 }
 0x262   : > { %v2447_v60 = vrot.slane %v6972_v41, 7  ;;  %v5145_v57 = vpack.c.bf16 %v6972_v41, %v6972_v41  ;;  %v2759_v27 = vrot.slane %v6972_v41, 1  ;;  %v2440_v62 = vrot.slane %v6974_v53, 7 }
 0x263   : > { %v5138_v25 = vpack.c.bf16 %v6974_v53, %v6974_v53  ;;  %v2752_v44 = vrot.slane %v6974_v53, 1  ;;  %v2319_v1 = vrot.slane %v6976_v56, 7  ;;  %v5129_v16 = vpack.c.bf16 %v6976_v56, %v6976_v56  ;;  %v5801_v61 = vpop.permute.xlu1 %5800  ;;  %v5791_v18 = vpop.permute.xlu0 %5790 }
 0x264   : > { %2623 = vst [vmem:[#allocation2 + $0x110] sm:$0xf] %v5145_v57  ;;  %v2455_v6 = vsel %vm642_vm0, %v2447_v60, %v2440_v62  ;;  %v2631_v4 = vrot.slane %v6976_v56, 1  ;;  %v2312_v9 = vrot.slane %v5787_v52, 7  ;;  %v5122_v21 = vpack.c.bf16 %v5787_v52, %v5787_v52  ;;  %v5981_v56 = vld [vmem:[#allocation6 + $0x130] sm:$0xff]  }
 0x265   : > { %v2456_v22 = vsel %vm6428_vm2, %v2455_v6, 0.0  ;;  %2616 = vst [vmem:[#allocation2 + $0x14] sm:$0xf] %v5138_v25  ;;  %v2767_v54 = vsel %vm955_vm1, %v2759_v27, %v2752_v44  ;;  %2543 = vst [vmem:[#allocation2 + $0x108] sm:$0xf] %v5129_v16  ;;  %v2624_v19 = vrot.slane %v5787_v52, 1  ;;  %v7006_v28 = vunpack.i.h.bf16 %v5801_v61 }
 0x266   : > { %v5114_v10 = vpack.c.bf16 %v2456_v22, %v2456_v22  ;;  %v2775_v17 = vsel %vm6518_vm3, %v2767_v54, 0.0  ;;  %v2326_v32 = vsel %vm642_vm0, %v2312_v9, %v2313_v59  ;;  %v2327_v33 = vsel %vm642_vm0, %v2319_v1, %v2312_v9  ;;  %2536 = vst [vmem:[#allocation2 + $0xc] sm:$0xf] %v5122_v21 }
 0x267   : > { %v5169_v37 = vpack.c.bf16 %v2775_v17, %v2775_v17  ;;  %v2328_v15 = vsel %vm6428_vm2, %v2327_v33, 0.0  ;;  %v5099_v5 = vpack.c.bf16 %v2326_v32, %v2326_v32  ;;  %v2638_v14 = vsel %vm955_vm1, %v2624_v19, %v2625_v63  ;;  %v7024_v36 = vpop.permute.xlu1 %2292  ;;  %v7036_v31 = vpop.permute.xlu0 %2298  ;;  %v5973_v33 = vld [vmem:[#allocation6 + $0x138] sm:$0xff]  }
 0x268   : > { %2496 = vst [vmem:[#allocation2 + $0x8] sm:$0xf] %v5114_v10  ;;  %v5098_v45 = vpack.c.bf16 %v2328_v15, %v2328_v15  ;;  %v2639_v48 = vsel %vm955_vm1, %v2631_v4, %v2624_v19  ;;  %v5146_v7 = vpack.c.bf16 %v2638_v14, %v2638_v14  ;;  %v2317_v43 = vrot.slane %v7006_v28, 7 }
 0x269   : > { %2815 = vst [vmem:[#allocation2 + $0x11c] sm:$0xf] %v5169_v37  ;;  %2369 = vst [vmem:[#allocation2 + $0x24] sm:$0xf] %v5099_v5  ;;  %v2647_v26 = vsel %vm6518_vm3, %v2639_v48, 0.0  ;;  %v5127_v2 = vpack.c.bf16 %v7006_v28, %v7006_v28  ;;  %v2629_v47 = vrot.slane %v7006_v28, 1  ;;  %v5802_v20 = vunpack.i.l.bf16 %v5801_v61 }
 0x26a   : > { %2368 = vst [vmem:[#allocation2] sm:$0xf] %v5098_v45  ;;  %v5153_v58 = vpack.c.bf16 %v2647_v26, %v2647_v26  ;;  %2680 = vst [vmem:[#allocation2 + $0x18] sm:$0xf] %v5146_v7  ;;  %v5793_v39 = vunpack.i.h.bf16 %v5791_v18  ;;  %v5792_v49 = vunpack.i.l.bf16 %v5791_v18  ;;  %v2318_v40 = vrot.slane %v7024_v36, 7 }
 0x26b   : > { %2541 = vst [vmem:[#allocation2 + $0xc0] sm:$0xf] %v5127_v2  ;;  %v2316_v13 = vrot.slane %v5802_v20, 7  ;;  %v5126_v12 = vpack.c.bf16 %v5802_v20, %v5802_v20  ;;  %v2628_v34 = vrot.slane %v5802_v20, 1  ;;  %v5128_v30 = vpack.c.bf16 %v7024_v36, %v7024_v36  ;;  %v5806_v54 = vpop.permute.xlu0 %5805  ;;  %v7073_v14 = vpop.permute.xlu1 %2308  ;;  %v5970_v48 = vld [vmem:[#allocation2 + $0x4] ss:$36 sps:$4 sm:$0xff]  }
 0x26c   : > { %2687 = vst [vmem:[#allocation2 + $0x114] sm:$0xf] %v5153_v58  ;;  %v2315_v51 = vrot.slane %v5793_v39, 7  ;;  %v5125_v23 = vpack.c.bf16 %v5793_v39, %v5793_v39  ;;  %v2627_v0 = vrot.slane %v5793_v39, 1  ;;  %v2314_v46 = vrot.slane %v5792_v49, 7  ;;  %v5980_v2 = vld [vmem:[#allocation6 + $0x170] sm:$0xff]   ;;  %3655 = vmatprep.mubr.bf16.mxu1 %v5970_v48 }
 0x26d   : > { %v2322_v11 = vsel %vm642_vm0, %v2316_v13, %v2317_v43  ;;  %2540 = vst [vmem:[#allocation2 + $0x9c] sm:$0xf] %v5126_v12  ;;  %v2634_v29 = vsel %vm955_vm1, %v2628_v34, %v2629_v47  ;;  %v5124_v52 = vpack.c.bf16 %v5792_v49, %v5792_v49  ;;  %v2626_v57 = vrot.slane %v5792_v49, 1  ;;  %2542 = vst [vmem:[#allocation2 + $0xe4] sm:$0xf] %v5128_v30 }
 0x26e   : > { %v5103_v25 = vpack.c.bf16 %v2322_v11, %v2322_v11  ;;  %v5150_v16 = vpack.c.bf16 %v2634_v29, %v2634_v29  ;;  %v2323_v61 = vsel %vm642_vm0, %v2315_v51, %v2316_v13  ;;  %2539 = vst [vmem:[#allocation2 + $0x78] sm:$0xf] %v5125_v23  ;;  %v2635_v18 = vsel %vm955_vm1, %v2627_v0, %v2628_v34 }
 0x26f   : > { %v2332_v6 = vsel %vm6574_vm7, %v2323_v61, 0.0  ;;  %v2643_v9 = vsel %vm6570_vm6, %v2635_v18, 0.0  ;;  %v2324_v21 = vsel %vm642_vm0, %v2314_v46, %v2315_v51  ;;  %v2325_v22 = vsel %vm642_vm0, %v2313_v59, %v2314_v46  ;;  %2538 = vst [vmem:[#allocation2 + $0x54] sm:$0xf] %v5124_v52  ;;  %v5811_v51 = vpop.permute.xlu0 %5810  ;;  %v5993_v61 = vld [vmem:[#allocation6 + $0x160] sm:$0xff]  }
 0x270   : > { %2373 = vst [vmem:[#allocation2 + $0xb4] sm:$0xf] %v5103_v25  ;;  %2684 = vst [vmem:[#allocation2 + $0xa8] sm:$0xf] %v5150_v16  ;;  %v5102_v19 = vpack.c.bf16 %v2332_v6, %v2332_v6  ;;  %v5149_v10 = vpack.c.bf16 %v2643_v9, %v2643_v9  ;;  %v2330_v17 = vsel %vm6538_vm4, %v2325_v22, 0.0  ;;  %v5101_v32 = vpack.c.bf16 %v2324_v21, %v2324_v21  ;;  %v5988_v25 = vld [vmem:[#allocation6 + $0x128] sm:$0xff]  }
 0x271   : > { %v5100_v37 = vpack.c.bf16 %v2330_v17, %v2330_v17  ;;  %v2636_v15 = vsel %vm955_vm1, %v2626_v57, %v2627_v0  ;;  %v2637_v59 = vsel %vm955_vm1, %v2625_v63, %v2626_v57  ;;  %v2320_v5 = vsel %vm642_vm0, %v2318_v40, %v2319_v1  ;;  %v5968_v45 = vld [vmem:[#allocation2] ss:$36 sps:$4 sm:$0xff]   ;;  %v5975_v22 = vld [vmem:[#allocation2 + $0x4c] ss:$36 sps:$4 sm:$0xff]  }
 0x272   : > { %2372 = vst [vmem:[#allocation2 + $0x90] sm:$0xf] %v5102_v19  ;;  %2683 = vst [vmem:[#allocation2 + $0x84] sm:$0xf] %v5149_v10  ;;  %v2641_v7 = vsel %vm6544_vm5, %v2637_v59, 0.0  ;;  %v5148_v26 = vpack.c.bf16 %v2636_v15, %v2636_v15  ;;  %v2321_v38 = vsel %vm642_vm0, %v2317_v43, %v2318_v40  ;;  %v5105_v63 = vpack.c.bf16 %v2320_v5, %v2320_v5 }
 0x273   : > { %2371 = vst [vmem:[#allocation2 + $0x6c] sm:$0xf] %v5101_v32  ;;  %2370 = vst [vmem:[#allocation2 + $0x48] sm:$0xf] %v5100_v37  ;;  %v5147_v20 = vpack.c.bf16 %v2641_v7, %v2641_v7  ;;  %v2334_v1 = vsel %vm6596_vm8, %v2321_v38, 0.0  ;;  %v2630_v58 = vrot.slane %v7024_v36, 1  ;;  %v5139_v13 = vpack.c.bf16 %v7036_v31, %v7036_v31  ;;  %3656 = vmatmul.mubr.bf16.vlgmr.msra.gmra.mxu1 %v5968_v45 }
 0x274   : > { %v2441_v39 = vrot.slane %v7036_v31, 7  ;;  %2682 = vst [vmem:[#allocation2 + $0x60] sm:$0xf] %v5148_v26  ;;  %v5104_v49 = vpack.c.bf16 %v2334_v1, %v2334_v1  ;;  %2375 = vst [vmem:[#allocation2 + $0xfc] sm:$0xf] %v5105_v63  ;;  %v2753_v43 = vrot.slane %v7036_v31, 1  ;;  %v5144_v30 = vpack.c.bf16 %v7073_v14, %v7073_v14  ;;  %5424 = vmatpush3.bf16.msra.mxu1 %v5973_v33 }
 0x275   : > { %v2446_v40 = vrot.slane %v7073_v14, 7  ;;  %2681 = vst [vmem:[#allocation2 + $0x3c] sm:$0xf] %v5147_v20  ;;  %v2632_v36 = vsel %vm955_vm1, %v2630_v58, %v2631_v4  ;;  %v2633_v12 = vsel %vm955_vm1, %v2629_v47, %v2630_v58  ;;  %2617 = vst [vmem:[#allocation2 + $0x38] sm:$0xf] %v5139_v13  ;;  %5425 = vmatprep.subr.bf16.mxu1 %v5980_v2  ;;  %v2758_v29 = vrot.slane %v7073_v14, 1 }
 0x276   : > { %v2454_v34 = vsel %vm642_vm0, %v2440_v62, %v2441_v39  ;;  %2374 = vst [vmem:[#allocation2 + $0xd8] sm:$0xf] %v5104_v49  ;;  %v2645_v4 = vsel %vm6600_vm9, %v2633_v12, 0.0  ;;  %v5152_v28 = vpack.c.bf16 %v2632_v36, %v2632_v36  ;;  %v2766_v47 = vsel %vm955_vm1, %v2752_v44, %v2753_v43  ;;  %v5985_v62 = vld [vmem:[#allocation6 + $0x168] sm:$0xff]   ;;  %2622 = vst [vmem:[#allocation2 + $0xec] sm:$0xf] %v5144_v30 }
 0x277   : > { %v5115_v23 = vpack.c.bf16 %v2454_v34, %v2454_v34  ;;  %v5151_v0 = vpack.c.bf16 %v2645_v4, %v2645_v4  ;;  %v5162_v46 = vpack.c.bf16 %v2766_v47, %v2766_v47  ;;  %v2448_v11 = vsel %vm642_vm0, %v2446_v40, %v2447_v60  ;;  %3663 = vmatprep.mubr.bf16.mxu1 %v5975_v22  ;;  %v5986_v15 = vld [vmem:[#allocation2 + $0x94] ss:$36 sps:$4 sm:$0xff]   ;;  %v5995_v26 = vld [vmem:[#allocation6 + $0x120] sm:$0xff]   ;;  %v5979_v13 = vld [vmem:[#allocation2 + $0xc] ss:$36 sps:$4 sm:$0xff]  }
 0x278   : > { %2686 = vst [vmem:[#allocation2 + $0xf0] sm:$0xf] %v5152_v28  ;;  %v5121_v53 = vpack.c.bf16 %v2448_v11, %v2448_v11  ;;  %v7116_v52 = vunpack.i.h.bf16 %v5806_v54  ;;  %v5807_v44 = vunpack.i.l.bf16 %v5806_v54  ;;  %v7118_v57 = vunpack.i.h.bf16 %v5811_v51  ;;  %5426 = vmatpush3.bf16.msra.mxu1 %v5981_v56  ;;  %v5983_v7 = vld [vmem:[#allocation6 + $0x1b8] sm:$0xff]   ;;  %v5989_v36 = vld [vmem:[#allocation6 + $0x1f0] sm:$0xff]   ;;  %3720 = vmatprep.mubr.bf16.mxu0 %v5979_v13 }
 0x279   : > { %2497 = vst [vmem:[#allocation2 + $0x2c] sm:$0xf] %v5115_v23  ;;  %2685 = vst [vmem:[#allocation2 + $0xcc] sm:$0xf] %v5151_v0  ;;  %v2760_v16 = vsel %vm955_vm1, %v2758_v29, %v2759_v27  ;;  %v7124_v60 = vunpack.i.l.bf16 %v5811_v51  ;;  %5427 = vmatprep.subr.bf16.mxu1 %v5985_v62  ;;  %v6001_v20 = vld [vmem:[#allocation6 + $0x158] sm:$0xff]   ;;  %v5990_v56 = vld [vmem:[#allocation6 + $0x1b0] sm:$0xff]  }
 0x27a   : > { %2808 = vst [vmem:[#allocation2 + $0x20] sm:$0xf] %v5162_v46  ;;  %2503 = vst [vmem:[#allocation2 + $0x104] sm:$0xf] %v5121_v53  ;;  %v5168_v18 = vpack.c.bf16 %v2760_v16, %v2760_v16  ;;  %v2443_v6 = vrot.slane %v7116_v52, 7  ;;  %v5141_v9 = vpack.c.bf16 %v7116_v52, %v7116_v52  ;;  %v2755_v21 = vrot.slane %v7116_v52, 1 }
 0x27b   : > { %v2442_v54 = vrot.slane %v5807_v44, 7  ;;  %v5140_v41 = vpack.c.bf16 %v5807_v44, %v5807_v44  ;;  %v2754_v19 = vrot.slane %v5807_v44, 1  ;;  %v2445_v27 = vrot.slane %v7118_v57, 7  ;;  %v5984_v10 = vld [vmem:[#allocation2 + $0x48] ss:$36 sps:$4 sm:$0xff]   ;;  %v6004_v4 = vld [vmem:[#allocation6 + $0x118] sm:$0xff]  }
 0x27c   : > { %2814 = vst [vmem:[#allocation2 + $0xf8] sm:$0xf] %v5168_v18  ;;  %2619 = vst [vmem:[#allocation2 + $0x80] sm:$0xf] %v5141_v9  ;;  %v5143_v17 = vpack.c.bf16 %v7118_v57, %v7118_v57  ;;  %v2757_v32 = vrot.slane %v7118_v57, 1  ;;  %v2444_v33 = vrot.slane %v7124_v60, 7  ;;  %v5142_v37 = vpack.c.bf16 %v7124_v60, %v7124_v60  ;;  %3664 = vmatmul.mubr.bf16.gmra.mxu1 %v5984_v10 }
 0x27d   : > { %v2452_v59 = vsel %vm642_vm0, %v2442_v54, %v2443_v6  ;;  %v2453_v5 = vsel %vm642_vm0, %v2441_v39, %v2442_v54  ;;  %2618 = vst [vmem:[#allocation2 + $0x5c] sm:$0xf] %v5140_v41  ;;  %v2764_v45 = vsel %vm955_vm1, %v2754_v19, %v2755_v21  ;;  %v2765_v48 = vsel %vm955_vm1, %v2753_v43, %v2754_v19  ;;  %v6000_v28 = vld [vmem:[#allocation2 + $0x90] ss:$36 sps:$4 sm:$0xff]   ;;  %v5996_v62 = vld [vmem:[#allocation6 + $0x1e8] sm:$0xff]   ;;  %v6006_v16 = vld [vmem:[#allocation6 + $0x1a0] sm:$0xff]  }
 0x27e   : > { %v2458_v38 = vsel %vm6538_vm4, %v2453_v5, 0.0  ;;  %v5117_v63 = vpack.c.bf16 %v2452_v59, %v2452_v59  ;;  %v2769_v31 = vsel %vm6544_vm5, %v2765_v48, 0.0  ;;  %v5164_v2 = vpack.c.bf16 %v2764_v45, %v2764_v45  ;;  %2621 = vst [vmem:[#allocation2 + $0xc8] sm:$0xf] %v5143_v17  ;;  %2620 = vst [vmem:[#allocation2 + $0xa4] sm:$0xf] %v5142_v37  ;;  %3671 = vmatprep.mubr.bf16.mxu1 %v5986_v15 }
 0x27f   : > { %5428 = vmatpush3.bf16.msra.mxu1 %v5988_v25  ;;  %v5116_v1 = vpack.c.bf16 %v2458_v38, %v2458_v38  ;;  %v5163_v58 = vpack.c.bf16 %v2769_v31, %v2769_v31  ;;  %v2449_v39 = vsel %vm642_vm0, %v2445_v27, %v2446_v40  ;;  %v2761_v42 = vsel %vm955_vm1, %v2757_v32, %v2758_v29  ;;  %v6007_v23 = vld [vmem:[#allocation6 + $0x150] sm:$0xff]   ;;  %v6002_v0 = vld [vmem:[#allocation2 + $0xdc] ss:$36 sps:$4 sm:$0xff]   ;;  %v6015_v44 = vld [vmem:[#allocation6 + $0x148] sm:$0xff]  }
 0x280   : > { %v5977_v49 = vld [vmem:[#allocation2 + $0x8] ss:$36 sps:$4 sm:$0xff]   ;;  %5429 = vmatprep.subr.bf16.mxu1 %v5993_v61  ;;  %2499 = vst [vmem:[#allocation2 + $0x74] sm:$0xf] %v5117_v63  ;;  %2810 = vst [vmem:[#allocation2 + $0x68] sm:$0xf] %v5164_v2  ;;  %v2450_v14 = vsel %vm642_vm0, %v2444_v33, %v2445_v27  ;;  %v2451_v40 = vsel %vm642_vm0, %v2443_v6, %v2444_v33 }
 0x281   : > { %v2462_v3 = vsel %vm6596_vm8, %v2449_v39, 0.0  ;;  %v2773_v43 = vsel %vm6600_vm9, %v2761_v42, 0.0  ;;  %2498 = vst [vmem:[#allocation2 + $0x50] sm:$0xf] %v5116_v1  ;;  %2809 = vst [vmem:[#allocation2 + $0x44] sm:$0xf] %v5163_v58  ;;  %v5119_v51 = vpack.c.bf16 %v2450_v14, %v2450_v14  ;;  %3721 = vmatmul.mubr.bf16.vlgmr.msra.gmra.mxu0 %v5977_v49 }
 0x282   : > { %v5120_v12 = vpack.c.bf16 %v2462_v3, %v2462_v3  ;;  %v5167_v34 = vpack.c.bf16 %v2773_v43, %v2773_v43  ;;  %v2460_v30 = vsel %vm6574_vm7, %v2451_v40, 0.0  ;;  %v2756_v8 = vrot.slane %v7124_v60, 1  ;;  %5464 = vmatpush3.bf16.msra.mxu0 %v5983_v7  ;;  %v6009_v53 = vld [vmem:[#allocation6 + $0x110] sm:$0xff]   ;;  %v6005_v25 = vld [vmem:[#allocation6 + $0x1e0] sm:$0xff]   ;;  %v6014_v18 = vld [vmem:[#allocation2 + $0xd8] ss:$36 sps:$4 sm:$0xff]  }
 0x283   : > { %v5118_v24 = vpack.c.bf16 %v2460_v30, %v2460_v30  ;;  %5430 = vmatpush3.bf16.msra.mxu1 %v5995_v26  ;;  %2501 = vst [vmem:[#allocation2 + $0xbc] sm:$0xf] %v5119_v51  ;;  %5465 = vmatprep.subr.bf16.mxu0 %v5989_v36  ;;  %v5991_v52 = vld [vmem:[#allocation2 + $0x54] ss:$36 sps:$4 sm:$0xff]   ;;  %v5998_v60 = vld [vmem:[#allocation2 + $0x9c] ss:$36 sps:$4 sm:$0xff]  }
 0x284   : > { %2502 = vst [vmem:[#allocation2 + $0xe0] sm:$0xf] %v5120_v12  ;;  %2813 = vst [vmem:[#allocation2 + $0xd4] sm:$0xf] %v5167_v34  ;;  %5431 = vmatprep.subr.bf16.mxu1 %v6001_v20  ;;  %v2762_v35 = vsel %vm955_vm1, %v2756_v8, %v2757_v32  ;;  %v2763_v47 = vsel %vm955_vm1, %v2755_v21, %v2756_v8  ;;  %3672 = vmatmul.mubr.bf16.gmra.mxu1 %v6000_v28  ;;  %v6022_v61 = vld [vmem:[#allocation6 + $0x140] sm:$0xff]   ;;  %v6010_v6 = vld [vmem:[#allocation6 + $0x1d8] sm:$0xff]  }
 0x285   : > { %2500 = vst [vmem:[#allocation2 + $0x98] sm:$0xf] %v5118_v24  ;;  %v2771_v46 = vsel %vm6570_vm6, %v2763_v47, 0.0  ;;  %v5166_v11 = vpack.c.bf16 %v2762_v35, %v2762_v35  ;;  %3679 = vmatprep.mubr.bf16.mxu1 %v6002_v0  ;;  %3728 = vmatprep.mubr.bf16.mxu0 %v5991_v52  ;;  %v6019_v9 = vld [vmem:[#allocation2 + $0x14] ss:$36 sps:$4 sm:$0xff]   ;;  %v6024_v21 = vld [vmem:[#allocation6 + $0x100] sm:$0xff]  }
 0x286   : > { %v5165_v29 = vpack.c.bf16 %v2771_v46, %v2771_v46  ;;  %5466 = vmatpush3.bf16.msra.mxu0 %v5990_v56  ;;  %v6013_v22 = vld [vmem:[#allocation6 + $0x198] sm:$0xff]   ;;  %v6020_v41 = vld [vmem:[#allocation6 + $0x1d0] sm:$0xff]   ;;  %v6011_v27 = vld [vmem:[#allocation2 + $0xe4] ss:$36 sps:$4 sm:$0xff]   ;;  %v7553_v24 = vmov 0.0   ;;  %vm4392_vm0 = vcmask 1043456  }
 0x287   : > { %5432 = vmatpush3.bf16.msra.mxu1 %v6004_v4  ;;  %2812 = vst [vmem:[#allocation2 + $0xb0] sm:$0xf] %v5166_v11  ;;  %5467 = vmatprep.subr.bf16.mxu0 %v5996_v62  ;;  %v6030_v19 = vld [vmem:[#allocation6 + $0x238] sm:$0xff]   ;;  %v6017_v10 = vld [vmem:[#allocation2 + $0x10] ss:$36 sps:$4 sm:$0xff]   ;;  %v6025_v33 = vld [vmem:[#allocation6 + $0x1c8] sm:$0xff]  }
 0x288   : > { %5433 = vmatprep.subr.bf16.mxu1 %v6007_v23  ;;  %2811 = vst [vmem:[#allocation2 + $0x8c] sm:$0xf] %v5165_v29  ;;  %v5994_v57 = vld [vmem:[#allocation2 + $0x50] ss:$36 sps:$4 sm:$0xff]   ;;  %v6031_v37 = vld [vmem:[#allocation2 + $0x5c] ss:$36 sps:$4 sm:$0xff]  }
 0x289   : > { %3729 = vmatmul.mubr.bf16.gmra.mxu0 %v5994_v57  ;;  %v6021_v17 = vld [vmem:[#allocation6 + $0x190] sm:$0xff]   ;;  %v6026_v15 = vld [vmem:[#allocation6 + $0x188] sm:$0xff]   ;;  %v6033_v5 = vld [vmem:[#allocation6 + $0x1c0] sm:$0xff]  }
 0x28a   : > { %5468 = vmatpush3.bf16.msra.mxu0 %v5997_v55  ;;  %3736 = vmatprep.mubr.bf16.mxu0 %v5998_v60  ;;  %v6035_v32 = vld [vmem:[#allocation6 + $0x230] sm:$0xff]   ;;  %v6039_v45 = vld [vmem:[#allocation6 + $0x228] sm:$0xff]   ;;  %v6029_v48 = vld [vmem:[#allocation2 + $0x1c] ss:$36 sps:$4 sm:$0xff]  }
 0x28b   : > { %5434 = vmatpush3.bf16.msra.mxu1 %v6009_v53  ;;  %5469 = vmatprep.subr.bf16.mxu0 %v6005_v25  ;;  %v6023_v59 = vld [vmem:[#allocation2 + $0xe0] ss:$36 sps:$4 sm:$0xff]   ;;  %v6038_v26 = vld [vmem:[#allocation2 + $0x58] ss:$36 sps:$4 sm:$0xff]   ;;  %v6050_v58 = vld [vmem:[#allocation6 + $0x210] sm:$0xff]  }
 0x28c   : > { %5435 = vmatprep.subr.bf16.mxu1 %v6015_v44  ;;  %3680 = vmatmul.mubr.bf16.gmra.mxu1 %v6014_v18  ;;  %v6008_v54 = vld [vmem:[#allocation2 + $0x98] ss:$36 sps:$4 sm:$0xff]   ;;  %v6034_v7 = vld [vmem:[#allocation6 + $0x180] sm:$0xff]   ;;  %v6048_v39 = vld [vmem:[#allocation2 + $0xec] ss:$36 sps:$4 sm:$0xff]  }
 0x28d   : > { %3785 = vmatprep.mubr.bf16.mxu1 %v6019_v9  ;;  %v6042_v38 = vld [vmem:[#allocation6 + $0x220] sm:$0xff]   ;;  %v6047_v31 = vld [vmem:[#allocation6 + $0x218] sm:$0xff]   ;;  %v6055_v42 = vld [vmem:[#allocation6 + $0x208] sm:$0xff]  }
 0x28e   : > { %5470 = vmatpush3.bf16.msra.mxu0 %v6006_v16  ;;  %v6040_v63 = vld [vmem:[#allocation2 + $0xa4] ss:$36 sps:$4 sm:$0xff]   ;;  %v6027_v2 = vld [vmem:[#allocation2 + $0x18] ss:$36 sps:$4 sm:$0xff]   ;;  %v6044_v13 = vld [vmem:[#allocation2 + $0xac] ss:$36 sps:$4 sm:$0xff]  }
 0x28f   : > { %5436 = vmatpush3.bf16.msra.mxu1 %v6016_v50  ;;  %5471 = vmatprep.subr.bf16.mxu0 %v6010_v6  ;;  %v6036_v20 = vld [vmem:[#allocation2 + $0x64] ss:$36 sps:$4 sm:$0xff]   ;;  %v6052_v36 = vld [vmem:[#allocation2 + $0xf4] ss:$36 sps:$4 sm:$0xff]  }
 0x290   : > { %5437 = vmatprep.subr.bf16.mxu1 %v6022_v61  ;;  %v6046_v1 = vld [vmem:[#allocation2 + $0xa0] ss:$36 sps:$4 sm:$0xff]   ;;  %v6054_v3 = vld [vmem:[#allocation2 + $0xe8] ss:$36 sps:$4 sm:$0xff]   ;;  %v6060_v34 = vld [vmem:[#allocation2 + $0xb0] ss:$36 sps:$4 sm:$0xff]  }
 0x291   : > { %3737 = vmatmul.mubr.bf16.gmra.mxu0 %v6008_v54  ;;  %v6043_v49 = vld [vmem:[#allocation2 + $0x60] ss:$36 sps:$4 sm:$0xff]   ;;  %v6051_v40 = vld [vmem:[#allocation2 + $0xa8] ss:$36 sps:$4 sm:$0xff]   ;;  %v6058_v30 = vld [vmem:[#allocation2 + $0xf0] ss:$36 sps:$4 sm:$0xff]  }
 0x292   : > { %3744 = vmatprep.mubr.bf16.mxu0 %v6011_v27  ;;  %5472 = vmatpush3.bf16.msra.mxu0 %v6013_v22  ;;  %v6057_v43 = vld [vmem:[#allocation6 + $0x200] sm:$0xff]   ;;  %v6059_v12 = vld [vmem:[#allocation2 + $0x68] ss:$36 sps:$4 sm:$0xff]   ;;  %v6061_v51 = vld [vmem:[#allocation2 + $0xf8] ss:$36 sps:$4 sm:$0xff]  }
 0x293   : > { %5438 = vmatpush3.bf16.msra.mxu1 %v6024_v21  ;;  %5473 = vmatprep.subr.bf16.mxu0 %v6020_v41  ;;  %v6056_v14 = vld [vmem:[#allocation2 + $0x20] ss:$36 sps:$4 sm:$0xff]   ;;  %v4038_v8 = vld [vmem:[%s7526_s9 + $0x78] sm:$0xff]  ;;  %v4037_v56 = vld [vmem:[%s7526_s9 + $0x70] sm:$0xff] }
 0x294   : > { %5580 = vmatprep.subr.bf16.mxu1 %v6030_v19  ;;  %v4036_v4 = vld [vmem:[%s7526_s9 + $0x68] sm:$0xff]  ;;  %v4035_v28 = vld [vmem:[%s7526_s9 + $0x60] sm:$0xff]  ;;  %v4034_v23 = vld [vmem:[%s7526_s9 + $0x58] sm:$0xff] }
 0x295   : > { %v4033_v35 = vld [vmem:[%s7526_s9 + $0x50] sm:$0xff]  ;;  %v4032_v47 = vld [vmem:[%s7526_s9 + $0x48] sm:$0xff]  ;;  %v4031_v62 = vld [vmem:[%s7526_s9 + $0x40] sm:$0xff] }
 0x296   : > { %3786 = vmatmul.mubr.bf16.vlgmr.msra.gmra.mxu1 %v6017_v10  ;;  %5474 = vmatpush3.bf16.msra.mxu0 %v6021_v17  ;;  %v4030_v0 = vld [vmem:[%s7526_s9 + $0x38] sm:$0xff]  ;;  %v4029_v46 = vld [vmem:[%s7526_s9 + $0x30] sm:$0xff]  ;;  %v4028_v11 = vld [vmem:[%s7526_s9 + $0x28] sm:$0xff] }
 0x297   : > { %3793 = vmatprep.mubr.bf16.mxu1 %v6031_v37  ;;  %5581 = vmatpush3.bf16.msra.mxu1 %v6030_v19  ;;  %v4027_v29 = vld [vmem:[%s7526_s9 + $0x20] sm:$0xff]  ;;  %v4026_v53 = vld [vmem:[%s7526_s9 + $0x18] sm:$0xff]  ;;  %v4025_v44 = vld [vmem:[%s7526_s9 + $0x10] sm:$0xff] }
 0x298   : > { %5582 = vmatprep.subr.bf16.mxu1 %v6035_v32  ;;  %5475 = vmatprep.subr.bf16.mxu0 %v6025_v33  ;;  %v4024_v52 = vld [vmem:[%s7526_s9 + $0x8] sm:$0xff]  ;;  %v7251_v21 = vld [vmem:[%s7521_s4] ss:$0 sm:$0xff] }
 0x299   : > { %3745 = vmatmul.mubr.bf16.gmra.mxu0 %v6023_v59 }
 0x29a   : > { %5476 = vmatpush3.bf16.msra.mxu0 %v6026_v15  ;;  %3850 = vmatprep.mubr.bf16.mxu0 %v6029_v48 }
 0x29b   : > { %5583 = vmatpush3.bf16.msra.mxu1 %v6035_v32  ;;  %5477 = vmatprep.subr.bf16.mxu0 %v6033_v5 }
 0x29c   : > { %5584 = vmatprep.subr.bf16.mxu1 %v6039_v45 }
 0x29e   : > { %3794 = vmatmul.mubr.bf16.gmra.mxu1 %v6038_v26  ;;  %5478 = vmatpush3.bf16.msra.mxu0 %v6034_v7 }
 0x29f   : > { %3801 = vmatprep.mubr.bf16.mxu1 %v6040_v63  ;;  %5585 = vmatpush3.bf16.msra.mxu1 %v6039_v45 }
 0x2a0   : > { %5586 = vmatprep.subr.bf16.mxu1 %v6042_v38  ;;  %5623 = vmatprep.subr.mxu0 %v7553_v24 }
 0x2a1   : > { %3851 = vmatmul.mubr.bf16.vlgmr.msra.gmra.mxu0 %v6027_v2 }
 0x2a2   : > { %3858 = vmatprep.mubr.bf16.mxu0 %v6036_v20  ;;  %5624 = vmatpush3.msra.mxu0 %v4038_v8 }
 0x2a3   : > { %5587 = vmatpush3.bf16.msra.mxu1 %v6042_v38  ;;  %5625 = vmatprep.subr.mxu0 %v7553_v24 }
 0x2a4   : > { %5588 = vmatprep.subr.bf16.mxu1 %v6047_v31  ;;  %5626 = vmatpush3.msra.mxu0 %v4037_v56 }
 0x2a5   : > { %5627 = vmatprep.subr.mxu0 %v7553_v24 }
 0x2a6   : > { %3802 = vmatmul.mubr.bf16.gmra.mxu1 %v6046_v1  ;;  %5628 = vmatpush3.msra.mxu0 %v4036_v4 }
 0x2a7   : > { %3809 = vmatprep.mubr.bf16.mxu1 %v6048_v39  ;;  %5589 = vmatpush3.bf16.msra.mxu1 %v6047_v31 }
 0x2a8   : > { %5590 = vmatprep.subr.bf16.mxu1 %v6050_v58  ;;  %5629 = vmatprep.subr.mxu0 %v7553_v24 }
 0x2a9   : > { %3859 = vmatmul.mubr.bf16.gmra.mxu0 %v6043_v49 }
 0x2aa   : > { %3866 = vmatprep.mubr.bf16.mxu0 %v6044_v13  ;;  %5630 = vmatpush3.msra.mxu0 %v4035_v28 }
 0x2ab   : > { %5591 = vmatpush3.bf16.msra.mxu1 %v6050_v58  ;;  %5631 = vmatprep.subr.mxu0 %v7553_v24 }
 0x2ac   : > { %5592 = vmatprep.subr.bf16.mxu1 %v6055_v42  ;;  %5632 = vmatpush3.msra.mxu0 %v4034_v23 }
 0x2ad   : > { %5633 = vmatprep.subr.mxu0 %v7553_v24 }
 0x2ae   : > { %3810 = vmatmul.mubr.bf16.gmra.mxu1 %v6054_v3  ;;  %5634 = vmatpush3.msra.mxu0 %v4033_v35 }
 0x2af   : > { %5593 = vmatpush3.bf16.msra.mxu1 %v6055_v42  ;;  %5596 = vmatprep.mubr.bf16.mxu1 %v6056_v14 }
 0x2b0   : > { %5594 = vmatprep.subr.bf16.mxu1 %v6057_v43  ;;  %5635 = vmatprep.subr.mxu0 %v7553_v24 }
 0x2b1   : > { %3867 = vmatmul.mubr.bf16.gmra.mxu0 %v6051_v40 }
 0x2b2   : > { %3874 = vmatprep.mubr.bf16.mxu0 %v6052_v36  ;;  %5636 = vmatpush3.msra.mxu0 %v4032_v47 }
 0x2b3   : > { %5595 = vmatpush3.bf16.msra.mxu1 %v6057_v43  ;;  %5637 = vmatprep.subr.mxu0 %v7553_v24 }
 0x2b4   : > { %5604 = vmatprep.subr.mxu1 %v7553_v24  ;;  %5638 = vmatpush3.msra.mxu0 %v4031_v62 }
 0x2b5   : > { %5639 = vmatprep.subr.mxu0 %v7553_v24 }
 0x2b6   : > { %5597 = vmatmul.mubr.bf16.vlgmr.msra.gmra.mxu1 %v6059_v12  ;;  %5640 = vmatpush3.msra.mxu0 %v4030_v0 }
 0x2b7   : > { %5600 = vmatprep.mubr.bf16.mxu1 %v6060_v34  ;;  %5641 = vmatprep.subr.mxu0 %v7553_v24 }
 0x2b8   : > { %5642 = vmatpush3.msra.mxu0 %v4029_v46 }
 0x2b9   : > { %3875 = vmatmul.mubr.bf16.gmra.mxu0 %v6058_v30  ;;  %5643 = vmatprep.subr.mxu0 %v7553_v24 }
 0x2ba   : > { %5655 = vmatprep.mubr.msk.f32.mxu0 %vm6203_vm10, %v7553_v24  ;;  %5644 = vmatpush3.msra.mxu0 %v4028_v11 }
 0x2bb   : > { %5645 = vmatprep.subr.mxu0 %v7553_v24 }
 0x2bc   : > { %5646 = vmatpush3.msra.mxu0 %v4027_v29 }
 0x2bd   : > { %5647 = vmatprep.subr.mxu0 %v7553_v24 }
 0x2be   : > { %5601 = vmatmul.mubr.bf16.gmra.mxu1 %v6061_v51  ;;  %5648 = vmatpush3.msra.mxu0 %v4026_v53 }
 0x2bf   : > { %5620 = vmatprep.mubr.msk.f32.mxu1 %vm6203_vm10, %v7553_v24  ;;  %5649 = vmatprep.subr.mxu0 %v7553_v24 }
 0x2c0   : > { %5650 = vmatpush3.msra.mxu0 %v4025_v44 }
 0x2c1   : > { %5651 = vmatprep.subr.mxu0 %v7553_v24 }
 0x2c2   : > { %5652 = vmatpush3.msra.mxu0 %v4024_v52 }
 0x2c3   : > { %5653 = vmatprep.subr.mxu0 %v7553_v24 }
 0x333   : > { %v5359_v55 = vpop.f32.mrf.mxu1 }
 0x335   : > { %v5360_v57 = vpop.f32.mrf.mxu1 }
 0x336   : > { %v5361_v25 = vadd.f32 %v5360_v57, %v5359_v55 }
 0x337   : > { %v5362_v16 = vpop.f32.mrf.mxu1 }
 0x338   : > { %v3658_v19 = vadd.f32 %v5361_v25, %v7251_v21 }
 0x339   : > { %v5363_v50 = vpop.f32.mrf.mxu1 }
 0x33a   : > { %v5364_v60 = vadd.f32 %v5363_v50, %v5362_v16 }
 0x33c   : > { %v5365_v61 = vpop.f32.mrf.mxu1  ;;  %v3661_v15 = vadd.f32 %v5364_v60, %v7251_v21 }
 0x33e   : > { %v5366_v18 = vpop.f32.mrf.mxu1 }
 0x33f   : > { %v7244_v6 = vadd.f32 %v5366_v18, %v5365_v61 }
 0x340   : > { %v7246_v9 = vpop.f32.mrf.mxu1 }
 0x341   : > { %v5399_v22 = vpop.f32.mrf.mxu0 }
 0x342   : > { %v7253_v54 = vpop.f32.mrf.mxu1 }
 0x343   : > { %v5400_v41 = vpop.f32.mrf.mxu0 }
 0x344   : > { %v5401_v27 = vadd.f32 %v5400_v41, %v5399_v22  ;;  %v7256_v10 = vpop.f32.mrf.mxu1 }
 0x345   : > { %v5402_v17 = vpop.f32.mrf.mxu0 }
 0x346   : > { %v7258_v32 = vadd.f32 %v5401_v27, %v3658_v19  ;;  %v7260_v33 = vpop.f32.mrf.mxu1 }
 0x347   : > { %v5403_v37 = vpop.f32.mrf.mxu0 }
 0x348   : > { %7613 = vst [vmem:[#allocation25_spill] sm:$0xff] %v7258_v32  ;;  %v5404_v59 = vadd.f32 %v5403_v37, %v5402_v17  ;;  %v5374_v5 = vpop.f32.mrf.mxu1 }
 0x349   : > { %v7265_v48 = vpop.f32.mrf.mxu0 }
 0x34a   : > { %v7263_v45 = vadd.f32 %v5404_v59, %v3661_v15  ;;  %v5375_v7 = vpop.f32.mrf.mxu1 }
 0x34b   : > { %v7267_v26 = vpop.f32.mrf.mxu0  ;;  %v5376_v59 = vadd.f32 %v5375_v7, %v5374_v5 }
 0x34c   : > { %7614 = vst [vmem:[#allocation24_spill] sm:$0xff] %v7263_v45  ;;  %v5377_v38 = vpop.f32.mrf.mxu1 }
 0x34d   : > { %v7269_v63 = vpop.f32.mrf.mxu0  ;;  %v3677_v5 = vadd.f32 %v5376_v59, %v7251_v21 }
 0x34e   : > { %v5378_v31 = vpop.f32.mrf.mxu1 }
 0x34f   : > { %v7271_v2 = vpop.f32.mrf.mxu0  ;;  %v5379_v27 = vadd.f32 %v5378_v31, %v5377_v38 }
 0x350   : > { %v5380_v20 = vpop.f32.mrf.mxu1 }
 0x351   : > { %v5411_v1 = vpop.f32.mrf.mxu0 }
 0x352   : > { %v5381_v58 = vpop.f32.mrf.mxu1 }
 0x353   : > { %v5412_v39 = vpop.f32.mrf.mxu0  ;;  %v5382_v41 = vadd.f32 %v5381_v58, %v5380_v20 }
 0x354   : > { %v5413_v7 = vadd.f32 %v5412_v39, %v5411_v1 }
 0x355   : > { %v5414_v49 = vpop.f32.mrf.mxu0 }
 0x356   : > { %v7273_v42 = vpop.f32.mrf.mxu1 }
 0x357   : > { %v5415_v3 = vpop.f32.mrf.mxu0 }
 0x358   : > { %v7275_v13 = vpop.f32.mrf.mxu1  ;;  %v5416_v20 = vadd.f32 %v5415_v3, %v5414_v49 }
 0x359   : > { %v5417_v14 = vpop.f32.mrf.mxu0 }
 0x35a   : > { %v7277_v43 = vpop.f32.mrf.mxu1  ;;  %v3742_v49 = vadd.f32 %v5416_v20, %v3677_v5 }
 0x35b   : > { %v5418_v36 = vpop.f32.mrf.mxu0 }
 0x35c   : > { %v7279_v40 = vpop.f32.mrf.mxu1  ;;  %v5419_v24 = vadd.f32 %v5418_v36, %v5417_v14 }
 0x35d   : > { %v5420_v34 = vpop.f32.mrf.mxu0 }
 0x35e   : > { %v7281_v12 = vpop.f32.mrf.mxu1 }
 0x35f   : > { %v5421_v51 = vpop.f32.mrf.mxu0 }
 0x360   : > { %v7283_v30 = vpop.f32.mrf.mxu1  ;;  %v5422_v37 = vadd.f32 %v5421_v51, %v5420_v34  ;;  %v5370_v34 = vadd.f32 %v7253_v54, %v7246_v9 }
 0x361   : > { %v7287_v56 = vpop.f32.mrf.mxu0 }
 0x362   : > { %v7285_v8 = vpop.f32.mrf.mxu1  ;;  %7615 = vst [vmem:[#allocation26_spill] sm:$0xff] %v7287_v56  ;;  %v3669_v54 = vadd.f32 %v5370_v34, %v7251_v21 }
 0x363   : > { %v7289_v28 = vpop.f32.mrf.mxu0 }
 0x364   : > { %v5449_v4 = vpop.f32.mrf.mxu1  ;;  %7616 = vst [vmem:[#allocation27_spill] sm:$0xff] %v7289_v28  ;;  %v3685_v28 = vadd.f32 %v5382_v41, %v7251_v21 }
 0x365   : > { %v7291_v35 = vpop.f32.mrf.mxu0 }
 0x366   : > { %v5451_v23 = vpop.f32.mrf.mxu1 }
 0x367   : > { %v7293_v62 = vpop.f32.mrf.mxu0 }
 0x368   : > { %v5452_v47 = vpop.f32.mrf.mxu1 }
 0x369   : > { %v7295_v46 = vpop.f32.mrf.mxu0 }
 0x36a   : > { %v5454_v0 = vpop.f32.mrf.mxu1 }
 0x36b   : > { %v7297_v29 = vpop.f32.mrf.mxu0 }
 0x36c   : > { %v5455_v11 = vpop.f32.mrf.mxu1 }
 0x36d   : > { %v5488_v44 = vpop.f32.mrf.mxu0  ;;  %v5456_v51 = vadd.f32 %v5455_v11, %v5454_v0 }
 0x36e   : > { %v5457_v53 = vpop.f32.mrf.mxu1 }
 0x36f   : > { %v5489_v55 = vpop.f32.mrf.mxu0  ;;  %v3807_v39 = vadd.f32 %v5456_v51, %v3742_v49 }
 0x370   : > { %v5458_v52 = vpop.f32.mrf.mxu1 }
 0x371   : > { %v5491_v25 = vpop.f32.mrf.mxu0  ;;  %v5459_v38 = vadd.f32 %v5458_v52, %v5457_v53 }
 0x372   : > { %v5460_v57 = vpop.f32.mrf.mxu1 }
 0x373   : > { %v5492_v50 = vpop.f32.mrf.mxu0 }
 0x374   : > { %v5461_v16 = vpop.f32.mrf.mxu1 }
 0x375   : > { %v5494_v61 = vpop.f32.mrf.mxu0  ;;  %v5462_v56 = vadd.f32 %v5461_v16, %v5460_v57 }
 0x376   : > { %v7299_v60 = vpop.f32.mrf.mxu1 }
 0x377   : > { %7617 = vst [vmem:[#allocation28_spill] sm:$0xff] %v7299_v60  ;;  %v5495_v22 = vpop.f32.mrf.mxu0  ;;  %v5373_v60 = vadd.f32 %v7260_v33, %v7256_v10  ;;  %v5410_v33 = vadd.f32 %v7271_v2, %v7269_v63  ;;  %v3666_v63 = vadd.f32 %v7244_v6, %v7251_v21  ;;  %v5487_v6 = vadd.f32 %v7297_v29, %v7295_v46  ;;  %v7621_v46 = vld [vmem:[#allocation24_spill] sm:$0xff] }
 0x378   : > { %v7301_v18 = vpop.f32.mrf.mxu1  ;;  %v5496_v52 = vadd.f32 %v5495_v22, %v5494_v61  ;;  %v5490_v61 = vadd.f32 %v5489_v55, %v5488_v44  ;;  %v7622_v55 = vld [vmem:[#allocation26_spill] sm:$0xff] }
 0x379   : > { %7618 = vst [vmem:[#allocation29_spill] sm:$0xff] %v7301_v18  ;;  %v5497_v17 = vpop.f32.mrf.mxu0  ;;  %v3682_v18 = vadd.f32 %v5379_v27, %v7251_v21  ;;  %v3674_v10 = vadd.f32 %v5373_v60, %v7251_v21  ;;  %v3734_v2 = vadd.f32 %v5410_v33, %v3669_v54 }
 0x37a   : > { %v7303_v19 = vpop.f32.mrf.mxu1 }
 0x37b   : > { %7619 = vst [vmem:[#allocation15_spill] sm:$0xff] %v7303_v19  ;;  %v5498_v32 = vpop.f32.mrf.mxu0  ;;  %v3750_v19 = vadd.f32 %v5422_v37, %v3685_v28  ;;  %v3747_v14 = vadd.f32 %v5419_v24, %v3682_v18  ;;  %v5453_v28 = vadd.f32 %v5452_v47, %v5451_v23  ;;  %v5407_v24 = vadd.f32 %v7267_v26, %v7265_v48 }
 0x37c   : > { %v7305_v15 = vpop.f32.mrf.mxu1  ;;  %v5499_v16 = vadd.f32 %v5498_v32, %v5497_v17  ;;  %v3739_v1 = vadd.f32 %v5413_v7, %v3674_v10  ;;  %v5450_v32 = vadd.f32 %v5449_v4, %v7285_v8  ;;  %v5447_v23 = vadd.f32 %v7283_v30, %v7281_v12  ;;  %v4110_v7 = vld [vmem:[%s7522_s5] sm:$0xff] }
 0x37d   : > { %v5500_v58 = vpop.f32.mrf.mxu0  ;;  %v3815_v57 = vadd.f32 %v5462_v56, %v3750_v19  ;;  %v3812_v53 = vadd.f32 %v5459_v38, %v3747_v14  ;;  %v5493_v56 = vadd.f32 %v5492_v50, %v5491_v25  ;;  %v3872_v48 = vadd.f32 %v5496_v52, %v3807_v39  ;;  %v7623_v50 = vld [vmem:[#allocation27_spill] sm:$0xff] }
 0x37e   : > { %v5602_v45 = vpop.f32.mrf.mxu1  ;;  %v3804_v60 = vadd.f32 %v5453_v28, %v3739_v1  ;;  %v3731_v26 = vadd.f32 %v5407_v24, %v3666_v63  ;;  %v5444_v8 = vadd.f32 %v7279_v40, %v7277_v43  ;;  %v7620_v4 = vmov 0.0   ;;  %v7626_v27 = vld [vmem:[#allocation28_spill] sm:$0xff]  ;;  %v5007_v28 = vld [vmem:[%s7525_s8] ss:$0 sm:$0xff]  ;;  %v4361_v63 = vld [vmem:[%s7529_s12 + $0x10] sm:$0xff] }
 0x37f   : > { %v5501_v36 = vpop.f32.mrf.mxu0  ;;  %v3877_v0 = vadd.f32 %v5499_v16, %v3812_v53  ;;  %v3799_v25 = vadd.f32 %v5450_v32, %v3734_v2  ;;  %v5484_v43 = vadd.f32 %v7293_v62, %v7291_v35  ;;  %v5481_v22 = vadd.f32 %v7623_v50, %v7622_v55  ;;  %v7625_v35 = vld [vmem:[#allocation25_spill] sm:$0xff]  ;;  %v5005_v16 = vld [vmem:[%s7523_s6] ss:$0 sm:$0xff]  ;;  %v6068_v50 = vld [vmem:[%s6377_s22 + $0x18] sm:$0xff] }
 0x380   : > { %v3933_v31 = vpop.f32.mrf.mxu1  ;;  %v5502_v41 = vadd.f32 %v5501_v36, %v5500_v58  ;;  %v3869_v21 = vadd.f32 %v5493_v56, %v3804_v60  ;;  %v3796_v30 = vadd.f32 %v5447_v23, %v3731_v26  ;;  %v3791_v29 = vadd.f32 %v5444_v8, %v7621_v46  ;;  %v7627_v58 = vld [vmem:[#allocation29_spill] sm:$0xff]  ;;  %v4359_v39 = vld [vmem:[%s7529_s12] sm:$0xff]  ;;  %v4362_v23 = vld [vmem:[%s7529_s12 + $0x18] sm:$0xff] }
 0x381   : > { %v7327_v18 = vadd.f32 %v5602_v45, %v3877_v0  ;;  %v5441_v45 = vadd.f32 %v7275_v13, %v7273_v42  ;;  %v3864_v40 = vadd.f32 %v5490_v61, %v3799_v25  ;;  %v4360_v0 = vld [vmem:[%s7529_s12 + $0x8] sm:$0xff]  ;;  %v4365_v61 = vld [vmem:[%s7529_s12 + $0x30] sm:$0xff] }
 0x382   : > { %v5603_v3 = vpop.f32.mrf.mxu1  ;;  %v3880_v9 = vadd.f32 %v5502_v41, %v3815_v57  ;;  %v7343_v44 = vadd.f32 %v3933_v31, %v3869_v21  ;;  %v3861_v19 = vadd.f32 %v5487_v6, %v3796_v30  ;;  %v7624_v42 = vld [vmem:[#allocation15_spill] sm:$0xff]  ;;  %v3856_v37 = vadd.f32 %v5484_v43, %v3791_v29  ;;  %v4364_v60 = vld [vmem:[%s7529_s12 + $0x28] sm:$0xff] }
 0x383   : > { %v7351_v13 = vadd.f32 %v7624_v42, %v3864_v40  ;;  %v3788_v62 = vadd.f32 %v5441_v45, %v7625_v35  ;;  %v3948_v31 = vld [vmem:[%s7528_s11] sm:$0xf]  ;;  %v6066_v25 = vld [vmem:[%s6377_s22 + $0x8] sm:$0xff] }
 0x384   : > { %v7321_v11 = vadd.f32 %v5603_v3, %v3880_v9  ;;  %v3936_v47 = vpop.f32.mrf.mxu1  ;;  %v7357_v17 = vadd.f32 %v7626_v27, %v3861_v19  ;;  %v7362_v20 = vadd.f32 %v7305_v15, %v3856_v37  ;;  %v4023_v15 = vld [vmem:[%s7526_s9] sm:$0xff] }
 0x385   : > { %v7335_v12 = vadd.f32 %v3936_v47, %v3872_v48  ;;  %v3853_v59 = vadd.f32 %v5481_v22, %v3788_v62  ;;  %5654 = vmatpush3.msra.mxu0 %v4023_v15  ;;  %v4193_v57 = vld [vmem:[%s7524_s7] sm:$0x3]  ;;  %v4366_v48 = vld [vmem:[%s7529_s12 + $0x38] sm:$0xff]  ;;  %v6069_v62 = vld [vmem:[%s6377_s22 + $0x10] sm:$0xff] }
 0x386   : > { %5605 = vmatpush3.msra.mxu1 %v7321_v11  ;;  %5658 = vmatprep.subr.mxu0 %v7620_v4  ;;  %v4285_v3 = vld [vmem:[%s7527_s10] sm:$0xff] }
 0x387   : > { %5606 = vmatprep.subr.mxu1 %v7620_v4  ;;  %v7367_v38 = vadd.f32 %v7627_v58, %v3853_v59  ;;  %v4363_v47 = vld [vmem:[%s7529_s12 + $0x20] sm:$0xff] }
 0x388   : > { %5607 = vmatpush3.msra.mxu1 %v7327_v18  ;;  %v6067_v43 = vld [vmem:[%s6377_s22] sm:$0xff] }
 0x389   : > { %5608 = vmatprep.subr.mxu1 %v7620_v4  ;;  %v6071_v15 = vld [vmem:[%s6377_s22 + $0x20] sm:$0xff] }
 0x38a   : > { %5609 = vmatpush3.msra.mxu1 %v7335_v12 }
 0x38b   : > { %5610 = vmatprep.subr.mxu1 %v7620_v4 }
 0x38c   : > { %5611 = vmatpush3.msra.mxu1 %v7343_v44 }
 0x38d   : > { %5612 = vmatprep.subr.mxu1 %v7620_v4 }
 0x38e   : > { %5613 = vmatpush3.msra.mxu1 %v7351_v13 }
 0x38f   : > { %5614 = vmatprep.subr.mxu1 %v7620_v4 }
 0x390   : > { %5615 = vmatpush3.msra.mxu1 %v7357_v17 }
 0x391   : > { %5616 = vmatprep.subr.mxu1 %v7620_v4 }
 0x392   : > { %5617 = vmatpush3.msra.mxu1 %v7362_v20 }
 0x393   : > { %5618 = vmatprep.subr.mxu1 %v7620_v4 }
 0x394   : > { %5619 = vmatpush3.msra.mxu1 %v7367_v38 }
 0x395   : > { %5621 = vmatmul.mubr.msk.f32.vlgmr.msra.gmra.mxu1 %vm3949_vm11, %v3948_v31  ;;  %5663 = vmatprep.subr.mxu1 %v7620_v4 }
 0x396   : > { %5665 = vmatprep.mubr.msk.f32.mxu1 %vm6203_vm10, %v7620_v4  ;;  %5664 = vmatpush3.msk.msra.mxu1 %vm4205_vm13, %v4193_v57  ;;  %v6073_v57 = vld [vmem:[%s6377_s22 + $0x30] sm:$0xff] }
 0x397   : > { %5668 = vmatprep.subr.mxu1 %v7620_v4 }
 0x455   : > { %v4019_v34 = vpop.f32.mrf.mxu1 }
 0x456   : > { %5656 = vmatmul.mubr.f32.vlgmr.msra.gmra.mxu0 %v4019_v34 }
 0x457   : > { %v5622_v5 = vpop.f32.mrf.mxu1  ;;  %5660 = vmatprep.mubr.msk.f32.mxu0 %vm6203_vm10, %v7620_v4  ;;  %5659 = vmatpush3.msra.mxu0 %v4110_v7 }
 0x516   : > { %v4105_v14 = vpop.f32.mrf.mxu0 }
 0x517   : > { %v4109_v36 = vmul.f32 0.00390625, %v4105_v14  ;;  %v6072_v14 = vld [vmem:[%s6377_s22 + $0x38] sm:$0xff] }
 0x518   : > { %v5657_v51 = vpop.f32.mrf.mxu0 }
 0x519   : > { %5661 = vmatmul.mubr.msk.f32.vlgmr.msra.gmra.mxu0 %vm4118_vm12, %v4109_v36 }
 0x5d9   : > { %v4188_v41 = vpop.f32.mrf.mxu0 }
 0x5da   : > { %v4189_v10 = vadd.f32 %v5005_v16, %v4188_v41 }
 0x5db   : > { %v5662_v33 = vpop.f32.mrf.mxu0 }
 0x5dc   : > { %v4192_v49 = vmax.f32 %v4189_v10, 0.0 }
 0x5de   : > { %5666 = vmatmul.mubr.msk.f32.vlgmr.msra.gmra.mxu1 %vm4201_vm14, %v4192_v49 }
 0x5df   : > { %5670 = vmatprep.mubr.msk.f32.mxu1 %vm6203_vm10, %v7620_v4  ;;  %5669 = vmatpush3.msra.mxu1 %v4285_v3 }
 0x69e   : > { %v4275_v53 = vpop.f32.mrf.mxu1 }
 0x69f   : > { %v4276_v52 = vadd.f32 %v5007_v28, %v4275_v53 }
 0x6a0   : > { %v5667_v9 = vpop.f32.mrf.mxu1 }
 0x6a1   : > { %v5010_v54 = vmul.f32 -1.442695, %v4276_v52 }
 0x6a3   : > { %6062 = vpow2.f32 %v5010_v54 }
 0x6b0   : > { %v6063_v24 = vpop.eup %6062 }
 0x6b1   : > { %v4282_v1 = vadd.f32 1.0, %v6063_v24 }
 0x6b3   : > { %6064 = vrcp.f32 %v4282_v1 }
 0x6c0   : > { %v6065_v32 = vpop.eup %6064 }
 0x6c1   : > { %5671 = vmatmul.mubr.msk.f32.vlgmr.msra.gmra.mxu1 %vm4118_vm12, %v6065_v32 }
 0x6c2   : > { %5675 = vmatprep.mubr.msk.f32.mxu1 %vm4367_vm15, %v4359_v39 }
 0x781   : > { %v4355_v56 = vpop.f32.mrf.mxu1 }
 0x782   : > { %5673 = vmatprep.subr.msk.mxu1 %vm4392_vm0, %v4355_v56 }
 0x783   : > { %v5672_v2 = vpop.f32.mrf.mxu1  ;;  %5674 = vmatpush3.msk.msra.mxu1 %vm4392_vm0, %v4355_v56 }
 0x784   : > { %5676 = vmatmul.mubr.msk.f32.vlgmr.msra.gmra.mxu1 %vm4367_vm15, %v4360_v0 }
 0x785   : > { %5678 = vmatprep.mubr.msk.f32.mxu1 %vm4367_vm15, %v4361_v63 }
 0x788   : > { %5679 = vmatmul.mubr.msk.f32.gmra.mxu1 %vm4367_vm15, %v4362_v23 }
 0x789   : > { %5681 = vmatprep.mubr.msk.f32.mxu1 %vm4367_vm15, %v4363_v47 }
 0x78c   : > { %5682 = vmatmul.mubr.msk.f32.gmra.mxu1 %vm4367_vm15, %v4364_v60 }
 0x78d   : > { %5684 = vmatprep.mubr.msk.f32.mxu1 %vm4367_vm15, %v4365_v61 }
 0x790   : > { %5685 = vmatmul.mubr.msk.f32.gmra.mxu1 %vm4367_vm15, %v4366_v48 }
 0x844   : > { %v5677_v26 = vpop.f32.mrf.mxu1 }
 0x845   : > { %v4502_v8 = vmul.f32 %v5677_v26, %v7362_v20  ;;  %v6070_v20 = vld [vmem:[%s6377_s22 + $0x28] sm:$0xff]  ;;  %s6204_s22 = smov [#allocation8]  }
 0x846   : > { %v4462_v4 = vpop.f32.mrf.mxu1  ;;  %s6130_s24 = sshll.u32 %s6204_s22, 4  ;;  %s6131_s24 = int_to_ptr.vmem [resolvable:$false] %s6130_s24 }
 0x847   : > { %v4510_v6 = vadd.f32 %v6066_v25, %v4502_v8  ;;  %v4501_v21 = vmul.f32 %v4462_v4, %v7367_v38  ;;  %s6132_s23 = scalar_lea.vmem %s6131_s24, 2048  ;;  %p6133_p11 = scmp.lt.s32.totalorder %s7465_s27, %s6131_s24 }
 0x848   : > { %v5680_v45 = vpop.f32.mrf.mxu1  ;;  %p6134_p0 = scmp.lt.s32.totalorder %s6132_s23, %s6126_s29 }
 0x849   : > { %v4518_v30 = vmax.f32 %v4510_v6, 0.0  ;;  %v4509_v40 = vadd.f32 %v6067_v43, %v4501_v21  ;;  %v4504_v46 = vmul.f32 %v5680_v45, %v7351_v13 }
 0x84a   : > { %v4472_v29 = vpop.f32.mrf.mxu1  ;;  %p6135_p1 = por %p6134_p0, %p6133_p11 }
 0x84b   : > { %4526 = vst [vmem:[%s7444_s15 + $0x8] sm:$0xff] %v4518_v30  ;;  %v4517_v55 = vmax.f32 %v4509_v40, 0.0  ;;  %v4512_v22 = vadd.f32 %v6068_v50, %v4504_v46  ;;  %v4503_v19 = vmul.f32 %v4472_v29, %v7357_v17 }
 0x84c   : > { %v5683_v42 = vpop.f32.mrf.mxu1  ;;  %p6136_p3 = pnand %p6135_p1, %p6129_p8 }
 0x84d   : > { %4525 = vst [vmem:[%s7444_s15] sm:$0xff] %v4517_v55  ;;  %v4520_v35 = vmax.f32 %v4512_v22, 0.0  ;;  %v4511_v13 = vadd.f32 %v6069_v62, %v4503_v19  ;;  %v4506_v27 = vmul.f32 %v5683_v42, %v7335_v12 }
 0x84e   : > { %v4482_v37 = vpop.f32.mrf.mxu1 }
 0x84f   : > { %4528 = vst [vmem:[%s7444_s15 + $0x18] sm:$0xff] %v4520_v35  ;;  %v4519_v59 = vmax.f32 %v4511_v13, 0.0  ;;  %v4514_v58 = vadd.f32 %v6070_v20, %v4506_v27  ;;  %v4505_v17 = vmul.f32 %v4482_v37, %v7343_v44 }
 0x850   : > { %v5686_v38 = vpop.f32.mrf.mxu1 }
 0x851   : > { %4527 = vst [vmem:[%s7444_s15 + $0x10] sm:$0xff] %v4519_v59  ;;  %v4522_v31 = vmax.f32 %v4514_v58, 0.0  ;;  %v4513_v34 = vadd.f32 %v6071_v15, %v4505_v17  ;;  %v4508_v5 = vmul.f32 %v5686_v38, %v7321_v11 }
 0x852   : > { %v4492_v12 = vpop.f32.mrf.mxu1 }
 0x853   : > { %4530 = vst [vmem:[%s7444_s15 + $0x28] sm:$0xff] %v4522_v31  ;;  %v4521_v7 = vmax.f32 %v4513_v34, 0.0  ;;  %v4516_v36 = vadd.f32 %v6072_v14, %v4508_v5  ;;  %v4507_v44 = vmul.f32 %v4492_v12, %v7327_v18 }
 0x855   : > { %4529 = vst [vmem:[%s7444_s15 + $0x20] sm:$0xff] %v4521_v7  ;;  %v4524_v51 = vmax.f32 %v4516_v36, 0.0  ;;  %v4515_v16 = vadd.f32 %v6073_v57, %v4507_v44 }
 0x857   : > { %4532 = vst [vmem:[%s7444_s15 + $0x38] sm:$0xff] %v4524_v51  ;;  %v4523_v11 = vmax.f32 %v4515_v16, 0.0 }
 0x859   : > { %4531 = vst [vmem:[%s7444_s15 + $0x30] sm:$0xff] %v4523_v11 }
 0x85a   : > { %6139 = shalt.err (!%p6136_p3)
}
 0x85b   : > { %s6140_s21 = scalar_lea.hbm %s7471_s30, 1024  ;;  %s6144_s17 = scalar_lea.hbm %s7530_s13, 2048 }
 0x85c   : > { %p6141_p2 = scmp.ne.s32.totalorder %s7471_s30, %s6140_s21  ;;  %p6145_p7 = scmp.lt.s32.totalorder %s7471_s30, %s7530_s13 }
 0x85d   : > { %p6146_p6 = scmp.lt.s32.totalorder %s6144_s17, %s6140_s21 }
 0x85e   : > { %p6142_p4 = pnand %p6141_p2, %p6314_p5 }
 0x85f   : > { %p6147_p9 = por %p6146_p6, %p6145_p7 }
 0x860   : > { %p6143_p13 = pneg %p6142_p4 }
 0x862   : > { %p6148_p10 = pnand %p6147_p9, %p6143_p13 }
 0x864   : > { %6151 = shalt.err (!%p6148_p10)
}
 0x865   : > { %s6205_s23 = smov 128   ;;  %s7628_s29 = smov 8  }
 0x866   : > { %5695 = dma.vmem_to_hbm [thread:$0]  (%p6314_p5), %s7465_s27, 1024, %s7471_s30, %s7476_s16, %s6205_s23, %s6205_s23, %s7628_s29  }
 0x867 PF: > { %p5712_p12 = scmp.ge.s32.totalorder %s6194_s28, 2  ;;  %s4562_s24 = sand.u32 1, %s6182_s25  }
 0x868   : > { %p7629_p8 = scmp.ne.s32.totalorder %s7560_s19, 0  ;;  %s4563_s21 = scalar_lea.sflag [#allocation5], %s4562_s24 }
 0x86a   : > { %p5705_p11 = pnand %p5712_p12, %p7629_p8 }
 0x86c   : > { %p5706_p0 = pneg %p5705_p11 }
 0x86e   : > { %6177 = dma.done.wait (%p5706_p0), %s4563_s21, 1024  }
 0x86f   : > { %6179 = vsyncadd (%p5706_p0), %s4563_s21, 4294966272  ;;  %s7630_s28 = sld [smem:[#allocation13_spill]]  ;;  %s7633_s25 = smov %s6186_s26 }
 0x870   : > { %s7631_s18 = sld [smem:[#allocation12_spill]] }
 0x871   : > { %s7632_s27 = sld [smem:[#allocation14_spill]] }
 0x875   : > { %p25_p1 = scmp.ge.s32.totalorder %s7630_s28, 4  }
 0x876   : > { %s7634_s26 = smov %s7631_s18 }
 0x877   :  { %27 = sbr.rel (!%p25_p1) target bundleno = 5 (0x5), region = 116 }
 0x87c   :  { %4568 = vsyncpa [#allocation4], 1 }
 0x87d   :  { %4570 = vsyncpa [#allocation4 + $0x1], 1 }
 0x87e   :  { %4571 = vsyncpa [#allocation7], 1 }
 0x87f   :  { %4572 = vsyncpa [#allocation5], 1 }
 0x880   :  { %4574 = vsyncpa [#allocation5 + $0x1], 1 }

</bundles_post_ra>
